<compile_context>
chip_gen: v7x
topology: tpu7x:2x2x1
jax: 0.10.0
libtpu: 0.0.40
codegen_flags: <defaults>
</compile_context>

<pallas_src>
import math
from functools import partial

import numpy as np
import jax
import jax.numpy as jnp
from jax import lax
from jax.experimental import pallas as pl
from jax.experimental.pallas import tpu as pltpu


# ---------------------------------------------------------------------------
# math helpers
# ---------------------------------------------------------------------------
def _gelu_exact(x):
    # PyTorch nn.GELU() default = exact erf formulation
    return 0.5 * x * (1.0 + lax.erf(x * (1.0 / math.sqrt(2.0))))


def _layernorm_cols(xT, g, b, eps=1e-5):
    # xT: (C, N) feature-major tile; normalize over the feature axis (axis 0)
    # g, b: (C, 1) column vectors (broadcast over tokens / lanes).
    mu = jnp.mean(xT, axis=0, keepdims=True)
    xc = xT - mu
    var = jnp.mean(xc * xc, axis=0, keepdims=True)
    return xc * lax.rsqrt(var + eps) * g + b


def _layernorm_rows(x, g, b, eps=1e-5):
    mu = jnp.mean(x, axis=-1, keepdims=True)
    xc = x - mu
    var = jnp.mean(xc * xc, axis=-1, keepdims=True)
    return xc * lax.rsqrt(var + eps) * g + b


# ---------------------------------------------------------------------------
# Pallas kernel: full transformer encoder block, `batch_block` batches / step
# ---------------------------------------------------------------------------
def make_encoder_kernel(num_heads, head_dim_padded, batch_block):
    nh, dp, bb = num_heads, head_dim_padded, batch_block

    def kernel(x_ref, wqkv_ref, wo_ref, w1_ref, w2_ref, vecs_ref, o_ref):
        _, C, L = x_ref.shape
        Cq = nh * dp                       # padded per-head channels (sublane aligned)
        BL = bb * L                        # lane-packed token count
        f32 = jnp.float32

        # ---- parameters (one packed array for every small vector) ---------
        wqkv = wqkv_ref[...]               # (3*Cq, C); 1/sqrt(d) folded into Q rows
        wo = wo_ref[...]                   # (C, Cq);  zero cols at padded head dims
        w1 = w1_ref[...]                   # (4C, C)
        w2 = w2_ref[...]                   # (C, 4C)
        vecs = vecs_ref[...]               # (R, 8) packed column vectors
        bqkv = vecs[:3 * Cq, 0:1]          # (3Cq, 1)
        b1 = vecs[:4 * C, 1:2]             # (4C, 1)
        ln1g = vecs[:C, 2:3]
        ln1b = vecs[:C, 3:4]
        ln2g = vecs[:C, 4:5]
        ln2b = vecs[:C, 5:6]
        bo = vecs[:C, 6:7]
        b2 = vecs[:C, 7:8]

        # ---- lane-pack the batch_block elements along the token axis ------
        if bb == 1:
            X = x_ref[0]                                             # (C, L)
        else:
            X = jnp.concatenate([x_ref[i] for i in range(bb)], axis=-1)  # (C, BL)

        # ================= attention branch (feature-major) ================
        xn = _layernorm_cols(X, ln1g, ln1b)                          # (C, BL)
        qkv = jnp.dot(wqkv, xn, preferred_element_type=f32) + bqkv   # (3Cq, BL)
        q = qkv[0 * Cq:1 * Cq]                                       # (Cq, BL)
        k = qkv[1 * Cq:2 * Cq]
        v = qkv[2 * Cq:3 * Cq]

        # head split: aligned 8-sublane reshapes (dp == 8)
        qh = jnp.swapaxes(q.reshape(nh, dp, BL), 1, 2)               # (nh, BL, dp)
        kh = k.reshape(nh, dp, BL)                                   # (nh, dp, BL)
        vh = v.reshape(nh, dp, BL)                                   # (nh, dp, BL)

        dn_qk = (((2,), (1,)), ((0,), (0,)))   # (h,q,d) x (h,d,k) -> (h,q,k)
        dn_pv = (((2,), (2,)), ((0,), (0,)))   # (h,d,k) x (h,q,k) -> (h,d,q)

        ctx_slabs = []
        for i in range(bb):                # attention never mixes batch elements
            cs = slice(i * L, (i + 1) * L)
            qb = qh[:, cs, :]              # (nh, L, dp)
            kb = kh[:, :, cs]              # (nh, dp, L)
            vb = vh[:, :, cs]              # (nh, dp, L)
            s = lax.dot_general(qb, kb, dn_qk, preferred_element_type=f32)   # (nh,L,L)
            s = s - jnp.max(s, axis=-1, keepdims=True)
            p = jnp.exp(s)
            p = p * pl.reciprocal(jnp.sum(p, axis=-1, keepdims=True), approx=True)
            ctx = lax.dot_general(vb, p, dn_pv, preferred_element_type=f32)  # (nh,dp,L)
            ctx_slabs.append(ctx.reshape(Cq, L))                     # feature-major
        ctx_full = ctx_slabs[0] if bb == 1 else jnp.concatenate(ctx_slabs, axis=-1)

        attn = jnp.dot(wo, ctx_full, preferred_element_type=f32) + bo    # (C, BL)
        x1 = X + attn                                                    # residual 1

        # ========================== MLP branch =============================
        xn2 = _layernorm_cols(x1, ln2g, ln2b)
        h1 = _gelu_exact(jnp.dot(w1, xn2, preferred_element_type=f32) + b1)  # (4C, BL)
        h2 = jnp.dot(w2, h1, preferred_element_type=f32) + b2                # (C, BL)
        out = x1 + h2                                                        # residual 2

        # un-pack the lane-packed batch elements into the (bb, C, L) output
        if bb == 1:
            o_ref[0] = out
        else:
            for i in range(bb):
                o_ref[i] = out[:, i * L:(i + 1) * L]

    return kernel


# ---------------------------------------------------------------------------
# wrapper
# ---------------------------------------------------------------------------
def _default_batch_block(batch):
    try:
        kind = jax.devices()[0].device_kind.lower()
    except Exception:
        kind = ""
    if "v7" in kind:
        # 2 TensorCores: keep the grid length even so both cores stay busy;
        # lane-pack pairs only when there is still >= 1 step per core.
        return 2 if (batch % 4 == 0) else 1
    # single-TensorCore chips: lane-pack a pair of batch elements
    # (L=64 -> 128 lanes) and fold the batch into fewer grid steps.
    return 2 if (batch % 2 == 0) else 1


@partial(jax.jit, static_argnums=(2, 3, 4))
def _encoder_fwd(x, kernel_params, num_heads, head_dim_padded, batch_block):
    B, C, H, W = x.shape
    L = H * W
    xs = x.reshape(B, C, L)                      # free view of NCHW, no transpose

    def param_spec(p):
        nd = p.ndim
        return pl.BlockSpec(p.shape, lambda i, _nd=nd: (0,) * _nd)

    in_specs = [pl.BlockSpec((batch_block, C, L), lambda i: (i, 0, 0))]
    in_specs += [param_spec(p) for p in kernel_params]

    out = pl.pallas_call(
        make_encoder_kernel(num_heads, head_dim_padded, batch_block),
        out_shape=jax.ShapeDtypeStruct((B, C, L), jnp.float32),
        grid=(B // batch_block,),
        in_specs=in_specs,
        out_specs=pl.BlockSpec((batch_block, C, L), lambda i: (i, 0, 0)),
        compiler_params=pltpu.CompilerParams(dimension_semantics=("parallel",)),
    )(xs, *kernel_params)
    return out.reshape(B, C, H, W)               # free reshape back to NCHW


def transformer_encoder_pallas(x, kernel_params, num_heads, head_dim_padded,
                               batch_block=None):
    B = x.shape[0]
    bb = _default_batch_block(B) if batch_block is None else batch_block
    if B % bb != 0:
        bb = 1
    return _encoder_fwd(x, tuple(kernel_params), num_heads, head_dim_padded, bb)


# ---------------------------------------------------------------------------
# deterministic synthetic parameters, PyTorch (out, in) convention
# ---------------------------------------------------------------------------
def init_params(key, dim, mlp_ratio=4):
    ks = jax.random.split(key, 12)
    s = 0.05
    f32 = jnp.float32
    ln1g = jnp.ones((dim,), f32)
    ln1b = jnp.zeros((dim,), f32)
    wq = jax.random.normal(ks[0], (dim, dim), f32) * s
    wk = jax.random.normal(ks[1], (dim, dim), f32) * s
    wv = jax.random.normal(ks[2], (dim, dim), f32) * s
    bq = jax.random.normal(ks[3], (dim,), f32) * s
    bk = jax.random.normal(ks[4], (dim,), f32) * s
    bv = jax.random.normal(ks[5], (dim,), f32) * s
    wo = jax.random.normal(ks[6], (dim, dim), f32) * s
    bo = jax.random.normal(ks[7], (dim,), f32) * s
    ln2g = jnp.ones((dim,), f32)
    ln2b = jnp.zeros((dim,), f32)
    w1 = jax.random.normal(ks[8], (dim * mlp_ratio, dim), f32) * s
    b1 = jax.random.normal(ks[9], (dim * mlp_ratio,), f32) * s
    w2 = jax.random.normal(ks[10], (dim, dim * mlp_ratio), f32) * s
    b2 = jax.random.normal(ks[11], (dim,), f32) * s
    return (ln1g, ln1b, wq, wk, wv, bq, bk, bv, wo, bo,
            ln2g, ln2b, w1, b1, w2, b2)


def prepare_kernel_params(params, num_heads):
    """One-time host-side re-layout of the PyTorch-convention parameters:
      * QKV fused into one (3*Cq, C) matrix (1/sqrt(d) folded into Q rows),
      * head dim zero-padded to dp=8 so in-kernel head reshapes are aligned,
      * Wo padded to (C, Cq) with zero columns at the padded head dims,
      * every small vector packed into one (R, 8) lane-padded array."""
    (ln1g, ln1b, wq, wk, wv, bq, bk, bv, wo, bo,
     ln2g, ln2b, w1, b1, w2, b2) = params
    C = wq.shape[0]
    nh = num_heads
    d = C // nh
    dp = max(8, ((d + 7) // 8) * 8)
    Cq = nh * dp
    scale = 1.0 / math.sqrt(d)

    def pad_head_rows(w, bvec):
        # (nh*d, C) weight / (nh*d,) bias -> (nh*dp, C) / (nh*dp,), zero padded
        w3 = w.reshape(nh, d, C)
        b3 = bvec.reshape(nh, d)
        wp = jnp.zeros((nh, dp, C), jnp.float32).at[:, :d, :].set(w3)
        bp = jnp.zeros((nh, dp), jnp.float32).at[:, :d].set(b3)
        return wp.reshape(Cq, C), bp.reshape(Cq)

    wq_p, bq_p = pad_head_rows(wq * scale, bq * scale)
    wk_p, bk_p = pad_head_rows(wk, bk)
    wv_p, bv_p = pad_head_rows(wv, bv)
    wqkv = jnp.concatenate([wq_p, wk_p, wv_p], axis=0)       # (3Cq, C)
    bqkv = jnp.concatenate([bq_p, bk_p, bv_p], axis=0)       # (3Cq,)

    wo3 = wo.reshape(C, nh, d)
    wo_p = jnp.zeros((C, nh, dp), jnp.float32).at[:, :, :d].set(wo3).reshape(C, Cq)

    R = max(3 * Cq, 4 * C)

    def col(vec):
        v = jnp.zeros((R,), jnp.float32).at[:vec.shape[0]].set(vec)
        return v[:, None]

    vecs = jnp.concatenate(
        [col(bqkv), col(b1), col(ln1g), col(ln1b),
         col(ln2g), col(ln2b), col(bo), col(b2)], axis=1)    # (R, 8)

    kernel_params = (wqkv, wo_p, w1, w2, vecs)
    return kernel_params, dp


# ---------------------------------------------------------------------------
# pure-JAX reference (mirrors PyTorch MultiheadAttention / LayerNorm / GELU)
# ---------------------------------------------------------------------------
def transformer_encoder_ref(x, params, num_heads):
    B, C, H, W = x.shape
    L = H * W
    (ln1g, ln1b, wq, wk, wv, bq, bk, bv, wo, bo,
     ln2g, ln2b, w1, b1, w2, b2) = params
    d = C // num_heads
    xs = jnp.transpose(x.reshape(B, C, L), (0, 2, 1))   # (B, L, C)

    def one(xb):
        xn = _layernorm_rows(xb, ln1g, ln1b)
        q = xn @ wq.T + bq
        k = xn @ wk.T + bk
        v = xn @ wv.T + bv
        qh = q.reshape(L, num_heads, d).transpose(1, 0, 2)
        kh = k.reshape(L, num_heads, d).transpose(1, 0, 2)
        vh = v.reshape(L, num_heads, d).transpose(1, 0, 2)
        s = jnp.einsum("hqd,hkd->hqk", qh, kh) / math.sqrt(d)
        p = jax.nn.softmax(s, axis=-1)
        o = jnp.einsum("hqk,hkd->hqd", p, vh).transpose(1, 0, 2).reshape(L, C)
        attn = o @ wo.T + bo
        x1 = xb + attn
        xn2 = _layernorm_rows(x1, ln2g, ln2b)
        h = _gelu_exact(xn2 @ w1.T + b1)
        return x1 + h @ w2.T + b2

    out = jax.vmap(one)(xs)
    return jnp.transpose(out, (0, 2, 1)).reshape(B, C, H, W)


if __name__ == "__main__":
    key = jax.random.PRNGKey(0)
    B, C, H, W = 2, 32, 8, 8            # dim=32, num_heads=8 -> head_dim=4
    num_heads = 8
    kx, kp = jax.random.split(key)
    x = jax.random.normal(kx, (B, C, H, W), jnp.float32)
    params = init_params(kp, C)
    kparams, head_dim_padded = prepare_kernel_params(params, num_heads)

    out = transformer_encoder_pallas(x, kparams, num_heads, head_dim_padded)
    jax.block_until_ready(out)

    ref = transformer_encoder_ref(x, params, num_heads)
    assert out.shape == (B, C, H, W)
    # tolerance covers the EUP approximate reciprocal in the softmax
    # normalization (everything else is exact-f32 up to accumulation order).
    np.testing.assert_allclose(np.asarray(out), np.asarray(ref),
                               rtol=1e-3, atol=1e-3)
    print("KERNEL_OK")
</pallas_src>

<mosaic_0001>
module attributes {stable_mosaic.version = 11 : i64} {
  func.func @kernel(%arg0: i32, %arg1: memref<2x32x64xf32, #tpu.memory_space<vmem>>, %arg2: memref<192x32xf32, #tpu.memory_space<vmem>>, %arg3: memref<32x64xf32, #tpu.memory_space<vmem>>, %arg4: memref<128x32xf32, #tpu.memory_space<vmem>>, %arg5: memref<32x128xf32, #tpu.memory_space<vmem>>, %arg6: memref<192x8xf32, #tpu.memory_space<vmem>>, %arg7: memref<2x32x64xf32, #tpu.memory_space<vmem>>) attributes {dimension_semantics = [#tpu.dimension_semantics<parallel>], iteration_bounds = array<i64: 1>, scalar_prefetch = 0 : i64, scratch_operands = 0 : i64, tpu.core_type = #tpu.core_type<tc>, window_params = [{transform_indices = @transform_0, window_bounds = array<i64: 2, 32, 64>}, {pipeline_mode = #tpu.pipeline_mode<synchronous>, transform_indices = @transform_1, window_bounds = array<i64: 192, 32>}, {pipeline_mode = #tpu.pipeline_mode<synchronous>, transform_indices = @transform_2, window_bounds = array<i64: 32, 64>}, {pipeline_mode = #tpu.pipeline_mode<synchronous>, transform_indices = @transform_3, window_bounds = array<i64: 128, 32>}, {pipeline_mode = #tpu.pipeline_mode<synchronous>, transform_indices = @transform_4, window_bounds = array<i64: 32, 128>}, {pipeline_mode = #tpu.pipeline_mode<synchronous>, transform_indices = @transform_5, window_bounds = array<i64: 192, 8>}, {transform_indices = @transform_6, window_bounds = array<i64: 2, 32, 64>}]} {
    %c0 = arith.constant 0 : index
    %c0_0 = arith.constant 0 : index
    %0 = vector.load %arg2[%c0, %c0_0] : memref<192x32xf32, #tpu.memory_space<vmem>>, vector<192x32xf32>
    %c0_1 = arith.constant 0 : index
    %c0_2 = arith.constant 0 : index
    %1 = vector.load %arg3[%c0_1, %c0_2] : memref<32x64xf32, #tpu.memory_space<vmem>>, vector<32x64xf32>
    %c0_3 = arith.constant 0 : index
    %c0_4 = arith.constant 0 : index
    %2 = vector.load %arg4[%c0_3, %c0_4] : memref<128x32xf32, #tpu.memory_space<vmem>>, vector<128x32xf32>
    %c0_5 = arith.constant 0 : index
    %c0_6 = arith.constant 0 : index
    %3 = vector.load %arg5[%c0_5, %c0_6] : memref<32x128xf32, #tpu.memory_space<vmem>>, vector<32x128xf32>
    %c0_7 = arith.constant 0 : index
    %c0_8 = arith.constant 0 : index
    %4 = vector.load %arg6[%c0_7, %c0_8] : memref<192x8xf32, #tpu.memory_space<vmem>>, vector<192x8xf32>
    %5 = vector.extract_strided_slice %4 {offsets = [0, 0], sizes = [192, 1], strides = [1, 1]} : vector<192x8xf32> to vector<192x1xf32>
    %6 = vector.extract_strided_slice %4 {offsets = [0, 1], sizes = [128, 1], strides = [1, 1]} : vector<192x8xf32> to vector<128x1xf32>
    %7 = vector.extract_strided_slice %4 {offsets = [0, 2], sizes = [32, 1], strides = [1, 1]} : vector<192x8xf32> to vector<32x1xf32>
    %8 = vector.extract_strided_slice %4 {offsets = [0, 3], sizes = [32, 1], strides = [1, 1]} : vector<192x8xf32> to vector<32x1xf32>
    %9 = vector.extract_strided_slice %4 {offsets = [0, 4], sizes = [32, 1], strides = [1, 1]} : vector<192x8xf32> to vector<32x1xf32>
    %10 = vector.extract_strided_slice %4 {offsets = [0, 5], sizes = [32, 1], strides = [1, 1]} : vector<192x8xf32> to vector<32x1xf32>
    %11 = vector.extract_strided_slice %4 {offsets = [0, 6], sizes = [32, 1], strides = [1, 1]} : vector<192x8xf32> to vector<32x1xf32>
    %12 = vector.extract_strided_slice %4 {offsets = [0, 7], sizes = [32, 1], strides = [1, 1]} : vector<192x8xf32> to vector<32x1xf32>
    %c0_9 = arith.constant 0 : index
    %c0_10 = arith.constant 0 : index
    %c0_11 = arith.constant 0 : index
    %13 = vector.load %arg1[%c0_9, %c0_10, %c0_11] : memref<2x32x64xf32, #tpu.memory_space<vmem>>, vector<1x32x64xf32>
    %14 = vector.shape_cast %13 : vector<1x32x64xf32> to vector<32x64xf32>
    %c1 = arith.constant 1 : index
    %c0_12 = arith.constant 0 : index
    %c0_13 = arith.constant 0 : index
    %15 = vector.load %arg1[%c1, %c0_12, %c0_13] : memref<2x32x64xf32, #tpu.memory_space<vmem>>, vector<1x32x64xf32>
    %16 = vector.shape_cast %15 : vector<1x32x64xf32> to vector<32x64xf32>
    %17 = tpu.concatenate %14, %16 in 1 : vector<32x64xf32>, vector<32x64xf32> -> vector<32x128xf32>
    %cst = arith.constant dense<0.000000e+00> : vector<128xf32>
    %18 = vector.multi_reduction <add>, %17, %cst [0] : vector<32x128xf32> to vector<128xf32>
    %19 = vector.shape_cast %18 : vector<128xf32> to vector<1x128xf32>
    %cst_14 = arith.constant 3.200000e+01 : f32
    %20 = vector.broadcast %cst_14 : f32 to vector<1x128xf32>
    %21 = arith.divf %19, %20 : vector<1x128xf32>
    %22 = vector.broadcast %21 : vector<1x128xf32> to vector<32x128xf32>
    %23 = arith.subf %17, %22 : vector<32x128xf32>
    %24 = arith.mulf %23, %23 : vector<32x128xf32>
    %cst_15 = arith.constant dense<0.000000e+00> : vector<128xf32>
    %25 = vector.multi_reduction <add>, %24, %cst_15 [0] : vector<32x128xf32> to vector<128xf32>
    %26 = vector.shape_cast %25 : vector<128xf32> to vector<1x128xf32>
    %cst_16 = arith.constant 3.200000e+01 : f32
    %27 = vector.broadcast %cst_16 : f32 to vector<1x128xf32>
    %28 = arith.divf %26, %27 : vector<1x128xf32>
    %cst_17 = arith.constant 9.99999974E-6 : f32
    %29 = vector.broadcast %cst_17 : f32 to vector<1x128xf32>
    %30 = arith.addf %28, %29 : vector<1x128xf32>
    %31 = math.rsqrt %30 : vector<1x128xf32>
    %32 = vector.broadcast %31 : vector<1x128xf32> to vector<32x128xf32>
    %33 = arith.mulf %23, %32 : vector<32x128xf32>
    %34 = vector.broadcast %7 : vector<32x1xf32> to vector<32x128xf32>
    %35 = arith.mulf %33, %34 : vector<32x128xf32>
    %36 = vector.broadcast %8 : vector<32x1xf32> to vector<32x128xf32>
    %37 = arith.addf %35, %36 : vector<32x128xf32>
    %cst_18 = arith.constant dense<0.000000e+00> : vector<192x128xf32>
    %38 = tpu.matmul %0, %37, %cst_18 {dimension_numbers = #tpu.dot_dimension_numbers<[1], [0], [0], [1], [0, 0, 1, 1], [], []>} : vector<192x32xf32>, vector<32x128xf32>, vector<192x128xf32> -> vector<192x128xf32>
    %39 = vector.broadcast %5 : vector<192x1xf32> to vector<192x128xf32>
    %40 = arith.addf %38, %39 : vector<192x128xf32>
    %41 = vector.extract_strided_slice %40 {offsets = [0, 0], sizes = [64, 128], strides = [1, 1]} : vector<192x128xf32> to vector<64x128xf32>
    %42 = vector.extract_strided_slice %40 {offsets = [64, 0], sizes = [64, 128], strides = [1, 1]} : vector<192x128xf32> to vector<64x128xf32>
    %43 = vector.extract_strided_slice %40 {offsets = [128, 0], sizes = [64, 128], strides = [1, 1]} : vector<192x128xf32> to vector<64x128xf32>
    %44 = vector.shape_cast %41 : vector<64x128xf32> to vector<8x8x128xf32>
    %45 = tpu.transpose %44, [0, 2, 1] : vector<8x8x128xf32> -> vector<8x128x8xf32>
    %46 = vector.shape_cast %42 : vector<64x128xf32> to vector<8x8x128xf32>
    %47 = vector.shape_cast %43 : vector<64x128xf32> to vector<8x8x128xf32>
    %48 = vector.extract_strided_slice %45 {offsets = [0, 0, 0], sizes = [8, 64, 8], strides = [1, 1, 1]} : vector<8x128x8xf32> to vector<8x64x8xf32>
    %49 = vector.extract_strided_slice %46 {offsets = [0, 0, 0], sizes = [8, 8, 64], strides = [1, 1, 1]} : vector<8x8x128xf32> to vector<8x8x64xf32>
    %50 = vector.extract_strided_slice %47 {offsets = [0, 0, 0], sizes = [8, 8, 64], strides = [1, 1, 1]} : vector<8x8x128xf32> to vector<8x8x64xf32>
    %cst_19 = arith.constant dense<0.000000e+00> : vector<8x64x64xf32>
    %51 = tpu.matmul %48, %49, %cst_19 {dimension_numbers = #tpu.dot_dimension_numbers<[2], [1], [1], [2], [0, 0, 0, 1, 1, 2], [0], [0]>} : vector<8x64x8xf32>, vector<8x8x64xf32>, vector<8x64x64xf32> -> vector<8x64x64xf32>
    %cst_20 = arith.constant dense<0xFF800000> : vector<8x64xf32>
    %52 = vector.multi_reduction <maximumf>, %51, %cst_20 [2] : vector<8x64x64xf32> to vector<8x64xf32>
    %53 = vector.shape_cast %52 : vector<8x64xf32> to vector<8x64x1xf32>
    %54 = vector.broadcast %53 : vector<8x64x1xf32> to vector<8x64x64xf32>
    %55 = arith.subf %51, %54 : vector<8x64x64xf32>
    %56 = math.exp %55 : vector<8x64x64xf32>
    %cst_21 = arith.constant dense<0.000000e+00> : vector<8x64xf32>
    %57 = vector.multi_reduction <add>, %56, %cst_21 [2] : vector<8x64x64xf32> to vector<8x64xf32>
    %58 = vector.shape_cast %57 : vector<8x64xf32> to vector<8x64x1xf32>
    %59 = tpu.reciprocal %58 {approx = true} : vector<8x64x1xf32> -> vector<8x64x1xf32>
    %60 = vector.broadcast %59 : vector<8x64x1xf32> to vector<8x64x64xf32>
    %61 = arith.mulf %56, %60 : vector<8x64x64xf32>
    %cst_22 = arith.constant dense<0.000000e+00> : vector<8x8x64xf32>
    %62 = tpu.matmul %50, %61, %cst_22 {dimension_numbers = #tpu.dot_dimension_numbers<[2], [2], [1], [1], [0, 0, 0, 1, 1, 1], [0], [0]>} : vector<8x8x64xf32>, vector<8x64x64xf32>, vector<8x8x64xf32> -> vector<8x8x64xf32>
    %63 = vector.shape_cast %62 : vector<8x8x64xf32> to vector<64x64xf32>
    %64 = vector.extract_strided_slice %45 {offsets = [0, 64, 0], sizes = [8, 64, 8], strides = [1, 1, 1]} : vector<8x128x8xf32> to vector<8x64x8xf32>
    %65 = vector.extract_strided_slice %46 {offsets = [0, 0, 64], sizes = [8, 8, 64], strides = [1, 1, 1]} : vector<8x8x128xf32> to vector<8x8x64xf32>
    %66 = vector.extract_strided_slice %47 {offsets = [0, 0, 64], sizes = [8, 8, 64], strides = [1, 1, 1]} : vector<8x8x128xf32> to vector<8x8x64xf32>
    %cst_23 = arith.constant dense<0.000000e+00> : vector<8x64x64xf32>
    %67 = tpu.matmul %64, %65, %cst_23 {dimension_numbers = #tpu.dot_dimension_numbers<[2], [1], [1], [2], [0, 0, 0, 1, 1, 2], [0], [0]>} : vector<8x64x8xf32>, vector<8x8x64xf32>, vector<8x64x64xf32> -> vector<8x64x64xf32>
    %cst_24 = arith.constant dense<0xFF800000> : vector<8x64xf32>
    %68 = vector.multi_reduction <maximumf>, %67, %cst_24 [2] : vector<8x64x64xf32> to vector<8x64xf32>
    %69 = vector.shape_cast %68 : vector<8x64xf32> to vector<8x64x1xf32>
    %70 = vector.broadcast %69 : vector<8x64x1xf32> to vector<8x64x64xf32>
    %71 = arith.subf %67, %70 : vector<8x64x64xf32>
    %72 = math.exp %71 : vector<8x64x64xf32>
    %cst_25 = arith.constant dense<0.000000e+00> : vector<8x64xf32>
    %73 = vector.multi_reduction <add>, %72, %cst_25 [2] : vector<8x64x64xf32> to vector<8x64xf32>
    %74 = vector.shape_cast %73 : vector<8x64xf32> to vector<8x64x1xf32>
    %75 = tpu.reciprocal %74 {approx = true} : vector<8x64x1xf32> -> vector<8x64x1xf32>
    %76 = vector.broadcast %75 : vector<8x64x1xf32> to vector<8x64x64xf32>
    %77 = arith.mulf %72, %76 : vector<8x64x64xf32>
    %cst_26 = arith.constant dense<0.000000e+00> : vector<8x8x64xf32>
    %78 = tpu.matmul %66, %77, %cst_26 {dimension_numbers = #tpu.dot_dimension_numbers<[2], [2], [1], [1], [0, 0, 0, 1, 1, 1], [0], [0]>} : vector<8x8x64xf32>, vector<8x64x64xf32>, vector<8x8x64xf32> -> vector<8x8x64xf32>
    %79 = vector.shape_cast %78 : vector<8x8x64xf32> to vector<64x64xf32>
    %80 = tpu.concatenate %63, %79 in 1 : vector<64x64xf32>, vector<64x64xf32> -> vector<64x128xf32>
    %cst_27 = arith.constant dense<0.000000e+00> : vector<32x128xf32>
    %81 = tpu.matmul %1, %80, %cst_27 {dimension_numbers = #tpu.dot_dimension_numbers<[1], [0], [0], [1], [0, 0, 1, 1], [], []>} : vector<32x64xf32>, vector<64x128xf32>, vector<32x128xf32> -> vector<32x128xf32>
    %82 = vector.broadcast %11 : vector<32x1xf32> to vector<32x128xf32>
    %83 = arith.addf %81, %82 : vector<32x128xf32>
    %84 = arith.addf %17, %83 : vector<32x128xf32>
    %cst_28 = arith.constant dense<0.000000e+00> : vector<128xf32>
    %85 = vector.multi_reduction <add>, %84, %cst_28 [0] : vector<32x128xf32> to vector<128xf32>
    %86 = vector.shape_cast %85 : vector<128xf32> to vector<1x128xf32>
    %cst_29 = arith.constant 3.200000e+01 : f32
    %87 = vector.broadcast %cst_29 : f32 to vector<1x128xf32>
    %88 = arith.divf %86, %87 : vector<1x128xf32>
    %89 = vector.broadcast %88 : vector<1x128xf32> to vector<32x128xf32>
    %90 = arith.subf %84, %89 : vector<32x128xf32>
    %91 = arith.mulf %90, %90 : vector<32x128xf32>
    %cst_30 = arith.constant dense<0.000000e+00> : vector<128xf32>
    %92 = vector.multi_reduction <add>, %91, %cst_30 [0] : vector<32x128xf32> to vector<128xf32>
    %93 = vector.shape_cast %92 : vector<128xf32> to vector<1x128xf32>
    %cst_31 = arith.constant 3.200000e+01 : f32
    %94 = vector.broadcast %cst_31 : f32 to vector<1x128xf32>
    %95 = arith.divf %93, %94 : vector<1x128xf32>
    %cst_32 = arith.constant 9.99999974E-6 : f32
    %96 = vector.broadcast %cst_32 : f32 to vector<1x128xf32>
    %97 = arith.addf %95, %96 : vector<1x128xf32>
    %98 = math.rsqrt %97 : vector<1x128xf32>
    %99 = vector.broadcast %98 : vector<1x128xf32> to vector<32x128xf32>
    %100 = arith.mulf %90, %99 : vector<32x128xf32>
    %101 = vector.broadcast %9 : vector<32x1xf32> to vector<32x128xf32>
    %102 = arith.mulf %100, %101 : vector<32x128xf32>
    %103 = vector.broadcast %10 : vector<32x1xf32> to vector<32x128xf32>
    %104 = arith.addf %102, %103 : vector<32x128xf32>
    %cst_33 = arith.constant dense<0.000000e+00> : vector<128x128xf32>
    %105 = tpu.matmul %2, %104, %cst_33 {dimension_numbers = #tpu.dot_dimension_numbers<[1], [0], [0], [1], [0, 0, 1, 1], [], []>} : vector<128x32xf32>, vector<32x128xf32>, vector<128x128xf32> -> vector<128x128xf32>
    %106 = vector.broadcast %6 : vector<128x1xf32> to vector<128x128xf32>
    %107 = arith.addf %105, %106 : vector<128x128xf32>
    %cst_34 = arith.constant 5.000000e-01 : f32
    %108 = vector.broadcast %cst_34 : f32 to vector<128x128xf32>
    %109 = arith.mulf %108, %107 : vector<128x128xf32>
    %cst_35 = arith.constant 0.707106769 : f32
    %110 = vector.broadcast %cst_35 : f32 to vector<128x128xf32>
    %111 = arith.mulf %107, %110 : vector<128x128xf32>
    %112 = math.erf %111 : vector<128x128xf32>
    %cst_36 = arith.constant 1.000000e+00 : f32
    %113 = vector.broadcast %cst_36 : f32 to vector<128x128xf32>
    %114 = arith.addf %113, %112 : vector<128x128xf32>
    %115 = arith.mulf %109, %114 : vector<128x128xf32>
    %cst_37 = arith.constant dense<0.000000e+00> : vector<32x128xf32>
    %116 = tpu.matmul %3, %115, %cst_37 {dimension_numbers = #tpu.dot_dimension_numbers<[1], [0], [0], [1], [0, 0, 1, 1], [], []>} : vector<32x128xf32>, vector<128x128xf32>, vector<32x128xf32> -> vector<32x128xf32>
    %117 = vector.broadcast %12 : vector<32x1xf32> to vector<32x128xf32>
    %118 = arith.addf %116, %117 : vector<32x128xf32>
    %119 = arith.addf %84, %118 : vector<32x128xf32>
    %120 = vector.extract_strided_slice %119 {offsets = [0, 0], sizes = [32, 64], strides = [1, 1]} : vector<32x128xf32> to vector<32x64xf32>
    %c0_38 = arith.constant 0 : index
    %c0_39 = arith.constant 0 : index
    %c0_40 = arith.constant 0 : index
    %121 = vector.load %arg7[%c0_38, %c0_39, %c0_40] : memref<2x32x64xf32, #tpu.memory_space<vmem>>, vector<1x32x64xf32>
    %122 = vector.shape_cast %121 : vector<1x32x64xf32> to vector<32x64xf32>
    %123 = vector.shape_cast %120 : vector<32x64xf32> to vector<1x32x64xf32>
    tpu.vector_store %arg7[%c0_38, %c0_39, %c0_40], %123 {strides = array<i32>} : memref<2x32x64xf32, #tpu.memory_space<vmem>>, vector<1x32x64xf32>,
    %124 = vector.extract_strided_slice %119 {offsets = [0, 64], sizes = [32, 64], strides = [1, 1]} : vector<32x128xf32> to vector<32x64xf32>
    %c1_41 = arith.constant 1 : index
    %c0_42 = arith.constant 0 : index
    %c0_43 = arith.constant 0 : index
    %125 = vector.load %arg7[%c1_41, %c0_42, %c0_43] : memref<2x32x64xf32, #tpu.memory_space<vmem>>, vector<1x32x64xf32>
    %126 = vector.shape_cast %125 : vector<1x32x64xf32> to vector<32x64xf32>
    %127 = vector.shape_cast %124 : vector<32x64xf32> to vector<1x32x64xf32>
    tpu.vector_store %arg7[%c1_41, %c0_42, %c0_43], %127 {strides = array<i32>} : memref<2x32x64xf32, #tpu.memory_space<vmem>>, vector<1x32x64xf32>,
    return
  }
  func.func @transform_0(%arg0: i32) -> (i32, i32, i32) {
    %c0_i32 = arith.constant 0 : i32
    %c0_i32_0 = arith.constant 0 : i32
    %c0_i32_1 = arith.constant 0 : i32
    return %arg0, %c0_i32, %c0_i32_0 : i32, i32, i32
  }
  func.func @transform_1(%arg0: i32) -> (i32, i32) {
    %c0_i32 = arith.constant 0 : i32
    %c0_i32_0 = arith.constant 0 : i32
    %c0_i32_1 = arith.constant 0 : i32
    return %c0_i32, %c0_i32_0 : i32, i32
  }
  func.func @transform_2(%arg0: i32) -> (i32, i32) {
    %c0_i32 = arith.constant 0 : i32
    %c0_i32_0 = arith.constant 0 : i32
    %c0_i32_1 = arith.constant 0 : i32
    return %c0_i32, %c0_i32_0 : i32, i32
  }
  func.func @transform_3(%arg0: i32) -> (i32, i32) {
    %c0_i32 = arith.constant 0 : i32
    %c0_i32_0 = arith.constant 0 : i32
    %c0_i32_1 = arith.constant 0 : i32
    return %c0_i32, %c0_i32_0 : i32, i32
  }
  func.func @transform_4(%arg0: i32) -> (i32, i32) {
    %c0_i32 = arith.constant 0 : i32
    %c0_i32_0 = arith.constant 0 : i32
    %c0_i32_1 = arith.constant 0 : i32
    return %c0_i32, %c0_i32_0 : i32, i32
  }
  func.func @transform_5(%arg0: i32) -> (i32, i32) {
    %c0_i32 = arith.constant 0 : i32
    %c0_i32_0 = arith.constant 0 : i32
    %c0_i32_1 = arith.constant 0 : i32
    return %c0_i32, %c0_i32_0 : i32, i32
  }
  func.func @transform_6(%arg0: i32) -> (i32, i32, i32) {
    %c0_i32 = arith.constant 0 : i32
    %c0_i32_0 = arith.constant 0 : i32
    %c0_i32_1 = arith.constant 0 : i32
    return %arg0, %c0_i32, %c0_i32_0 : i32, i32, i32
  }
}

</mosaic_0001>

<bundles_post_ra>
// kernel: _encoder_fwd.1
= control target key start
LH: loop header
LB: loop body
LE: loop exit
PB: predicated region body
PF: predicated region fallthrough
CT: control target
= control target key end

     0   :  { %v8909_v2 = vmov 2   ;;  %s8910_s25 = smov 64   ;;  %v8911_v7 = vmov 3   ;;  %vm320_vm0 = vcmask 261120   ;;  %v8912_v11 = vmov 0   ;;  %s11546_s0 = inlined_call_operand.vmem [shape: f32[2,32,64], index: 0, kind: input, shape index: {}]   ;;  %s11547_s5 = inlined_call_operand.vmem [shape: f32[192,8], index: 5, kind: input, shape index: {}]   ;;  %s11548_s1 = inlined_call_operand.vmem [shape: f32[192,32], index: 1, kind: input, shape index: {}]   ;;  %s11549_s2 = inlined_call_operand.vmem [shape: f32[32,64], index: 2, kind: input, shape index: {}]   ;;  %s11550_s3 = inlined_call_operand.vmem [shape: f32[128,32], index: 3, kind: input, shape index: {}]   ;;  %s11551_s4 = inlined_call_operand.vmem [shape: f32[32,128], index: 4, kind: input, shape index: {}]   ;;  %s11552_s6 = inlined_call_operand.vmem [shape: f32[2,32,64], index: 6, kind: output, shape index: {}]  }
   0x1   :  { %v6601_v0 = vld [vmem:[%s11546_s0 + $0x20] sm:$0xff]  ;;  %v6603_v1 = vld [vmem:[%s11546_s0 + $0x30] sm:$0xff]  ;;  %8306 = vset.pattern.permute.xlu1 %v8909_v2  ;;  %8305 = vset.pattern.permute.xlu0 %v8909_v2  ;;  %v6602_v3 = vld [vmem:[%s11546_s0 + $0x28] sm:$0xff]  ;;  %vm120_vm1 = vcmask 523264   ;;  %vm834_vm2 = vcmask 64512   ;;  %vm8914_vm3 = vmmov 0  }
   0x2   :  { %108 = vrot.lane.b32.xlu0 %v6601_v0, %s8910_s25  ;;  %112 = vrot.lane.b32.xlu1 %v6603_v1, %s8910_s25  ;;  %v6604_v4 = vld [vmem:[%s11546_s0 + $0x38] sm:$0xff]  ;;  %v72_v5 = vld [vmem:[%s11547_s5 + $0x8] sm:$0xff]  ;;  %vm10000_vm4 = vmpackc.low %vm120_vm1, %vm120_vm1 }
   0x3   :  { %v71_v6 = vld [vmem:[%s11547_s5] sm:$0xff]  ;;  %v73_v8 = vld [vmem:[%s11547_s5 + $0x10] sm:$0xff]  ;;  %v74_v9 = vld [vmem:[%s11547_s5 + $0x18] sm:$0xff] }
   0x4   :  { %v23_v10 = vld [vmem:[%s11548_s1] sm:$0xff]  ;;  %v80_v13 = vld [vmem:[%s11547_s5 + $0x48] sm:$0xff]  ;;  %v78_v14 = vld [vmem:[%s11547_s5 + $0x38] sm:$0xff] }
   0x5   :  { %7301 = vmatprep.mubr.msk.f32.mxu0 %vm320_vm0, %v23_v10  ;;  %v79_v12 = vld [vmem:[%s11547_s5 + $0x40] sm:$0xff]  ;;  %v81_v15 = vld [vmem:[%s11547_s5 + $0x50] sm:$0xff]  ;;  %v96_v19 = vld [vmem:[%s11546_s0 + $0x8] sm:$0xff] }
   0x6   :  { %110 = vrot.lane.b32.xlu0 %v6602_v3, %s8910_s25  ;;  %114 = vrot.lane.b32.xlu1 %v6604_v4, %s8910_s25  ;;  %v95_v18 = vld [vmem:[%s11546_s0] sm:$0xff]  ;;  %v85_v20 = vld [vmem:[%s11547_s5 + $0x70] sm:$0xff] }
   0x7   :  { %v75_v21 = vld [vmem:[%s11547_s5 + $0x20] sm:$0xff]  ;;  %v97_v22 = vld [vmem:[%s11546_s0 + $0x10] sm:$0xff]  ;;  %v98_v25 = vld [vmem:[%s11546_s0 + $0x18] sm:$0xff] }
   0x8   :  { %v87_v29 = vld [vmem:[%s11547_s5 + $0x80] sm:$0xff]  ;;  %v76_v30 = vld [vmem:[%s11547_s5 + $0x28] sm:$0xff]  ;;  %v82_v35 = vld [vmem:[%s11547_s5 + $0x58] sm:$0xff] }
   0x9   :  { %v77_v38 = vld [vmem:[%s11547_s5 + $0x30] sm:$0xff]  ;;  %v83_v41 = vld [vmem:[%s11547_s5 + $0x60] sm:$0xff]  ;;  %v84_v44 = vld [vmem:[%s11547_s5 + $0x68] sm:$0xff] }
   0xa   :  { %167 = vperm.xlu1 %8306, %v72_v5   ;;  %162 = vperm.xlu0 %8305, %v71_v6   ;;  %v86_v49 = vld [vmem:[%s11547_s5 + $0x78] sm:$0xff]  ;;  %v88_v55 = vld [vmem:[%s11547_s5 + $0x88] sm:$0xff] }
   0xb   :  { %v90_v59 = vld [vmem:[%s11547_s5 + $0x98] sm:$0xff] }
   0xe   :  { %8307 = vset.pattern.permute.xlu1 %v8911_v7  ;;  %8308 = vset.pattern.permute.xlu0 %v8911_v7 }
   0xf   :  { %185 = vperm.xlu1 %8307, %v71_v6   ;;  %189 = vperm.xlu0 %8308, %v72_v5  }
  0x13   :  { %8309 = vset.pattern.permute.xlu1 %v8909_v2  ;;  %193 = vperm.xlu0 %8308, %v73_v8  }
  0x14   :  { %172 = vperm.xlu1 %8309, %v73_v8  }
  0x17   :  { %8311 = vset.pattern.permute.xlu0 %v8912_v11 }
  0x18   :  { %177 = vperm.xlu1 %8309, %v74_v9   ;;  %205 = vperm.xlu0 %8311, %v71_v6  }
  0x1c   :  { %8310 = vset.pattern.permute.xlu1 %v8911_v7  ;;  %242 = vperm.xlu0 %8311, %v79_v12  }
  0x1d   :  { %197 = vperm.xlu1 %8310, %v74_v9  }
  0x20   :  { %247 = vperm.xlu0 %8311, %v80_v13  }
  0x21   :  { %8312 = vset.pattern.permute.xlu1 %v8912_v11 }
  0x22   :  { %209 = vperm.xlu1 %8312, %v72_v5  }
  0x24   :  { %237 = vperm.xlu0 %8311, %v78_v14  }
  0x26   :  { %213 = vperm.xlu1 %8312, %v73_v8  }
  0x28   :  { %272 = vperm.xlu0 %8311, %v85_v20  }
  0x2a   :  { %217 = vperm.xlu1 %8312, %v74_v9  }
  0x2c   :  { %282 = vperm.xlu0 %8311, %v87_v29   ;;  %v24_v29 = vld [vmem:[%s11548_s1 + $0x8] sm:$0xff] }
  0x2e   :  { %252 = vperm.xlu1 %8312, %v81_v15  }
  0x32   :  { %222 = vperm.xlu1 %8312, %v75_v21  }
  0x36   :  { %227 = vperm.xlu1 %8312, %v76_v30   ;;  %v25_v30 = vld [vmem:[%s11548_s1 + $0x10] sm:$0xff] }
  0x3a   :  { %257 = vperm.xlu1 %8312, %v82_v35   ;;  %v28_v35 = vld [vmem:[%s11548_s1 + $0x28] sm:$0xff] }
  0x3e   :  { %232 = vperm.xlu1 %8312, %v77_v38   ;;  %v31_v38 = vld [vmem:[%s11548_s1 + $0x40] sm:$0xff] }
  0x42   :  { %262 = vperm.xlu1 %8312, %v83_v41   ;;  %v34_v41 = vld [vmem:[%s11548_s1 + $0x58] sm:$0xff] }
  0x46   :  { %267 = vperm.xlu1 %8312, %v84_v44   ;;  %v37_v44 = vld [vmem:[%s11548_s1 + $0x70] sm:$0xff] }
  0x4a   :  { %277 = vperm.xlu1 %8312, %v86_v49   ;;  %v42_v49 = vld [vmem:[%s11548_s1 + $0x98] sm:$0xff] }
  0x4e   :  { %287 = vperm.xlu1 %8312, %v88_v55  }
  0x52   :  { %297 = vperm.xlu1 %8312, %v90_v59  }
  0x74   :  { %v109_v16 = vpop.permute.xlu0 %108  ;;  %v113_v17 = vpop.permute.xlu1 %112 }
  0x75   :  { %v9019_v26 = vsel %vm120_vm1, %v95_v18, %v109_v16  ;;  %v9033_v31 = vsel %vm120_vm1, %v97_v22, %v113_v17 }
  0x76   :  { %11639 = vst [vmem:[#allocation2_spill] sm:$0xff] %v9019_v26  ;;  %11641 = vst [vmem:[#allocation4_spill] sm:$0xff] %v9033_v31 }
  0x78   :  { %v111_v23 = vpop.permute.xlu0 %110  ;;  %v115_v24 = vpop.permute.xlu1 %114 }
  0x79   :  { %v9022_v27 = vsel %vm120_vm1, %v96_v19, %v111_v23  ;;  %v9036_v32 = vsel %vm120_vm1, %v98_v25, %v115_v24 }
  0x7a   :  { %11640 = vst [vmem:[#allocation3_spill] sm:$0xff] %v9022_v27  ;;  %v125_v28 = vadd.f32 %v9022_v27, %v9019_v26  ;;  %11642 = vst [vmem:[#allocation5_spill] sm:$0xff] %v9036_v32 }
  0x7c   :  { %v126_v33 = vadd.f32 %v125_v28, %v9033_v31 }
  0x7e   :  { %v127_v34 = vadd.f32 %v126_v33, %v9036_v32  ;;  %v26_v33 = vld [vmem:[%s11548_s1 + $0x18] sm:$0xff] }
  0x80   :  { %v128_v36 = vrot.slane %v127_v34, 4 }
  0x82   :  { %v129_v37 = vadd.f32 %v128_v36, %v127_v34  ;;  %v27_v34 = vld [vmem:[%s11548_s1 + $0x20] sm:$0xff]  ;;  %v29_v36 = vld [vmem:[%s11548_s1 + $0x30] sm:$0xff] }
  0x84   :  { %v130_v39 = vrot.slane %v129_v37, 2 }
  0x86   :  { %v131_v40 = vadd.f32 %v130_v39, %v129_v37  ;;  %v30_v37 = vld [vmem:[%s11548_s1 + $0x38] sm:$0xff]  ;;  %v32_v39 = vld [vmem:[%s11548_s1 + $0x48] sm:$0xff] }
  0x88   :  { %v132_v42 = vrot.slane %v131_v40, 1 }
  0x89   :  { %v168_v62 = vpop.permute.xlu1 %167  ;;  %v163_v7 = vpop.permute.xlu0 %162 }
  0x8a   :  { %v133_v43 = vadd.f32 %v132_v42, %v131_v40  ;;  %v33_v40 = vld [vmem:[%s11548_s1 + $0x50] sm:$0xff]  ;;  %v35_v42 = vld [vmem:[%s11548_s1 + $0x60] sm:$0xff] }
  0x8c   :  { %v135_v45 = vmul.f32 0.03125, %v133_v43  ;;  %v36_v43 = vld [vmem:[%s11548_s1 + $0x68] sm:$0xff] }
  0x8e   :  { %v136_v46 = vsub.f32 %v9019_v26, %v135_v45  ;;  %v138_v47 = vsub.f32 %v9033_v31, %v135_v45  ;;  %v137_v48 = vsub.f32 %v9022_v27, %v135_v45  ;;  %v139_v50 = vsub.f32 %v9036_v32, %v135_v45  ;;  %v186_v3 = vpop.permute.xlu1 %185  ;;  %v190_v9 = vpop.permute.xlu0 %189  ;;  %v38_v45 = vld [vmem:[%s11548_s1 + $0x78] sm:$0xff] }
  0x90   :  { %v140_v51 = vmul.f32 %v136_v46, %v136_v46  ;;  %v141_v52 = vmul.f32 %v137_v48, %v137_v48  ;;  %v142_v53 = vmul.f32 %v138_v47, %v138_v47  ;;  %v143_v56 = vmul.f32 %v139_v50, %v139_v50 }
  0x92   :  { %v144_v54 = vadd.f32 %v141_v52, %v140_v51  ;;  %v194_v16 = vpop.permute.xlu0 %193 }
  0x93   :  { %v173_v6 = vpop.permute.xlu1 %172 }
  0x94   :  { %v145_v57 = vadd.f32 %v144_v54, %v142_v53 }
  0x96   :  { %v146_v58 = vadd.f32 %v145_v57, %v143_v56 }
  0x97   :  { %v178_v8 = vpop.permute.xlu1 %177  ;;  %v206_v56 = vpop.permute.xlu0 %205 }
  0x98   :  { %v147_v60 = vrot.slane %v146_v58, 4 }
  0x9a   :  { %v148_v61 = vadd.f32 %v147_v60, %v146_v58 }
  0x9c   :  { %v149_v63 = vrot.slane %v148_v61, 2  ;;  %v198_v15 = vpop.permute.xlu1 %197 }
  0x9e   :  { %v150_v0 = vadd.f32 %v149_v63, %v148_v61 }
  0xa0   :  { %v151_v1 = vrot.slane %v150_v0, 1 }
  0xa2   :  { %v152_v2 = vadd.f32 %v151_v1, %v150_v0 }
  0xa4   :  { %v153_v4 = vmul.f32 0.03125, %v152_v2  ;;  %v243_v2 = vpop.permute.xlu0 %242 }
  0xa6   :  { %v154_v5 = vadd.f32 1e-05, %v153_v4 }
  0xa8   :  { %8345 = vrsqrt.f32 %v154_v5 }
  0xb2   :  { %v8346_v10 = vpop.eup %8345 }
  0xb3   :  { %v157_v11 = vmul.f32 %v8346_v10, %v137_v48  ;;  %v158_v12 = vmul.f32 %v8346_v10, %v138_v47  ;;  %v156_v13 = vmul.f32 %v8346_v10, %v136_v46  ;;  %v159_v14 = vmul.f32 %v8346_v10, %v139_v50  ;;  %v39_v46 = vld [vmem:[%s11548_s1 + $0x80] sm:$0xff]  ;;  %v40_v47 = vld [vmem:[%s11548_s1 + $0x88] sm:$0xff]  ;;  %v41_v48 = vld [vmem:[%s11548_s1 + $0x90] sm:$0xff]  ;;  %v210_v50 = vpop.permute.xlu1 %209 }
  0xb5   :  { %v181_v17 = vmul.f32 %v168_v62, %v157_v11  ;;  %v182_v18 = vmul.f32 %v173_v6, %v158_v12  ;;  %v180_v19 = vmul.f32 %v163_v7, %v156_v13  ;;  %v183_v20 = vmul.f32 %v178_v8, %v159_v14  ;;  %v248_v6 = vpop.permute.xlu0 %247 }
  0xb7   :  { %v200_v21 = vadd.f32 %v186_v3, %v180_v19  ;;  %v201_v22 = vadd.f32 %v190_v9, %v181_v17  ;;  %v203_v23 = vadd.f32 %v198_v15, %v183_v20  ;;  %v202_v24 = vadd.f32 %v194_v16, %v182_v18  ;;  %v214_v51 = vpop.permute.xlu1 %213 }
  0xb9   :  { %v7957_v25 = vpack.c.bf16 %v201_v22, %v200_v21  ;;  %v7961_v28 = vpack.c.bf16 %v203_v23, %v202_v24  ;;  %v9158_v14 = vpop.permute.xlu0 %237 }
  0xbb   :  { %7958 = vmatprep.subr.bf16.mxu0 %v7957_v25  ;;  %v218_v52 = vpop.permute.xlu1 %217 }
  0xbc   :  { %7960 = vmatpush3.bf16.msra.mxu0 %v7957_v25 }
  0xbd   :  { %7962 = vmatprep.subr.bf16.mxu0 %v7961_v28  ;;  %v273_v20 = vpop.permute.xlu0 %272 }
  0xbf   :  { %v9141_v53 = vpop.permute.xlu1 %252 }
  0xc0   :  { %7964 = vmatpush3.bf16.msra.mxu0 %v7961_v28 }
  0xc3   :  { %7302 = vmatmul.mubr.msk.f32.vlgmr.msra.gmra.mrb[0].mxu0 %vm320_vm0, %v24_v29  ;;  %v9143_v54 = vpop.permute.xlu1 %222 }
  0xc4   :  { %7304 = vmatprep.mubr.msk.f32.mxu0 %vm320_vm0, %v25_v30 }
  0xc7   :  { %7305 = vmatmul.mubr.msk.f32.gmra.mrb[2].mxu0 %vm320_vm0, %v26_v33  ;;  %v228_v62 = vpop.permute.xlu1 %227 }
  0xc8   :  { %7307 = vmatprep.mubr.msk.f32.mxu0 %vm320_vm0, %v27_v34 }
  0xcb   :  { %7308 = vmatmul.mubr.msk.f32.gmra.mrb[4].mxu0 %vm320_vm0, %v28_v35  ;;  %v9147_v3 = vpop.permute.xlu1 %257 }
  0xcc   :  { %7310 = vmatprep.mubr.msk.f32.mxu0 %vm320_vm0, %v29_v36 }
  0xcf   :  { %7311 = vmatmul.mubr.msk.f32.gmra.mrb[6].mxu0 %vm320_vm0, %v30_v37  ;;  %v233_v9 = vpop.permute.xlu1 %232  ;;  %v9185_v37 = vpop.permute.xlu0 %282 }
  0xd0   :  { %7313 = vmatprep.mubr.msk.f32.mxu0 %vm320_vm0, %v31_v38  ;;  %11652 = vst [vmem:[#allocation15_spill] sm:$0xff] %v9185_v37 }
  0xd3   :  { %7314 = vmatmul.mubr.msk.f32.gmra.mrb[8].mxu0 %vm320_vm0, %v32_v39  ;;  %v263_v15 = vpop.permute.xlu1 %262 }
  0xd4   :  { %7316 = vmatprep.mubr.msk.f32.mxu0 %vm320_vm0, %v33_v40 }
  0xd7   :  { %7317 = vmatmul.mubr.msk.f32.gmra.mrb[10].mxu0 %vm320_vm0, %v34_v41  ;;  %v9177_v29 = vpop.permute.xlu1 %267 }
  0xd8   :  { %7319 = vmatprep.mubr.msk.f32.mxu0 %vm320_vm0, %v35_v42 }
  0xdb   :  { %7320 = vmatmul.mubr.msk.f32.gmra.mrb[12].mxu0 %vm320_vm0, %v36_v43  ;;  %v9179_v30 = vpop.permute.xlu1 %277 }
  0xdc   :  { %7322 = vmatprep.mubr.msk.f32.mxu0 %vm320_vm0, %v37_v44 }
  0xdf   :  { %7323 = vmatmul.mubr.msk.f32.gmra.mrb[14].mxu0 %vm320_vm0, %v38_v45  ;;  %v9181_v33 = vpop.permute.xlu1 %287 }
  0xe0   :  { %7325 = vmatprep.mubr.msk.f32.mxu0 %vm320_vm0, %v39_v46  ;;  %11650 = vst [vmem:[#allocation13_spill] sm:$0xff] %v9181_v33 }
  0xe3   :  { %7326 = vmatmul.mubr.msk.f32.gmra.mrb[16].mxu0 %vm320_vm0, %v40_v47  ;;  %v9183_v36 = vpop.permute.xlu1 %297 }
  0xe4   :  { %7328 = vmatprep.mubr.msk.f32.mxu0 %vm320_vm0, %v41_v48  ;;  %11651 = vst [vmem:[#allocation14_spill] sm:$0xff] %v9183_v36 }
  0xe7   :  { %7329 = vmatmul.mubr.msk.f32.gmra.mrb[18].mxu0 %vm320_vm0, %v42_v49 }
 0x196   :  { %v7303_v55 = vpop.f32.mrb[0].mxu0 }
 0x197   :  { %v465_v57 = vadd.f32 %v7303_v55, %v210_v50  ;;  %v459_v58 = vpop.f32.mrb[1].mxu0 }
 0x198   :  { %v460_v59 = vadd.f32 %v459_v58, %v206_v56 }
 0x199   :  { %610 = vxpose.xlu1.b32.start.end [1/1] (short) %v465_v57, 128 }
 0x19a   :  { %578 = vxpose.xlu0.b32.start.end [1/1] (short) %v460_v59, 128  ;;  %v7306_v60 = vpop.f32.mrb[2].mxu0 }
 0x19b   :  { %v469_v61 = vpop.f32.mrb[3].mxu0  ;;  %v475_v28 = vadd.f32 %v7306_v60, %v218_v52 }
 0x19c   :  { %v470_v63 = vadd.f32 %v469_v61, %v214_v51 }
 0x19e   :  { %v7309_v0 = vpop.f32.mrb[4].mxu0 }
 0x19f   :  { %v9145_v1 = vpop.f32.mrb[5].mxu0  ;;  %v485_v35 = vadd.f32 %v7309_v0, %v228_v62 }
 0x1a2   :  { %v9149_v4 = vpop.f32.mrb[6].mxu0 }
 0x1a3   :  { %v489_v5 = vpop.f32.mrb[7].mxu0 }
 0x1a4   :  { %v490_v34 = vadd.f32 %v489_v5, %v233_v9 }
 0x1a6   :  { %v7315_v7 = vpop.f32.mrb[8].mxu0 }
 0x1a7   :  { %v499_v8 = vpop.f32.mrb[9].mxu0  ;;  %v9153_v11 = vadd.f32 %v7315_v7, %v248_v6  ;;  %v480_v7 = vadd.f32 %v9145_v1, %v9143_v54  ;;  %v45_v1 = vld [vmem:[%s11548_s1 + $0xb0] sm:$0xff] }
 0x1a8   :  { %v9151_v10 = vadd.f32 %v499_v8, %v243_v2 }
 0x1a9   :  { %11644 = vst [vmem:[#allocation7_spill] sm:$0xff] %v9153_v11 }
 0x1aa   :  { %11643 = vst [vmem:[#allocation6_spill] sm:$0xff] %v9151_v10  ;;  %7337 = vmatprep.subr.mxu1 %v9151_v10  ;;  %v7318_v12 = vpop.f32.mrb[10].mxu0 }
 0x1ab   :  { %7338 = vmatpush3.msra.mxu1 %v9151_v10  ;;  %v509_v13 = vpop.f32.mrb[11].mxu0  ;;  %v9206_v58 = vadd.f32 %v7318_v12, %v9147_v3  ;;  %v43_v12 = vld [vmem:[%s11548_s1 + $0xa0] sm:$0xff] }
 0x1ac   :  { %7351 = vmatprep.subr.mxu1 %v9153_v11  ;;  %v9189_v42 = vadd.f32 %v509_v13, %v9141_v53  ;;  %v44_v13 = vld [vmem:[%s11548_s1 + $0xa8] sm:$0xff]  ;;  %7331 = vmatprep.mubr.msk.f32.mxu0 %vm320_vm0, %v43_v12 }
 0x1ad   :  { %11656 = vst [vmem:[#allocation19_spill] sm:$0xff] %v9206_v58  ;;  %7332 = vmatmul.mubr.msk.f32.gmra.mrb[20].mxu0 %vm320_vm0, %v44_v13 }
 0x1ae   :  { %v9160_v16 = vpop.f32.mrb[12].mxu0  ;;  %11653 = vst [vmem:[#allocation16_spill] sm:$0xff] %v9189_v42  ;;  %7334 = vmatprep.mubr.msk.f32.mxu0 %vm320_vm0, %v45_v1 }
 0x1af   :  { %v519_v17 = vpop.f32.mrb[13].mxu0 }
 0x1b0   :  { %v9162_v18 = vadd.f32 %v519_v17, %v263_v15  ;;  %v46_v17 = vld [vmem:[%s11548_s1 + $0xb8] sm:$0xff] }
 0x1b1   :  { %7335 = vmatmul.mubr.msk.f32.gmra.mrb[22].mxu0 %vm320_vm0, %v46_v17 }
 0x1b2   :  { %11645 = vst [vmem:[#allocation8_spill] sm:$0xff] %v9162_v18  ;;  %v9164_v19 = vpop.f32.mrb[14].mxu0  ;;  %7393 = vmatprep.subr.mxu0 %v9162_v18 }
 0x1b3   :  { %v529_v21 = vpop.f32.mrb[15].mxu0  ;;  %7394 = vmatpush3.msra.mxu0 %v9162_v18 }
 0x1b4   :  { %v9168_v22 = vadd.f32 %v529_v21, %v273_v20 }
 0x1b6   :  { %11646 = vst [vmem:[#allocation9_spill] sm:$0xff] %v9168_v22  ;;  %v9170_v23 = vpop.f32.mrb[16].mxu0  ;;  %7421 = vmatprep.subr.mxu0 %v9168_v22 }
 0x1b7   :  { %11647 = vst [vmem:[#allocation10_spill] sm:$0xff] %v9170_v23  ;;  %v9173_v24 = vpop.f32.mrb[17].mxu0 }
 0x1b8   :  { %11648 = vst [vmem:[#allocation11_spill] sm:$0xff] %v9173_v24 }
 0x1ba   :  { %v9175_v25 = vpop.f32.mrb[18].mxu0 }
 0x1bb   :  { %11649 = vst [vmem:[#allocation12_spill] sm:$0xff] %v9175_v25 }
 0x1d6   :  { %674 = vxpose.xlu1.b32.start.end [1/1] (short) %v475_v28, 128 }
 0x1d7   :  { %642 = vxpose.xlu0.b32.start.end [1/1] (short) %v470_v63, 128 }
 0x213   :  { %770 = vxpose.xlu1.b32.start.end [1/1] (short) %v490_v34, 128  ;;  %v9266_v34 = vadd.f32 %v9160_v16, %v9177_v29 }
 0x214   :  { %738 = vxpose.xlu0.b32.start.end [1/1] (short) %v485_v35, 128 }
 0x215   :  { %11671 = vst [vmem:[#allocation34_spill] sm:$0xff] %v9266_v34 }
 0x219   :  { %v626_v38 = vpop.trf.xlu1 }
 0x21a   :  { %v594_v39 = vpop.trf.xlu0 }
 0x21b   :  { %7339 = vmatprep.mubr.msk.f32.mxu1 %vm834_vm2, %v594_v39 }
 0x21d   :  { %v627_v40 = vpop.trf.xlu1 }
 0x21e   :  { %v595_v41 = vpop.trf.xlu0 }
 0x21f   :  { %7340 = vmatmul.mubr.msk.f32.vlgmr.msra.gmra.mrb[0].mxu1 %vm834_vm2, %v595_v41 }
 0x220   :  { %7352 = vmatpush3.msra.mxu1 %v9153_v11 }
 0x221   :  { %7365 = vmatprep.subr.mxu1 %v9189_v42  ;;  %v628_v43 = vpop.trf.xlu1 }
 0x222   :  { %v596_v44 = vpop.trf.xlu0 }
 0x223   :  { %7342 = vmatprep.mubr.msk.f32.mxu1 %vm834_vm2, %v596_v44 }
 0x225   :  { %v629_v45 = vpop.trf.xlu1 }
 0x226   :  { %v597_v46 = vpop.trf.xlu0 }
 0x227   :  { %7343 = vmatmul.mubr.msk.f32.gmra.mrb[2].mxu1 %vm834_vm2, %v597_v46 }
 0x229   :  { %v630_v47 = vpop.trf.xlu1 }
 0x22a   :  { %v598_v48 = vpop.trf.xlu0 }
 0x22b   :  { %7345 = vmatprep.mubr.msk.f32.mxu1 %vm834_vm2, %v598_v48  ;;  %v9282_v48 = vadd.f32 %v9164_v19, %v9179_v30 }
 0x22d   :  { %v631_v49 = vpop.trf.xlu1  ;;  %11673 = vst [vmem:[#allocation36_spill] sm:$0xff] %v9282_v48 }
 0x22e   :  { %v599_v50 = vpop.trf.xlu0 }
 0x22f   :  { %7346 = vmatmul.mubr.msk.f32.gmra.mrb[4].mxu1 %vm834_vm2, %v599_v50 }
 0x231   :  { %v632_v51 = vpop.trf.xlu1 }
 0x232   :  { %v600_v52 = vpop.trf.xlu0 }
 0x233   :  { %7348 = vmatprep.mubr.msk.f32.mxu1 %vm834_vm2, %v600_v52 }
 0x235   :  { %v633_v53 = vpop.trf.xlu1 }
 0x236   :  { %v601_v55 = vpop.trf.xlu0 }
 0x237   :  { %7349 = vmatmul.mubr.msk.f32.gmra.mrb[6].mxu1 %vm834_vm2, %v601_v55  ;;  %v495_v55 = vadd.f32 %v9149_v4, %v9158_v14 }
 0x238   :  { %7353 = vmatprep.mubr.msk.f32.mxu1 %vm834_vm2, %v626_v38 }
 0x239   :  { %v9201_v56 = vpop.trf.xlu1 }
 0x23a   :  { %11654 = vst [vmem:[#allocation17_spill] sm:$0xff] %v9201_v56  ;;  %v9203_v57 = vpop.trf.xlu0 }
 0x23b   :  { %11655 = vst [vmem:[#allocation18_spill] sm:$0xff] %v9203_v57  ;;  %7354 = vmatmul.mubr.msk.f32.vlgmr.msra.gmra.mrb[8].mxu1 %vm834_vm2, %v627_v40 }
 0x23c   :  { %7366 = vmatpush3.msra.mxu1 %v9189_v42  ;;  %7356 = vmatprep.mubr.msk.f32.mxu1 %vm834_vm2, %v628_v43 }
 0x23d   :  { %7379 = vmatprep.subr.mxu1 %v9206_v58  ;;  %v9212_v59 = vpop.trf.xlu1 }
 0x23e   :  { %11657 = vst [vmem:[#allocation20_spill] sm:$0xff] %v9212_v59  ;;  %v9214_v60 = vpop.trf.xlu0 }
 0x23f   :  { %11658 = vst [vmem:[#allocation21_spill] sm:$0xff] %v9214_v60  ;;  %7357 = vmatmul.mubr.msk.f32.gmra.mrb[10].mxu1 %vm834_vm2, %v629_v45 }
 0x240   :  { %7359 = vmatprep.mubr.msk.f32.mxu1 %vm834_vm2, %v630_v47 }
 0x241   :  { %v9218_v61 = vpop.trf.xlu1 }
 0x242   :  { %11659 = vst [vmem:[#allocation22_spill] sm:$0xff] %v9218_v61  ;;  %v9220_v62 = vpop.trf.xlu0 }
 0x243   :  { %11660 = vst [vmem:[#allocation23_spill] sm:$0xff] %v9220_v62  ;;  %7360 = vmatmul.mubr.msk.f32.gmra.mrb[12].mxu1 %vm834_vm2, %v631_v49 }
 0x244   :  { %7362 = vmatprep.mubr.msk.f32.mxu1 %vm834_vm2, %v632_v51 }
 0x245   :  { %v9224_v63 = vpop.trf.xlu1 }
 0x246   :  { %11661 = vst [vmem:[#allocation24_spill] sm:$0xff] %v9224_v63  ;;  %v9226_v0 = vpop.trf.xlu0 }
 0x247   :  { %11662 = vst [vmem:[#allocation25_spill] sm:$0xff] %v9226_v0  ;;  %7363 = vmatmul.mubr.msk.f32.gmra.mrb[14].mxu1 %vm834_vm2, %v633_v53 }
 0x249   :  { %v9229_v2 = vpop.trf.xlu1 }
 0x24a   :  { %11663 = vst [vmem:[#allocation26_spill] sm:$0xff] %v9229_v2  ;;  %v9231_v3 = vpop.trf.xlu0 }
 0x24b   :  { %11664 = vst [vmem:[#allocation27_spill] sm:$0xff] %v9231_v3 }
 0x24d   :  { %v9233_v5 = vpop.trf.xlu1 }
 0x24e   :  { %11665 = vst [vmem:[#allocation28_spill] sm:$0xff] %v9233_v5  ;;  %v9235_v6 = vpop.trf.xlu0 }
 0x24f   :  { %11666 = vst [vmem:[#allocation29_spill] sm:$0xff] %v9235_v6 }
 0x251   :  { %v9239_v8 = vpop.trf.xlu1 }
 0x252   :  { %11667 = vst [vmem:[#allocation30_spill] sm:$0xff] %v9239_v8  ;;  %v9241_v9 = vpop.trf.xlu0  ;;  %706 = vxpose.xlu0.b32.start.end [1/1] (short) %v480_v7, 128 }
 0x253   :  { %11668 = vst [vmem:[#allocation31_spill] sm:$0xff] %v9241_v9 }
 0x255   :  { %v9253_v54 = vpop.trf.xlu1 }
 0x256   :  { %v9251_v15 = vpop.trf.xlu0  ;;  %11670 = vst [vmem:[#allocation33_spill] sm:$0xff] %v9253_v54 }
 0x257   :  { %11669 = vst [vmem:[#allocation32_spill] sm:$0xff] %v9251_v15 }
 0x259   :  { %v690_v21 = vpop.trf.xlu1 }
 0x25a   :  { %v658_v20 = vpop.trf.xlu0 }
 0x25b   :  { %7367 = vmatprep.mubr.msk.f32.mxu1 %vm834_vm2, %v658_v20 }
 0x25d   :  { %v691_v38 = vpop.trf.xlu1 }
 0x25e   :  { %v659_v28 = vpop.trf.xlu0 }
 0x25f   :  { %7368 = vmatmul.mubr.msk.f32.vlgmr.msra.gmra.mrb[16].mxu1 %vm834_vm2, %v659_v28 }
 0x260   :  { %7380 = vmatpush3.msra.mxu1 %v9206_v58 }
 0x261   :  { %7407 = vmatprep.subr.mxu1 %v9266_v34  ;;  %v692_v40 = vpop.trf.xlu1 }
 0x262   :  { %v660_v35 = vpop.trf.xlu0 }
 0x263   :  { %7370 = vmatprep.mubr.msk.f32.mxu1 %vm834_vm2, %v660_v35 }
 0x265   :  { %v693_v43 = vpop.trf.xlu1 }
 0x266   :  { %v661_v39 = vpop.trf.xlu0 }
 0x267   :  { %7371 = vmatmul.mubr.msk.f32.gmra.mrb[18].mxu1 %vm834_vm2, %v661_v39 }
 0x269   :  { %v694_v44 = vpop.trf.xlu1 }
 0x26a   :  { %v662_v41 = vpop.trf.xlu0 }
 0x26b   :  { %7373 = vmatprep.mubr.msk.f32.mxu1 %vm834_vm2, %v662_v41 }
 0x26d   :  { %v695_v46 = vpop.trf.xlu1 }
 0x26e   :  { %v663_v16 = vpop.trf.xlu0 }
 0x26f   :  { %7374 = vmatmul.mubr.msk.f32.gmra.mrb[20].mxu1 %vm834_vm2, %v663_v16 }
 0x271   :  { %v696_v50 = vpop.trf.xlu1 }
 0x272   :  { %v664_v29 = vpop.trf.xlu0 }
 0x273   :  { %7376 = vmatprep.mubr.msk.f32.mxu1 %vm834_vm2, %v664_v29 }
 0x275   :  { %v697_v19 = vpop.trf.xlu1 }
 0x276   :  { %v665_v45 = vpop.trf.xlu0 }
 0x277   :  { %7377 = vmatmul.mubr.msk.f32.gmra.mrb[22].mxu1 %vm834_vm2, %v665_v45 }
 0x278   :  { %7381 = vmatprep.mubr.msk.f32.mxu1 %vm834_vm2, %v690_v21 }
 0x279   :  { %v9314_v4 = vpop.trf.xlu1 }
 0x27a   :  { %v9278_v47 = vpop.trf.xlu0  ;;  %11681 = vst [vmem:[#allocation44_spill] sm:$0xff] %v9314_v4 }
 0x27b   :  { %11672 = vst [vmem:[#allocation35_spill] sm:$0xff] %v9278_v47  ;;  %7382 = vmatmul.mubr.msk.f32.vlgmr.msra.gmra.mrb[24].mxu1 %vm834_vm2, %v691_v38 }
 0x27c   :  { %7408 = vmatpush3.msra.mxu1 %v9266_v34  ;;  %7384 = vmatprep.mubr.msk.f32.mxu1 %vm834_vm2, %v692_v40 }
 0x27d   :  { %7435 = vmatprep.subr.mxu1 %v9282_v48  ;;  %v9318_v28 = vpop.trf.xlu1 }
 0x27e   :  { %v9288_v49 = vpop.trf.xlu0  ;;  %11682 = vst [vmem:[#allocation45_spill] sm:$0xff] %v9318_v28 }
 0x27f   :  { %11674 = vst [vmem:[#allocation37_spill] sm:$0xff] %v9288_v49  ;;  %7385 = vmatmul.mubr.msk.f32.gmra.mrb[26].mxu1 %vm834_vm2, %v693_v43 }
 0x280   :  { %7387 = vmatprep.mubr.msk.f32.mxu1 %vm834_vm2, %v694_v44 }
 0x281   :  { %v9321_v38 = vpop.trf.xlu1 }
 0x282   :  { %v9292_v51 = vpop.trf.xlu0  ;;  %11683 = vst [vmem:[#allocation46_spill] sm:$0xff] %v9321_v38 }
 0x283   :  { %11675 = vst [vmem:[#allocation38_spill] sm:$0xff] %v9292_v51  ;;  %7388 = vmatmul.mubr.msk.f32.gmra.mrb[28].mxu1 %vm834_vm2, %v695_v46 }
 0x284   :  { %7390 = vmatprep.mubr.msk.f32.mxu1 %vm834_vm2, %v696_v50 }
 0x285   :  { %v9326_v41 = vpop.trf.xlu1 }
 0x286   :  { %v9296_v30 = vpop.trf.xlu0  ;;  %11685 = vst [vmem:[#allocation48_spill] sm:$0xff] %v9326_v41 }
 0x287   :  { %11676 = vst [vmem:[#allocation39_spill] sm:$0xff] %v9296_v30  ;;  %7391 = vmatmul.mubr.msk.f32.gmra.mrb[30].mxu1 %vm834_vm2, %v697_v19 }
 0x289   :  { %v9330_v16 = vpop.trf.xlu1 }
 0x28a   :  { %v9299_v52 = vpop.trf.xlu0  ;;  %11687 = vst [vmem:[#allocation50_spill] sm:$0xff] %v9330_v16 }
 0x28b   :  { %11677 = vst [vmem:[#allocation40_spill] sm:$0xff] %v9299_v52 }
 0x28d   :  { %v9336_v45 = vpop.trf.xlu1 }
 0x28e   :  { %v9301_v53 = vpop.trf.xlu0  ;;  %11690 = vst [vmem:[#allocation53_spill] sm:$0xff] %v9336_v45 }
 0x28f   :  { %11678 = vst [vmem:[#allocation41_spill] sm:$0xff] %v9301_v53 }
 0x291   :  { %v9340_v50 = vpop.trf.xlu1 }
 0x292   :  { %v9305_v7 = vpop.trf.xlu0  ;;  %802 = vxpose.xlu0.b32.start.end [1/1] (short) %v495_v55, 128  ;;  %11692 = vst [vmem:[#allocation55_spill] sm:$0xff] %v9340_v50 }
 0x293   :  { %11679 = vst [vmem:[#allocation42_spill] sm:$0xff] %v9305_v7 }
 0x296   :  { %v9307_v12 = vpop.trf.xlu0 }
 0x297   :  { %11680 = vst [vmem:[#allocation43_spill] sm:$0xff] %v9307_v12 }
 0x29a   :  { %v754_v13 = vpop.trf.xlu0 }
 0x29b   :  { %7409 = vmatprep.mubr.msk.f32.mxu1 %vm834_vm2, %v754_v13  ;;  %v9346_v13 = vpop.trf.xlu1 }
 0x29c   :  { %11695 = vst [vmem:[#allocation58_spill] sm:$0xff] %v9346_v13 }
 0x29e   :  { %v755_v1 = vpop.trf.xlu0 }
 0x29f   :  { %7410 = vmatmul.mubr.msk.f32.vlgmr.msra.gmra.mrb[32].mxu1 %vm834_vm2, %v755_v1 }
 0x2a0   :  { %7436 = vmatpush3.msra.mxu1 %v9282_v48 }
 0x2a2   :  { %v756_v17 = vpop.trf.xlu0 }
 0x2a3   :  { %7412 = vmatprep.mubr.msk.f32.mxu1 %vm834_vm2, %v756_v17  ;;  %v786_v17 = vpop.trf.xlu1 }
 0x2a6   :  { %v757_v20 = vpop.trf.xlu0 }
 0x2a7   :  { %7413 = vmatmul.mubr.msk.f32.gmra.mrb[34].mxu1 %vm834_vm2, %v757_v20 }
 0x2aa   :  { %v758_v14 = vpop.trf.xlu0 }
 0x2ab   :  { %7415 = vmatprep.mubr.msk.f32.mxu1 %vm834_vm2, %v758_v14 }
 0x2ae   :  { %v759_v21 = vpop.trf.xlu0 }
 0x2af   :  { %7416 = vmatmul.mubr.msk.f32.gmra.mrb[36].mxu1 %vm834_vm2, %v759_v21  ;;  %v787_v21 = vpop.trf.xlu1 }
 0x2b2   :  { %v760_v35 = vpop.trf.xlu0 }
 0x2b3   :  { %7418 = vmatprep.mubr.msk.f32.mxu1 %vm834_vm2, %v760_v35 }
 0x2b6   :  { %v761_v39 = vpop.trf.xlu0 }
 0x2b7   :  { %7419 = vmatmul.mubr.msk.f32.gmra.mrb[38].mxu1 %vm834_vm2, %v761_v39  ;;  %v788_v39 = vpop.trf.xlu1 }
 0x2ba   :  { %v9324_v40 = vpop.trf.xlu0 }
 0x2bb   :  { %11684 = vst [vmem:[#allocation47_spill] sm:$0xff] %v9324_v40  ;;  %v789_v26 = vpop.trf.xlu1 }
 0x2be   :  { %v9328_v43 = vpop.trf.xlu0 }
 0x2bf   :  { %11686 = vst [vmem:[#allocation49_spill] sm:$0xff] %v9328_v43 }
 0x2c2   :  { %v9332_v29 = vpop.trf.xlu0 }
 0x2c3   :  { %11688 = vst [vmem:[#allocation51_spill] sm:$0xff] %v9332_v29 }
 0x2c6   :  { %v9334_v44 = vpop.trf.xlu0 }
 0x2c7   :  { %11689 = vst [vmem:[#allocation52_spill] sm:$0xff] %v9334_v44 }
 0x2ca   :  { %v9338_v46 = vpop.trf.xlu0 }
 0x2cb   :  { %11691 = vst [vmem:[#allocation54_spill] sm:$0xff] %v9338_v46 }
 0x2ce   :  { %v9342_v19 = vpop.trf.xlu0 }
 0x2cf   :  { %11693 = vst [vmem:[#allocation56_spill] sm:$0xff] %v9342_v19 }
 0x2d2   :  { %v9344_v55 = vpop.trf.xlu0 }
 0x2d3   :  { %11694 = vst [vmem:[#allocation57_spill] sm:$0xff] %v9344_v55 }
 0x2d6   :  { %v9348_v1 = vpop.trf.xlu0 }
 0x2d7   :  { %11696 = vst [vmem:[#allocation59_spill] sm:$0xff] %v9348_v1 }
 0x2da   :  { %v722_v20 = vpop.trf.xlu0 }
 0x2db   :  { %7395 = vmatprep.mubr.msk.f32.mxu0 %vm834_vm2, %v722_v20  ;;  %v790_v20 = vpop.trf.xlu1 }
 0x2de   :  { %v723_v14 = vpop.trf.xlu0 }
 0x2df   :  { %7396 = vmatmul.mubr.msk.f32.vlgmr.msra.gmra.mrb[24].mxu0 %vm834_vm2, %v723_v14 }
 0x2e0   :  { %7422 = vmatpush3.msra.mxu0 %v9168_v22 }
 0x2e2   :  { %v724_v35 = vpop.trf.xlu0 }
 0x2e3   :  { %7398 = vmatprep.mubr.msk.f32.mxu0 %vm834_vm2, %v724_v35  ;;  %v9362_v35 = vpop.f32.mrb[19].mxu0 }
 0x2e4   :  { %11697 = vst [vmem:[#allocation60_spill] sm:$0xff] %v9362_v35 }
 0x2e6   :  { %v725_v32 = vpop.trf.xlu0 }
 0x2e7   :  { %7399 = vmatmul.mubr.msk.f32.gmra.mrb[26].mxu0 %vm834_vm2, %v725_v32 }
 0x2ea   :  { %v726_v31 = vpop.trf.xlu0 }
 0x2eb   :  { %7401 = vmatprep.mubr.msk.f32.mxu0 %vm834_vm2, %v726_v31  ;;  %v89_v31 = vld [vmem:[%s11547_s5 + $0x90] sm:$0xff] }
 0x2ee   :  { %v727_v27 = vpop.trf.xlu0 }
 0x2ef   :  { %7402 = vmatmul.mubr.msk.f32.gmra.mrb[28].mxu0 %vm834_vm2, %v727_v27  ;;  %v791_v27 = vpop.trf.xlu1 }
 0x2f2   :  { %v9357_v1 = vpop.f32.mrb[0].mxu1  ;;  %v728_v14 = vpop.trf.xlu0 }
 0x2f3   :  { %v9359_v55 = vpop.f32.mrb[1].mxu1  ;;  %7404 = vmatprep.mubr.msk.f32.mxu0 %vm834_vm2, %v728_v14 }
 0x2f4   :  { %v1867_v32 = vsel %vm120_vm1, %v9359_v55, -inf }
 0x2f5   :  { %1868 = vmax.xlane.f32.xlu1 %v1867_v32  ;;  %v792_v32 = vpop.trf.xlu1 }
 0x2f6   :  { %v729_v19 = vpop.trf.xlu0 }
 0x2f7   :  { %292 = vperm.xlu0 %8311, %v89_v31   ;;  %7405 = vmatmul.mubr.msk.f32.gmra.mrb[30].mxu0 %vm834_vm2, %v729_v19 }
 0x2f8   :  { %7423 = vmatprep.mubr.msk.f32.mxu0 %vm834_vm2, %v786_v17 }
 0x2f9   :  { %v793_v40 = vpop.trf.xlu1 }
 0x2fa   :  { %v9371_v46 = vpop.f32.mrb[2].mxu1  ;;  %v9373_v14 = vpop.trf.xlu0 }
 0x2fb   :  { %11698 = vst [vmem:[#allocation61_spill] sm:$0xff] %v9373_v14  ;;  %v9375_v44 = vpop.f32.mrb[3].mxu1  ;;  %v1876_v29 = vsel %vm120_vm1, %v9371_v46, -inf  ;;  %7424 = vmatmul.mubr.msk.f32.vlgmr.msra.gmra.mrb[32].mxu0 %vm834_vm2, %v787_v21 }
 0x2fc   :  { %1877 = vmax.xlane.f32.xlu1 %v1876_v29  ;;  %7426 = vmatprep.mubr.msk.f32.mxu0 %vm834_vm2, %v788_v39  ;;  %v1873_v60 = vsel %vm120_vm1, %v9375_v44, -inf }
 0x2fe   :  { %v9381_v31 = vpop.trf.xlu0 }
 0x2ff   :  { %11699 = vst [vmem:[#allocation62_spill] sm:$0xff] %v9381_v31  ;;  %7427 = vmatmul.mubr.msk.f32.gmra.mrb[34].mxu0 %vm834_vm2, %v789_v26  ;;  %v9430_v31 = vpop.f32.mrb[20].mxu0 }
 0x300   :  { %7429 = vmatprep.mubr.msk.f32.mxu0 %vm834_vm2, %v790_v20  ;;  %11706 = vst [vmem:[#allocation69_spill] sm:$0xff] %v9430_v31 }
 0x302   :  { %v9385_v19 = vpop.f32.mrb[4].mxu1  ;;  %v9387_v17 = vpop.trf.xlu0 }
 0x303   :  { %11700 = vst [vmem:[#allocation63_spill] sm:$0xff] %v9387_v17  ;;  %v9389_v43 = vpop.f32.mrb[5].mxu1  ;;  %7430 = vmatmul.mubr.msk.f32.gmra.mrb[36].mxu0 %vm834_vm2, %v791_v27  ;;  %v1882_v31 = vsel %vm120_vm1, %v9385_v19, -inf }
 0x304   :  { %7432 = vmatprep.mubr.msk.f32.mxu0 %vm834_vm2, %v792_v32  ;;  %v1879_v25 = vsel %vm120_vm1, %v9389_v43, -inf }
 0x306   :  { %v9393_v29 = vpop.trf.xlu0 }
 0x307   :  { %11701 = vst [vmem:[#allocation64_spill] sm:$0xff] %v9393_v29  ;;  %7433 = vmatmul.mubr.msk.f32.gmra.mrb[38].mxu0 %vm834_vm2, %v793_v40  ;;  %v1870_v40 = vsel %vm120_vm1, %v9357_v1, -inf }
 0x30a   :  { %v9396_v21 = vpop.f32.mrb[6].mxu1  ;;  %v9398_v26 = vpop.trf.xlu0 }
 0x30b   :  { %11702 = vst [vmem:[#allocation65_spill] sm:$0xff] %v9398_v26  ;;  %v9400_v39 = vpop.f32.mrb[7].mxu1 }
 0x30e   :  { %v9402_v20 = vpop.trf.xlu0  ;;  %v9404_v13 = vpop.f32.mrb[8].mxu1 }
 0x30f   :  { %11703 = vst [vmem:[#allocation66_spill] sm:$0xff] %v9402_v20  ;;  %v9406_v50 = vpop.f32.mrb[9].mxu1 }
 0x312   :  { %v9408_v27 = vpop.trf.xlu0  ;;  %v9410_v45 = vpop.f32.mrb[10].mxu1 }
 0x313   :  { %11704 = vst [vmem:[#allocation67_spill] sm:$0xff] %v9408_v27  ;;  %v9412_v32 = vpop.f32.mrb[11].mxu1 }
 0x314   :  { %v1897_v42 = vsel %vm120_vm1, %v9412_v32, -inf }
 0x316   :  { %1871 = vmax.xlane.f32.xlu0 %v1870_v40  ;;  %v9416_v16 = vpop.f32.mrb[12].mxu1  ;;  %v9418_v26 = vpop.trf.xlu0 }
 0x317   :  { %11705 = vst [vmem:[#allocation68_spill] sm:$0xff] %v9418_v26  ;;  %v9420_v29 = vpop.f32.mrb[13].mxu1  ;;  %v9432_v26 = vpop.f32.mrb[21].mxu0  ;;  %v1906_v24 = vsel %vm120_vm1, %v9416_v16, -inf }
 0x318   :  { %11707 = vst [vmem:[#allocation70_spill] sm:$0xff] %v9432_v26  ;;  %v9435_v14 = vpop.f32.mrb[22].mxu0 }
 0x319   :  { %11708 = vst [vmem:[#allocation71_spill] sm:$0xff] %v9435_v14  ;;  %v9437_v4 = vpop.f32.mrb[23].mxu0 }
 0x31a   :  { %v9422_v20 = vpop.f32.mrb[14].mxu1  ;;  %v818_v41 = vpop.trf.xlu0  ;;  %11709 = vst [vmem:[#allocation72_spill] sm:$0xff] %v9437_v4 }
 0x31b   :  { %v9424_v17 = vpop.f32.mrb[15].mxu1  ;;  %7437 = vmatprep.mubr.msk.f32.mxu1 %vm834_vm2, %v818_v41 }
 0x31e   :  { %v819_v27 = vpop.trf.xlu0 }
 0x31f   :  { %7438 = vmatmul.mubr.msk.f32.vlgmr.msra.gmra.mrb[40].mxu1 %vm834_vm2, %v819_v27 }
 0x322   :  { %v820_v38 = vpop.trf.xlu0 }
 0x323   :  { %7440 = vmatprep.mubr.msk.f32.mxu1 %vm834_vm2, %v820_v38 }
 0x326   :  { %v821_v40 = vpop.trf.xlu0 }
 0x327   :  { %7441 = vmatmul.mubr.msk.f32.gmra.mrb[42].mxu1 %vm834_vm2, %v821_v40 }
 0x32a   :  { %v822_v28 = vpop.trf.xlu0 }
 0x32b   :  { %7443 = vmatprep.mubr.msk.f32.mxu1 %vm834_vm2, %v822_v28 }
 0x32e   :  { %v823_v41 = vpop.trf.xlu0 }
 0x32f   :  { %7444 = vmatmul.mubr.msk.f32.gmra.mrb[44].mxu1 %vm834_vm2, %v823_v41 }
 0x332   :  { %v9440_v27 = vpop.f32.mrb[16].mxu1  ;;  %v824_v38 = vpop.trf.xlu0 }
 0x333   :  { %v9442_v12 = vpop.f32.mrb[17].mxu1  ;;  %7446 = vmatprep.mubr.msk.f32.mxu1 %vm834_vm2, %v824_v38 }
 0x336   :  { %v825_v40 = vpop.trf.xlu0 }
 0x337   :  { %7447 = vmatmul.mubr.msk.f32.gmra.mrb[46].mxu1 %vm834_vm2, %v825_v40 }
 0x33a   :  { %v9446_v54 = vpop.f32.mrb[18].mxu1 }
 0x33b   :  { %v9448_v28 = vpop.f32.mrb[19].mxu1 }
 0x342   :  { %v9450_v7 = vpop.f32.mrb[20].mxu1 }
 0x343   :  { %v9452_v8 = vpop.f32.mrb[21].mxu1 }
 0x344   :  { %11710 = vst [vmem:[#allocation73_spill] sm:$0xff] %v9452_v8 }
 0x34a   :  { %v9454_v53 = vpop.f32.mrb[22].mxu1 }
 0x34b   :  { %v9456_v41 = vpop.f32.mrb[23].mxu1 }
 0x34c   :  { %11711 = vst [vmem:[#allocation74_spill] sm:$0xff] %v9456_v41 }
 0x34e   :  { %v9458_v5 = vpop.f32.mrb[24].mxu1 }
 0x34f   :  { %v9460_v52 = vpop.f32.mrb[25].mxu1 }
 0x350   :  { %11712 = vst [vmem:[#allocation75_spill] sm:$0xff] %v9460_v52 }
 0x352   :  { %v9462_v38 = vpop.f32.mrb[26].mxu1 }
 0x353   :  { %v9464_v2 = vpop.f32.mrb[27].mxu1 }
 0x356   :  { %v9466_v40 = vpop.f32.mrb[28].mxu1 }
 0x357   :  { %v9468_v30 = vpop.f32.mrb[29].mxu1 }
 0x358   :  { %11713 = vst [vmem:[#allocation76_spill] sm:$0xff] %v9468_v30 }
 0x35a   :  { %v9470_v63 = vpop.f32.mrb[30].mxu1 }
 0x35b   :  { %v9472_v51 = vpop.f32.mrb[31].mxu1 }
 0x35c   :  { %11714 = vst [vmem:[#allocation77_spill] sm:$0xff] %v9472_v51 }
 0x372   :  { %v9474_v61 = vpop.f32.mrb[32].mxu1 }
 0x373   :  { %v9476_v49 = vpop.f32.mrb[33].mxu1 }
 0x374   :  { %11715 = vst [vmem:[#allocation78_spill] sm:$0xff] %v9476_v49 }
 0x37a   :  { %v9478_v59 = vpop.f32.mrb[34].mxu1 }
 0x37b   :  { %v9480_v47 = vpop.f32.mrb[35].mxu1 }
 0x382   :  { %v9482_v56 = vpop.f32.mrb[36].mxu1 }
 0x383   :  { %v9484_v15 = vpop.f32.mrb[37].mxu1 }
 0x384   :  { %11716 = vst [vmem:[#allocation79_spill] sm:$0xff] %v9484_v15 }
 0x38a   :  { %v9486_v9 = vpop.f32.mrb[38].mxu1 }
 0x38b   :  { %v9488_v14 = vpop.f32.mrb[39].mxu1 }
 0x3b2   :  { %v9490_v6 = vpop.f32.mrb[24].mxu0 }
 0x3b3   :  { %v9492_v3 = vpop.f32.mrb[25].mxu0  ;;  %v1966_v0 = vsel %vm120_vm1, %v9490_v6, -inf }
 0x3b4   :  { %1967 = vmax.xlane.f32.xlu1 %v1966_v0  ;;  %v1963_v62 = vsel %vm120_vm1, %v9492_v3, -inf }
 0x3b5   :  { %1964 = vmax.xlane.f32.xlu0 %v1963_v62  ;;  %v1885_v62 = vsel %vm120_vm1, %v9400_v39, -inf }
 0x3b8   :  { %1874 = vmax.xlane.f32.xlu1 %v1873_v60 }
 0x3ba   :  { %v9500_v57 = vpop.f32.mrb[26].mxu0 }
 0x3bb   :  { %v9502_v4 = vpop.f32.mrb[27].mxu0  ;;  %v1972_v0 = vsel %vm120_vm1, %v9500_v57, -inf }
 0x3bc   :  { %1883 = vmax.xlane.f32.xlu1 %v1882_v31  ;;  %v1969_v26 = vsel %vm120_vm1, %v9502_v4, -inf }
 0x3bd   :  { %1970 = vmax.xlane.f32.xlu0 %v1969_v26  ;;  %v1888_v26 = vsel %vm120_vm1, %v9396_v21, -inf }
 0x3c0   :  { %1973 = vmax.xlane.f32.xlu1 %v1972_v0 }
 0x3c1   :  { %1886 = vmax.xlane.f32.xlu0 %v1885_v62 }
 0x3c2   :  { %v9512_v60 = vpop.f32.mrb[28].mxu0 }
 0x3c3   :  { %v9514_v35 = vpop.f32.mrb[29].mxu0  ;;  %v1978_v0 = vsel %vm120_vm1, %v9512_v60, -inf }
 0x3c4   :  { %1880 = vmax.xlane.f32.xlu1 %v1879_v25  ;;  %v1975_v31 = vsel %vm120_vm1, %v9514_v35, -inf }
 0x3c5   :  { %1976 = vmax.xlane.f32.xlu0 %v1975_v31  ;;  %v1894_v31 = vsel %vm120_vm1, %v9404_v13, -inf }
 0x3c8   :  { %1889 = vmax.xlane.f32.xlu1 %v1888_v26  ;;  %v1903_v26 = vsel %vm120_vm1, %v9420_v29, -inf }
 0x3ca   :  { %v9524_v62 = vpop.f32.mrb[30].mxu0 }
 0x3cb   :  { %v9526_v36 = vpop.f32.mrb[31].mxu0  ;;  %v1984_v18 = vsel %vm120_vm1, %v9524_v62, -inf }
 0x3cc   :  { %1979 = vmax.xlane.f32.xlu1 %v1978_v0  ;;  %v1981_v48 = vsel %vm120_vm1, %v9526_v36, -inf }
 0x3cd   :  { %1982 = vmax.xlane.f32.xlu0 %v1981_v48  ;;  %v1891_v48 = vsel %vm120_vm1, %v9406_v50, -inf }
 0x3ce   :  { %v9530_v25 = vpop.f32.mrb[32].mxu0 }
 0x3cf   :  { %v9534_v23 = vpop.f32.mrb[33].mxu0 }
 0x3d0   :  { %1895 = vmax.xlane.f32.xlu1 %v1894_v31  ;;  %v2011_v33 = vsel %vm120_vm1, %v9534_v23, -inf  ;;  %v1900_v31 = vsel %vm120_vm1, %v9410_v45, -inf }
 0x3d1   :  { %1904 = vmax.xlane.f32.xlu0 %v1903_v26  ;;  %v1909_v26 = vsel %vm120_vm1, %v9424_v17, -inf }
 0x3d2   :  { %v9540_v0 = vpop.f32.mrb[34].mxu0 }
 0x3d3   :  { %v9544_v34 = vpop.f32.mrb[35].mxu0 }
 0x3d4   :  { %1892 = vmax.xlane.f32.xlu1 %v1891_v48  ;;  %v2017_v11 = vsel %vm120_vm1, %v9544_v34, -inf }
 0x3d5   :  { %2012 = vmax.xlane.f32.xlu0 %v2011_v33 }
 0x3d6   :  { %v9546_v22 = vpop.f32.mrb[36].mxu0 }
 0x3d7   :  { %v9550_v58 = vpop.f32.mrb[37].mxu0 }
 0x3d8   :  { %1901 = vmax.xlane.f32.xlu1 %v1900_v31  ;;  %v9564_v31 = vpop.trf.xlu1  ;;  %v2023_v10 = vsel %vm120_vm1, %v9550_v58, -inf }
 0x3d9   :  { %1910 = vmax.xlane.f32.xlu0 %v1909_v26  ;;  %11719 = vst [vmem:[#allocation82_spill] sm:$0xff] %v9564_v31  ;;  %v1915_v26 = vsel %vm120_vm1, %v9442_v12, -inf  ;;  %v1912_v31 = vsel %vm120_vm1, %v9422_v20, -inf }
 0x3da   :  { %v9558_v48 = vpop.f32.mrb[38].mxu0 }
 0x3db   :  { %11717 = vst [vmem:[#allocation80_spill] sm:$0xff] %v9558_v48  ;;  %v9560_v33 = vpop.f32.mrb[39].mxu0 }
 0x3dc   :  { %11718 = vst [vmem:[#allocation81_spill] sm:$0xff] %v9560_v33  ;;  %1985 = vmax.xlane.f32.xlu1 %v1984_v18  ;;  %v9574_v18 = vpop.trf.xlu1 }
 0x3dd   :  { %2018 = vmax.xlane.f32.xlu0 %v2017_v11  ;;  %v2014_v11 = vsel %vm120_vm1, %v9530_v25, -inf  ;;  %11720 = vst [vmem:[#allocation83_spill] sm:$0xff] %v9574_v18 }
 0x3e0   :  { %1898 = vmax.xlane.f32.xlu1 %v1897_v42  ;;  %v1921_v42 = vsel %vm120_vm1, %v9448_v28, -inf  ;;  %v9582_v37 = vpop.trf.xlu1 }
 0x3e1   :  { %1916 = vmax.xlane.f32.xlu0 %v1915_v26  ;;  %v2029_v26 = vsel %vm120_vm1, %v9560_v33, -inf  ;;  %11721 = vst [vmem:[#allocation84_spill] sm:$0xff] %v9582_v37  ;;  %v1918_v33 = vsel %vm120_vm1, %v9440_v27, -inf }
 0x3e4   :  { %1907 = vmax.xlane.f32.xlu1 %v1906_v24  ;;  %v9586_v24 = vpop.trf.xlu0 }
 0x3e5   :  { %2024 = vmax.xlane.f32.xlu0 %v2023_v10  ;;  %v2020_v10 = vsel %vm120_vm1, %v9540_v0, -inf  ;;  %11722 = vst [vmem:[#allocation85_spill] sm:$0xff] %v9586_v24  ;;  %v1939_v24 = vsel %vm120_vm1, %v9460_v52, -inf }
 0x3e8   :  { %2015 = vmax.xlane.f32.xlu1 %v2014_v11  ;;  %v1927_v11 = vsel %vm120_vm1, %v9452_v8, -inf }
 0x3e9   :  { %1922 = vmax.xlane.f32.xlu0 %v1921_v42  ;;  %v9590_v42 = vpop.trf.xlu1 }
 0x3ea   :  { %11723 = vst [vmem:[#allocation86_spill] sm:$0xff] %v9590_v42 }
 0x3ec   :  { %1913 = vmax.xlane.f32.xlu1 %v1912_v31  ;;  %v1933_v31 = vsel %vm120_vm1, %v9456_v41, -inf }
 0x3ed   :  { %2030 = vmax.xlane.f32.xlu0 %v2029_v26  ;;  %v9600_v26 = vpop.trf.xlu0 }
 0x3ee   :  { %11724 = vst [vmem:[#allocation87_spill] sm:$0xff] %v9600_v26 }
 0x3f0   :  { %2021 = vmax.xlane.f32.xlu1 %v2020_v10  ;;  %v2026_v10 = vsel %vm120_vm1, %v9546_v22, -inf }
 0x3f1   :  { %1928 = vmax.xlane.f32.xlu0 %v1927_v11  ;;  %v9604_v11 = vpop.trf.xlu1  ;;  %v9610_v8 = vpop.trf.xlu0 }
 0x3f2   :  { %v9592_v18 = vpop.f32.mrb[40].mxu1  ;;  %11725 = vst [vmem:[#allocation88_spill] sm:$0xff] %v9604_v11  ;;  %11726 = vst [vmem:[#allocation89_spill] sm:$0xff] %v9610_v8 }
 0x3f3   :  { %v9596_v37 = vpop.f32.mrb[41].mxu1 }
 0x3f4   :  { %1919 = vmax.xlane.f32.xlu1 %v1918_v33  ;;  %v1924_v33 = vsel %vm120_vm1, %v9446_v54, -inf }
 0x3f5   :  { %1934 = vmax.xlane.f32.xlu0 %v1933_v31  ;;  %v1945_v31 = vsel %vm120_vm1, %v9464_v2, -inf  ;;  %v9620_v26 = vpop.trf.xlu1  ;;  %v9624_v8 = vpop.trf.xlu0 }
 0x3f6   :  { %11727 = vst [vmem:[#allocation90_spill] sm:$0xff] %v9620_v26  ;;  %11728 = vst [vmem:[#allocation91_spill] sm:$0xff] %v9624_v8  ;;  %v1957_v26 = vsel %vm120_vm1, %v9472_v51, -inf  ;;  %v1936_v8 = vsel %vm120_vm1, %v9454_v53, -inf }
 0x3f8   :  { %2027 = vmax.xlane.f32.xlu1 %v2026_v10  ;;  %v2032_v10 = vsel %vm120_vm1, %v9558_v48, -inf }
 0x3f9   :  { %1940 = vmax.xlane.f32.xlu0 %v1939_v24  ;;  %v1951_v24 = vsel %vm120_vm1, %v9468_v30, -inf }
 0x3fa   :  { %v9608_v42 = vpop.f32.mrb[42].mxu1 }
 0x3fb   :  { %v9614_v41 = vpop.f32.mrb[43].mxu1 }
 0x3fc   :  { %1925 = vmax.xlane.f32.xlu1 %v1924_v33  ;;  %v1930_v33 = vsel %vm120_vm1, %v9450_v7, -inf }
 0x3fd   :  { %1946 = vmax.xlane.f32.xlu0 %v1945_v31  ;;  %v9632_v31 = vpop.trf.xlu1 }
 0x3fe   :  { %11731 = vst [vmem:[#allocation94_spill] sm:$0xff] %v9632_v31 }
 0x400   :  { %2033 = vmax.xlane.f32.xlu1 %v2032_v10  ;;  %v9636_v10 = vpop.trf.xlu0 }
 0x401   :  { %1952 = vmax.xlane.f32.xlu0 %v1951_v24  ;;  %11732 = vst [vmem:[#allocation95_spill] sm:$0xff] %v9636_v10  ;;  %v1987_v24 = vsel %vm120_vm1, %v9476_v49, -inf  ;;  %v9642_v48 = vpop.trf.xlu1 }
 0x402   :  { %v9626_v11 = vpop.f32.mrb[44].mxu1  ;;  %11733 = vst [vmem:[#allocation96_spill] sm:$0xff] %v9642_v48  ;;  %v1999_v48 = vsel %vm120_vm1, %v9484_v15, -inf  ;;  %v1960_v15 = vsel %vm120_vm1, %v9470_v63, -inf }
 0x403   :  { %11729 = vst [vmem:[#allocation92_spill] sm:$0xff] %v9626_v11  ;;  %v9630_v52 = vpop.f32.mrb[45].mxu1 }
 0x404   :  { %11730 = vst [vmem:[#allocation93_spill] sm:$0xff] %v9630_v52  ;;  %1931 = vmax.xlane.f32.xlu1 %v1930_v33  ;;  %v1942_v33 = vsel %vm120_vm1, %v9458_v5, -inf  ;;  %v9652_v10 = vpop.trf.xlu0 }
 0x405   :  { %1958 = vmax.xlane.f32.xlu0 %v1957_v26  ;;  %v1993_v26 = vsel %vm120_vm1, %v9480_v47, -inf  ;;  %11736 = vst [vmem:[#allocation99_spill] sm:$0xff] %v9652_v10  ;;  %v2035_v10 = vsel %vm120_vm1, %v9596_v37, -inf }
 0x408   :  { %1937 = vmax.xlane.f32.xlu1 %v1936_v8  ;;  %v1948_v8 = vsel %vm120_vm1, %v9462_v38, -inf  ;;  %v9658_v49 = vpop.trf.xlu0 }
 0x409   :  { %1988 = vmax.xlane.f32.xlu0 %v1987_v24  ;;  %v1869_v24 = vpop.xlane.xlu1 %1868  ;;  %11737 = vst [vmem:[#allocation100_spill] sm:$0xff] %v9658_v49  ;;  %v2008_v49 = vsel %vm120_vm1, %v9486_v9, -inf }
 0x40a   :  { %v9644_v30 = vpop.f32.mrb[46].mxu1  ;;  %v2059_v51 = vsub.f32 %v9359_v55, %v1869_v24  ;;  %v2041_v55 = vsel %vm120_vm1, %v9614_v41, -inf  ;;  %v1990_v24 = vsel %vm120_vm1, %v9474_v61, -inf }
 0x40b   :  { %11734 = vst [vmem:[#allocation97_spill] sm:$0xff] %v9644_v30  ;;  %v9648_v31 = vpop.f32.mrb[47].mxu1 }
 0x40c   :  { %11735 = vst [vmem:[#allocation98_spill] sm:$0xff] %v9648_v31  ;;  %1943 = vmax.xlane.f32.xlu1 %v1942_v33  ;;  %v1954_v33 = vsel %vm120_vm1, %v9466_v40, -inf }
 0x40d   :  { %1994 = vmax.xlane.f32.xlu0 %v1993_v26  ;;  %v2005_v26 = vsel %vm120_vm1, %v9488_v14, -inf }
 0x410   :  { %1949 = vmax.xlane.f32.xlu1 %v1948_v8  ;;  %v2123_v8 = vmul.f32 1.442695, %v2059_v51 }
 0x411   :  { %2000 = vmax.xlane.f32.xlu0 %v1999_v48  ;;  %v9669_v48 = vpop.trf.xlu0 }
 0x412   :  { %11738 = vst [vmem:[#allocation101_spill] sm:$0xff] %v9669_v48  ;;  %8347 = vpow2.f32 %v2123_v8  ;;  %v2002_v8 = vsel %vm120_vm1, %v9482_v56, -inf  ;;  %v1878_v48 = vpop.xlane.xlu1 %1877 }
 0x414   :  { %1955 = vmax.xlane.f32.xlu1 %v1954_v33  ;;  %v2047_v33 = vsel %vm120_vm1, %v9630_v52, -inf }
 0x415   :  { %2006 = vmax.xlane.f32.xlu0 %v2005_v26  ;;  %v9677_v51 = vpop.permute.xlu0 %292 }
 0x416   :  { %11739 = vst [vmem:[#allocation102_spill] sm:$0xff] %v9677_v51  ;;  %v2062_v51 = vsub.f32 %v9371_v46, %v1878_v48 }
 0x418   :  { %1961 = vmax.xlane.f32.xlu1 %v1960_v15  ;;  %v1996_v15 = vsel %vm120_vm1, %v9478_v59, -inf }
 0x419   :  { %2036 = vmax.xlane.f32.xlu0 %v2035_v10  ;;  %v2053_v10 = vsel %vm120_vm1, %v9648_v31, -inf  ;;  %v1872_v26 = vpop.xlane.xlu0 %1871 }
 0x41c   :  { %1991 = vmax.xlane.f32.xlu1 %v1990_v24  ;;  %v9685_v24 = vpop.eup %8347 }
 0x41d   :  { %2042 = vmax.xlane.f32.xlu0 %v2041_v55  ;;  %v2060_v55 = vsub.f32 %v9357_v1, %v1872_v26  ;;  %v2129_v1 = vmul.f32 1.442695, %v2062_v51  ;;  %v2056_v26 = vsel %vm120_vm1, %v9644_v30, -inf }
 0x420   :  { %1997 = vmax.xlane.f32.xlu1 %v1996_v15  ;;  %v2038_v15 = vsel %vm120_vm1, %v9592_v18, -inf }
 0x421   :  { %2048 = vmax.xlane.f32.xlu0 %v2047_v33  ;;  %v2251_v33 = vsel %vm120_vm1, %v9685_v24, 0.0 }
 0x424   :  { %2003 = vmax.xlane.f32.xlu1 %v2002_v8  ;;  %v2125_v8 = vmul.f32 1.442695, %v2060_v55 }
 0x425   :  { %2054 = vmax.xlane.f32.xlu0 %v2053_v10  ;;  %v2044_v10 = vsel %vm120_vm1, %v9608_v42, -inf }
 0x426   :  { %8349 = vpow2.f32 %v2125_v8 }
 0x427   :  { %8351 = vpow2.f32 %v2129_v1 }
 0x428   :  { %2009 = vmax.xlane.f32.xlu1 %v2008_v49  ;;  %v2050_v49 = vsel %vm120_vm1, %v9626_v11, -inf }
 0x429   :  { %2252 = vadd.xlane.f32.xlu0 %v2251_v33 }
 0x42c   :  { %2039 = vmax.xlane.f32.xlu1 %v2038_v15 }
 0x430   :  { %2045 = vmax.xlane.f32.xlu1 %v2044_v10  ;;  %v9701_v33 = vpop.eup %8349 }
 0x431   :  { %v2254_v46 = vsel %vm120_vm1, %v9701_v33, 0.0  ;;  %v9705_v48 = vpop.eup %8351 }
 0x432   :  { %11740 = vst [vmem:[#allocation103_spill] sm:$0xff] %v9705_v48  ;;  %v2260_v51 = vsel %vm120_vm1, %v9705_v48, 0.0 }
 0x434   :  { %2051 = vmax.xlane.f32.xlu1 %v2050_v49 }
 0x438   :  { %2057 = vmax.xlane.f32.xlu1 %v2056_v26 }
 0x43c   :  { %2255 = vadd.xlane.f32.xlu1 %v2254_v46 }
 0x440   :  { %2261 = vadd.xlane.f32.xlu1 %v2260_v51 }
 0x441   :  { %v1968_v55 = vpop.xlane.xlu1 %1967 }
 0x442   :  { %v2092_v15 = vsub.f32 %v9490_v6, %v1968_v55  ;;  %v1965_v8 = vpop.xlane.xlu0 %1964 }
 0x443   :  { %v2091_v1 = vsub.f32 %v9492_v3, %v1965_v8 }
 0x444   :  { %v2189_v10 = vmul.f32 1.442695, %v2092_v15 }
 0x445   :  { %v1875_v49 = vpop.xlane.xlu1 %1874  ;;  %v2187_v30 = vmul.f32 1.442695, %v2091_v1 }
 0x446   :  { %8353 = vpow2.f32 %v2189_v10  ;;  %v2061_v26 = vsub.f32 %v9375_v44, %v1875_v49 }
 0x448   :  { %v2127_v31 = vmul.f32 1.442695, %v2061_v26 }
 0x449   :  { %v1884_v11 = vpop.xlane.xlu1 %1883 }
 0x44a   :  { %8355 = vpow2.f32 %v2127_v31  ;;  %v2064_v46 = vsub.f32 %v9385_v19, %v1884_v11  ;;  %v1971_v52 = vpop.xlane.xlu0 %1970 }
 0x44b   :  { %8357 = vpow2.f32 %v2187_v30  ;;  %v2093_v55 = vsub.f32 %v9502_v4, %v1971_v52 }
 0x44c   :  { %v2133_v51 = vmul.f32 1.442695, %v2064_v46 }
 0x44d   :  { %v1974_v48 = vpop.xlane.xlu1 %1973  ;;  %v2191_v30 = vmul.f32 1.442695, %v2093_v55 }
 0x44e   :  { %8359 = vpow2.f32 %v2133_v51  ;;  %v2094_v6 = vsub.f32 %v9500_v57, %v1974_v48  ;;  %v1887_v3 = vpop.xlane.xlu0 %1886 }
 0x44f   :  { %v2065_v31 = vsub.f32 %v9400_v39, %v1887_v3  ;;  %v11581_v3 = vmov 0.0|0.0  }
 0x450   :  { %v9715_v15 = vpop.eup %8353  ;;  %v2193_v8 = vmul.f32 1.442695, %v2094_v6  ;;  %7965 = vmatprep.subr.bf16.mxu0 %v11581_v3  ;;  %7981 = vmatprep.subr.bf16.mxu1 %v11581_v3 }
 0x451   :  { %v1881_v44 = vpop.xlane.xlu1 %1880  ;;  %v2350_v10 = vsel %vm120_vm1, %v9715_v15, 0.0  ;;  %v2135_v26 = vmul.f32 1.442695, %v2065_v31 }
 0x452   :  { %8361 = vpow2.f32 %v2193_v8  ;;  %v2063_v19 = vsub.f32 %v9389_v43, %v1881_v44  ;;  %2351 = vadd.xlane.f32.xlu1 %v2350_v10  ;;  %v1977_v48 = vpop.xlane.xlu0 %1976 }
 0x453   :  { %v2095_v46 = vsub.f32 %v9514_v35, %v1977_v48 }
 0x454   :  { %v9720_v11 = vpop.eup %8355  ;;  %v2131_v57 = vmul.f32 1.442695, %v2063_v19 }
 0x455   :  { %v1890_v52 = vpop.xlane.xlu1 %1889  ;;  %v2257_v4 = vsel %vm120_vm1, %v9720_v11, 0.0  ;;  %v9725_v1 = vpop.eup %8357  ;;  %v2195_v44 = vmul.f32 1.442695, %v2095_v46 }
 0x456   :  { %8363 = vpow2.f32 %v2131_v57  ;;  %v2066_v49 = vsub.f32 %v9396_v21, %v1890_v52  ;;  %2258 = vadd.xlane.f32.xlu0 %v2257_v4  ;;  %v2347_v55 = vsel %vm120_vm1, %v9725_v1, 0.0 }
 0x457   :  { %8365 = vpow2.f32 %v2191_v30 }
 0x458   :  { %v9728_v43 = vpop.eup %8359  ;;  %v2137_v51 = vmul.f32 1.442695, %v2066_v49 }
 0x459   :  { %v1980_v39 = vpop.xlane.xlu1 %1979  ;;  %v2266_v6 = vsel %vm120_vm1, %v9728_v43, 0.0 }
 0x45a   :  { %8367 = vpow2.f32 %v2137_v51  ;;  %v2096_v21 = vsub.f32 %v9512_v60, %v1980_v39  ;;  %2267 = vadd.xlane.f32.xlu1 %v2266_v6  ;;  %2348 = vadd.xlane.f32.xlu0 %v2347_v55  ;;  %v1983_v8 = vpop.xlane.xlu0 %1982 }
 0x45b   :  { %8369 = vpow2.f32 %v2135_v26 }
 0x45c   :  { %v9738_v35 = vpop.eup %8361  ;;  %v2197_v10 = vmul.f32 1.442695, %v2096_v21 }
 0x45d   :  { %v1896_v19 = vpop.xlane.xlu1 %1895  ;;  %v2356_v30 = vsel %vm120_vm1, %v9738_v35, 0.0 }
 0x45e   :  { %8371 = vpow2.f32 %v2197_v10  ;;  %v2068_v31 = vsub.f32 %v9404_v13, %v1896_v19  ;;  %2357 = vadd.xlane.f32.xlu1 %v2356_v30  ;;  %v1905_v57 = vpop.xlane.xlu0 %1904  ;;  %v2097_v13 = vsub.f32 %v9526_v36, %v1983_v8 }
 0x45f   :  { %8373 = vpow2.f32 %v2195_v44 }
 0x460   :  { %v9743_v48 = vpop.eup %8363  ;;  %v2141_v60 = vmul.f32 1.442695, %v2068_v31  ;;  %v2199_v30 = vmul.f32 1.442695, %v2097_v13  ;;  %v2071_v13 = vsub.f32 %v9420_v29, %v1905_v57 }
 0x461   :  { %v9745_v52 = vpop.eup %8365  ;;  %v1893_v4 = vpop.xlane.xlu1 %1892  ;;  %v2263_v49 = vsel %vm120_vm1, %v9743_v48, 0.0 }
 0x462   :  { %8375 = vpow2.f32 %v2141_v60  ;;  %v2067_v26 = vsub.f32 %v9406_v50, %v1893_v4  ;;  %2264 = vadd.xlane.f32.xlu0 %v2263_v49  ;;  %v2013_v46 = vpop.xlane.xlu0 %2012  ;;  %v2353_v21 = vsel %vm120_vm1, %v9745_v52, 0.0 }
 0x464   :  { %v9750_v51 = vpop.eup %8367  ;;  %v2139_v39 = vmul.f32 1.442695, %v2067_v26 }
 0x465   :  { %v1902_v6 = vpop.xlane.xlu1 %1901  ;;  %v2272_v55 = vsel %vm120_vm1, %v9750_v51, 0.0  ;;  %v9757_v44 = vpop.eup %8369 }
 0x466   :  { %8377 = vpow2.f32 %v2139_v39  ;;  %v2070_v10 = vsub.f32 %v9410_v45, %v1902_v6  ;;  %2273 = vadd.xlane.f32.xlu1 %v2272_v55  ;;  %2354 = vadd.xlane.f32.xlu0 %v2353_v21  ;;  %v1911_v50 = vpop.xlane.xlu0 %1910  ;;  %v2269_v60 = vsel %vm120_vm1, %v9757_v44, 0.0 }
 0x468   :  { %v9760_v19 = vpop.eup %8371  ;;  %v2145_v36 = vmul.f32 1.442695, %v2070_v10 }
 0x469   :  { %v1986_v8 = vpop.xlane.xlu1 %1985  ;;  %v2362_v31 = vsel %vm120_vm1, %v9760_v19, 0.0  ;;  %v9766_v4 = vpop.eup %8373 }
 0x46a   :  { %8379 = vpow2.f32 %v2145_v36  ;;  %v2098_v49 = vsub.f32 %v9524_v62, %v1986_v8  ;;  %2363 = vadd.xlane.f32.xlu1 %v2362_v31  ;;  %2270 = vadd.xlane.f32.xlu0 %v2269_v60  ;;  %v2019_v45 = vpop.xlane.xlu0 %2018  ;;  %v2359_v21 = vsel %vm120_vm1, %v9766_v4, 0.0  ;;  %v2147_v8 = vmul.f32 1.442695, %v2071_v13 }
 0x46b   :  { %8381 = vpow2.f32 %v2199_v30  ;;  %v2107_v30 = vsub.f32 %v9534_v23, %v2013_v46 }
 0x46c   :  { %v9769_v26 = vpop.eup %8375  ;;  %v2201_v39 = vmul.f32 1.442695, %v2098_v49 }
 0x46d   :  { %v1899_v6 = vpop.xlane.xlu1 %1898  ;;  %v2278_v55 = vsel %vm120_vm1, %v9769_v26, 0.0 }
 0x46e   :  { %8383 = vpow2.f32 %v2201_v39  ;;  %v2069_v10 = vsub.f32 %v9412_v32, %v1899_v6  ;;  %2279 = vadd.xlane.f32.xlu1 %v2278_v55  ;;  %2360 = vadd.xlane.f32.xlu0 %v2359_v21  ;;  %v1917_v62 = vpop.xlane.xlu0 %1916  ;;  %v2219_v32 = vmul.f32 1.442695, %v2107_v30  ;;  %v2073_v6 = vsub.f32 %v9424_v17, %v1911_v50 }
 0x470   :  { %v9777_v36 = vpop.eup %8377  ;;  %v2143_v29 = vmul.f32 1.442695, %v2069_v10 }
 0x471   :  { %v1908_v57 = vpop.xlane.xlu1 %1907  ;;  %v2275_v31 = vsel %vm120_vm1, %v9777_v36, 0.0 }
 0x472   :  { %8385 = vpow2.f32 %v2143_v29  ;;  %v2072_v60 = vsub.f32 %v9416_v16, %v1908_v57  ;;  %2276 = vadd.xlane.f32.xlu0 %v2275_v31  ;;  %v2025_v49 = vpop.xlane.xlu0 %2024  ;;  %v2151_v29 = vmul.f32 1.442695, %v2073_v6 }
 0x473   :  { %8387 = vpow2.f32 %v2147_v8  ;;  %v2109_v8 = vsub.f32 %v9544_v34, %v2019_v45  ;;  %v2075_v34 = vsub.f32 %v9442_v12, %v1917_v62 }
 0x474   :  { %v9783_v39 = vpop.eup %8379  ;;  %v2149_v55 = vmul.f32 1.442695, %v2072_v60 }
 0x475   :  { %v2016_v13 = vpop.xlane.xlu1 %2015  ;;  %v2284_v23 = vsel %vm120_vm1, %v9783_v39, 0.0  ;;  %v9788_v46 = vpop.eup %8381 }
 0x476   :  { %11741 = vst [vmem:[#allocation104_spill] sm:$0xff] %v9788_v46  ;;  %8389 = vpow2.f32 %v2149_v55  ;;  %v2108_v21 = vsub.f32 %v9530_v25, %v2016_v13  ;;  %2285 = vadd.xlane.f32.xlu1 %v2284_v23  ;;  %v1923_v16 = vpop.xlane.xlu0 %1922  ;;  %v2365_v57 = vsel %vm120_vm1, %v9788_v46, 0.0 }
 0x477   :  { %8391 = vpow2.f32 %v2219_v32  ;;  %v2223_v32 = vmul.f32 1.442695, %v2109_v8 }
 0x478   :  { %v9791_v10 = vpop.eup %8383  ;;  %v2221_v30 = vmul.f32 1.442695, %v2108_v21 }
 0x479   :  { %11742 = vst [vmem:[#allocation105_spill] sm:$0xff] %v9791_v10  ;;  %v1914_v17 = vpop.xlane.xlu1 %1913  ;;  %v2368_v50 = vsel %vm120_vm1, %v9791_v10, 0.0 }
 0x47a   :  { %8393 = vpow2.f32 %v2221_v30  ;;  %v2074_v31 = vsub.f32 %v9422_v20, %v1914_v17  ;;  %2369 = vadd.xlane.f32.xlu0 %v2368_v50  ;;  %2366 = vadd.xlane.f32.xlu1 %v2365_v57  ;;  %v9799_v25 = vpop.xlane.xlu0 %2030  ;;  %v2155_v30 = vmul.f32 1.442695, %v2075_v34 }
 0x47b   :  { %8395 = vpow2.f32 %v2151_v29  ;;  %v2111_v29 = vsub.f32 %v9550_v58, %v2025_v49  ;;  %v2077_v49 = vsub.f32 %v9448_v28, %v1923_v16  ;;  %v11745_v16 = vld [vmem:[#allocation73_spill] sm:$0xff] }
 0x47c   :  { %v9801_v60 = vpop.eup %8385  ;;  %v2153_v45 = vmul.f32 1.442695, %v2074_v31 }
 0x47d   :  { %v2022_v6 = vpop.xlane.xlu1 %2021  ;;  %v2281_v55 = vsel %vm120_vm1, %v9801_v60, 0.0  ;;  %v9806_v13 = vpop.eup %8387  ;;  %v2227_v58 = vmul.f32 1.442695, %v2111_v29  ;;  %v2159_v28 = vmul.f32 1.442695, %v2077_v49 }
 0x47e   :  { %8397 = vpow2.f32 %v2153_v45  ;;  %v2110_v20 = vsub.f32 %v9540_v0, %v2022_v6  ;;  %2282 = vadd.xlane.f32.xlu0 %v2281_v55  ;;  %v1929_v23 = vpop.xlane.xlu0 %1928  ;;  %v2287_v17 = vsel %vm120_vm1, %v9806_v13, 0.0 }
 0x47f   :  { %8399 = vpow2.f32 %v2223_v32  ;;  %v2079_v29 = vsub.f32 %v11745_v16, %v1929_v23  ;;  %v11579_v16 = vmov 0.0  }
 0x480   :  { %v9809_v21 = vpop.eup %8389  ;;  %v2225_v8 = vmul.f32 1.442695, %v2110_v20  ;;  %7465 = vmatprep.mubr.msk.f32.mxu0 %vm8914_vm3, %v11579_v16  ;;  %7484 = vmatprep.mubr.msk.f32.mxu1 %vm8914_vm3, %v11579_v16 }
 0x481   :  { %v1920_v12 = vpop.xlane.xlu1 %1919  ;;  %v2290_v62 = vsel %vm120_vm1, %v9809_v21, 0.0  ;;  %v9816_v50 = vpop.eup %8391  ;;  %v2163_v23 = vmul.f32 1.442695, %v2079_v29  ;;  %v11748_v29 = vld [vmem:[#allocation74_spill] sm:$0xff] }
 0x482   :  { %11743 = vst [vmem:[#allocation106_spill] sm:$0xff] %v9816_v50  ;;  %8401 = vpow2.f32 %v2225_v8  ;;  %v2076_v0 = vsub.f32 %v9440_v27, %v1920_v12  ;;  %2291 = vadd.xlane.f32.xlu1 %v2290_v62  ;;  %2288 = vadd.xlane.f32.xlu0 %v2287_v17  ;;  %v1935_v57 = vpop.xlane.xlu0 %1934  ;;  %v2395_v6 = vsel %vm120_vm1, %v9816_v50, 0.0 }
 0x483   :  { %8403 = vpow2.f32 %v2155_v30 }
 0x484   :  { %v9819_v31 = vpop.eup %8393  ;;  %v2157_v32 = vmul.f32 1.442695, %v2076_v0 }
 0x485   :  { %11744 = vst [vmem:[#allocation107_spill] sm:$0xff] %v9819_v31  ;;  %v2028_v34 = vpop.xlane.xlu1 %2027  ;;  %v2398_v45 = vsel %vm120_vm1, %v9819_v31, 0.0  ;;  %v9826_v55 = vpop.eup %8395 }
 0x486   :  { %8405 = vpow2.f32 %v2157_v32  ;;  %v2112_v27 = vsub.f32 %v9546_v22, %v2028_v34  ;;  %2399 = vadd.xlane.f32.xlu1 %v2398_v45  ;;  %2396 = vadd.xlane.f32.xlu0 %v2395_v6  ;;  %v1941_v20 = vpop.xlane.xlu0 %1940  ;;  %v2293_v17 = vsel %vm120_vm1, %v9826_v55, 0.0 }
 0x487   :  { %8407 = vpow2.f32 %v2227_v58 }
 0x488   :  { %v9829_v30 = vpop.eup %8397  ;;  %v2229_v8 = vmul.f32 1.442695, %v2112_v27 }
 0x489   :  { %v1926_v12 = vpop.xlane.xlu1 %1925  ;;  %v2296_v62 = vsel %vm120_vm1, %v9829_v30, 0.0  ;;  %v9836_v0 = vpop.eup %8399 }
 0x48a   :  { %11746 = vst [vmem:[#allocation73_spill] sm:$0xff] %v9836_v0  ;;  %8409 = vpow2.f32 %v2229_v8  ;;  %v2078_v22 = vsub.f32 %v9446_v54, %v1926_v12  ;;  %2297 = vadd.xlane.f32.xlu1 %v2296_v62  ;;  %2294 = vadd.xlane.f32.xlu0 %v2293_v17  ;;  %v1947_v32 = vpop.xlane.xlu0 %1946  ;;  %v2401_v6 = vsel %vm120_vm1, %v9836_v0, 0.0  ;;  %v2081_v8 = vsub.f32 %v11748_v29, %v1935_v57 }
 0x48b   :  { %8411 = vpow2.f32 %v2159_v28 }
 0x48c   :  { %v9839_v58 = vpop.eup %8401  ;;  %v2161_v49 = vmul.f32 1.442695, %v2078_v22  ;;  %v2167_v16 = vmul.f32 1.442695, %v2081_v8  ;;  %v2085_v8 = vsub.f32 %v9464_v2, %v1947_v32 }
 0x48d   :  { %11747 = vst [vmem:[#allocation108_spill] sm:$0xff] %v9839_v58  ;;  %v9841_v34 = vpop.xlane.xlu1 %2033  ;;  %v2404_v45 = vsel %vm120_vm1, %v9839_v58, 0.0  ;;  %v9847_v27 = vpop.eup %8403 }
 0x48e   :  { %8413 = vpow2.f32 %v2161_v49  ;;  %2405 = vadd.xlane.f32.xlu1 %v2404_v45  ;;  %2402 = vadd.xlane.f32.xlu0 %v2401_v6  ;;  %v1953_v54 = vpop.xlane.xlu0 %1952  ;;  %v2299_v17 = vsel %vm120_vm1, %v9847_v27, 0.0 }
 0x48f   :  { %8415 = vpow2.f32 %v2163_v23  ;;  %v11751_v23 = vld [vmem:[#allocation75_spill] sm:$0xff] }
 0x490   :  { %v9853_v28 = vpop.eup %8405  ;;  %v2083_v3 = vsub.f32 %v11751_v23, %v1941_v20 }
 0x491   :  { %v1932_v12 = vpop.xlane.xlu1 %1931  ;;  %v2302_v62 = vsel %vm120_vm1, %v9853_v28, 0.0  ;;  %v9860_v22 = vpop.eup %8407 }
 0x492   :  { %11749 = vst [vmem:[#allocation74_spill] sm:$0xff] %v9860_v22  ;;  %v2080_v49 = vsub.f32 %v9450_v7, %v1932_v12  ;;  %2303 = vadd.xlane.f32.xlu1 %v2302_v62  ;;  %2300 = vadd.xlane.f32.xlu0 %v2299_v17  ;;  %v1959_v45 = vpop.xlane.xlu0 %1958  ;;  %v2407_v58 = vsel %vm120_vm1, %v9860_v22, 0.0  ;;  %v2171_v20 = vmul.f32 1.442695, %v2083_v3  ;;  %v11752_v3 = vld [vmem:[#allocation76_spill] sm:$0xff] }
 0x494   :  { %v9863_v6 = vpop.eup %8409  ;;  %v2165_v57 = vmul.f32 1.442695, %v2080_v49 }
 0x495   :  { %11750 = vst [vmem:[#allocation109_spill] sm:$0xff] %v9863_v6  ;;  %v1938_v29 = vpop.xlane.xlu1 %1937  ;;  %v2410_v0 = vsel %vm120_vm1, %v9863_v6, 0.0  ;;  %v9870_v50 = vpop.eup %8411 }
 0x496   :  { %8417 = vpow2.f32 %v2165_v57  ;;  %v2082_v7 = vsub.f32 %v9454_v53, %v1938_v29  ;;  %2411 = vadd.xlane.f32.xlu1 %v2410_v0  ;;  %2408 = vadd.xlane.f32.xlu0 %v2407_v58  ;;  %v1989_v12 = vpop.xlane.xlu0 %1988  ;;  %v2305_v22 = vsel %vm120_vm1, %v9870_v50, 0.0  ;;  %v2175_v0 = vmul.f32 1.442695, %v2085_v8 }
 0x497   :  { %8419 = vpow2.f32 %v2167_v16  ;;  %v2087_v58 = vsub.f32 %v11752_v3, %v1953_v54 }
 0x498   :  { %v9873_v62 = vpop.eup %8413  ;;  %v2169_v17 = vmul.f32 1.442695, %v2082_v7 }
 0x499   :  { %v1944_v49 = vpop.xlane.xlu1 %1943  ;;  %v2308_v23 = vsel %vm120_vm1, %v9873_v62, 0.0  ;;  %v9880_v57 = vpop.eup %8415 }
 0x49a   :  { %8421 = vpow2.f32 %v2169_v17  ;;  %v2084_v53 = vsub.f32 %v9458_v5, %v1944_v49  ;;  %2309 = vadd.xlane.f32.xlu1 %v2308_v23  ;;  %2306 = vadd.xlane.f32.xlu0 %v2305_v22  ;;  %v1995_v32 = vpop.xlane.xlu0 %1994  ;;  %v2311_v29 = vsel %vm120_vm1, %v9880_v57, 0.0  ;;  %v2179_v5 = vmul.f32 1.442695, %v2087_v58  ;;  %v11753_v17 = vld [vmem:[#allocation77_spill] sm:$0xff] }
 0x49b   :  { %8423 = vpow2.f32 %v2171_v20  ;;  %v2089_v22 = vsub.f32 %v11753_v17, %v1959_v45 }
 0x49c   :  { %v2173_v2 = vmul.f32 1.442695, %v2084_v53 }
 0x49d   :  { %v1950_v16 = vpop.xlane.xlu1 %1949  ;;  %v2183_v3 = vmul.f32 1.442695, %v2089_v22 }
 0x49e   :  { %8425 = vpow2.f32 %v2173_v2  ;;  %v2086_v7 = vsub.f32 %v9462_v38, %v1950_v16  ;;  %2312 = vadd.xlane.f32.xlu0 %v2311_v29  ;;  %v2001_v23 = vpop.xlane.xlu0 %2000 }
 0x49f   :  { %8427 = vpow2.f32 %v2175_v0  ;;  %v11754_v0 = vld [vmem:[#allocation78_spill] sm:$0xff] }
 0x4a0   :  { %v9887_v6 = vpop.eup %8417  ;;  %v2177_v20 = vmul.f32 1.442695, %v2086_v7  ;;  %v2099_v58 = vsub.f32 %v11754_v0, %v1989_v12  ;;  %v2101_v12 = vsub.f32 %v9480_v47, %v1995_v32  ;;  %v11755_v32 = vld [vmem:[#allocation79_spill] sm:$0xff] }
 0x4a1   :  { %v1956_v8 = vpop.xlane.xlu1 %1955  ;;  %v2314_v54 = vsel %vm120_vm1, %v9887_v6, 0.0  ;;  %v9892_v49 = vpop.eup %8419 }
 0x4a2   :  { %8429 = vpow2.f32 %v2177_v20  ;;  %v2088_v53 = vsub.f32 %v9466_v40, %v1956_v8  ;;  %2315 = vadd.xlane.f32.xlu1 %v2314_v54  ;;  %v2317_v29 = vsel %vm120_vm1, %v9892_v49, 0.0  ;;  %v2007_v22 = vpop.xlane.xlu0 %2006  ;;  %v2207_v47 = vmul.f32 1.442695, %v2101_v12 }
 0x4a3   :  { %8431 = vpow2.f32 %v2179_v5  ;;  %v2203_v5 = vmul.f32 1.442695, %v2099_v58  ;;  %v2103_v58 = vsub.f32 %v11755_v32, %v2001_v23  ;;  %v2105_v12 = vsub.f32 %v9488_v14, %v2007_v22 }
 0x4a4   :  { %v9895_v38 = vpop.eup %8421  ;;  %v2181_v2 = vmul.f32 1.442695, %v2088_v53 }
 0x4a5   :  { %v1962_v45 = vpop.xlane.xlu1 %1961  ;;  %v2320_v16 = vsel %vm120_vm1, %v9895_v38, 0.0  ;;  %v9902_v7 = vpop.eup %8423  ;;  %v2211_v23 = vmul.f32 1.442695, %v2103_v58 }
 0x4a6   :  { %8433 = vpow2.f32 %v2181_v2  ;;  %v2090_v40 = vsub.f32 %v9470_v63, %v1962_v45  ;;  %2321 = vadd.xlane.f32.xlu0 %v2320_v16  ;;  %2318 = vadd.xlane.f32.xlu1 %v2317_v29  ;;  %v2323_v53 = vsel %vm120_vm1, %v9902_v7, 0.0 }
 0x4a7   :  { %8435 = vpow2.f32 %v2183_v3 }
 0x4a8   :  { %v9905_v17 = vpop.eup %8425  ;;  %v2185_v20 = vmul.f32 1.442695, %v2090_v40 }
 0x4a9   :  { %v1992_v8 = vpop.xlane.xlu1 %1991  ;;  %v2326_v54 = vsel %vm120_vm1, %v9905_v17, 0.0  ;;  %v9912_v0 = vpop.eup %8427 }
 0x4aa   :  { %8437 = vpow2.f32 %v2185_v20  ;;  %v2100_v63 = vsub.f32 %v9474_v61, %v1992_v8  ;;  %2327 = vadd.xlane.f32.xlu1 %v2326_v54  ;;  %2324 = vadd.xlane.f32.xlu0 %v2323_v53  ;;  %v2329_v29 = vsel %vm120_vm1, %v9912_v0, 0.0  ;;  %v2037_v20 = vpop.xlane.xlu0 %2036 }
 0x4ab   :  { %8439 = vpow2.f32 %v2203_v5  ;;  %v2115_v14 = vsub.f32 %v9596_v37, %v2037_v20 }
 0x4ac   :  { %v9915_v3 = vpop.eup %8429  ;;  %v2205_v2 = vmul.f32 1.442695, %v2100_v63 }
 0x4ad   :  { %v1998_v45 = vpop.xlane.xlu1 %1997  ;;  %v2332_v16 = vsel %vm120_vm1, %v9915_v3, 0.0  ;;  %v9922_v40 = vpop.eup %8431  ;;  %v2235_v37 = vmul.f32 1.442695, %v2115_v14 }
 0x4ae   :  { %8441 = vpow2.f32 %v2205_v2  ;;  %v2102_v61 = vsub.f32 %v9478_v59, %v1998_v45  ;;  %2333 = vadd.xlane.f32.xlu1 %v2332_v16  ;;  %2330 = vadd.xlane.f32.xlu0 %v2329_v29  ;;  %v2335_v63 = vsel %vm120_vm1, %v9922_v40, 0.0  ;;  %v9938_v22 = vpop.xlane.xlu0 %2042 }
 0x4af   :  { %8443 = vpow2.f32 %v2207_v47  ;;  %v2215_v47 = vmul.f32 1.442695, %v2105_v12 }
 0x4b0   :  { %v9925_v5 = vpop.eup %8433  ;;  %v2209_v8 = vmul.f32 1.442695, %v2102_v61 }
 0x4b1   :  { %v2004_v54 = vpop.xlane.xlu1 %2003  ;;  %v2338_v53 = vsel %vm120_vm1, %v9925_v5, 0.0  ;;  %v9932_v32 = vpop.eup %8435 }
 0x4b2   :  { %8445 = vpow2.f32 %v2209_v8  ;;  %v2104_v59 = vsub.f32 %v9482_v56, %v2004_v54  ;;  %2339 = vadd.xlane.f32.xlu1 %v2338_v53  ;;  %2336 = vadd.xlane.f32.xlu0 %v2335_v63  ;;  %v2341_v29 = vsel %vm120_vm1, %v9932_v32, 0.0  ;;  %v9955_v63 = vpop.xlane.xlu0 %2048 }
 0x4b3   :  { %8447 = vpow2.f32 %v2211_v23 }
 0x4b4   :  { %v9935_v2 = vpop.eup %8437  ;;  %v2213_v58 = vmul.f32 1.442695, %v2104_v59 }
 0x4b5   :  { %v2010_v45 = vpop.xlane.xlu1 %2009  ;;  %v2344_v16 = vsel %vm120_vm1, %v9935_v2, 0.0  ;;  %v9944_v61 = vpop.eup %8439 }
 0x4b6   :  { %11756 = vst [vmem:[#allocation75_spill] sm:$0xff] %v9944_v61  ;;  %8449 = vpow2.f32 %v2213_v58  ;;  %v2106_v56 = vsub.f32 %v9486_v9, %v2010_v45  ;;  %2345 = vadd.xlane.f32.xlu1 %v2344_v16  ;;  %2342 = vadd.xlane.f32.xlu0 %v2341_v29  ;;  %v2371_v54 = vsel %vm120_vm1, %v9944_v61, 0.0  ;;  %v9970_v29 = vpop.xlane.xlu0 %2054  ;;  %v11772_v61 = vld [vmem:[#allocation93_spill] sm:$0xff] }
 0x4b7   :  { %8451 = vpow2.f32 %v2215_v47 }
 0x4b8   :  { %v9947_v23 = vpop.eup %8441  ;;  %v2217_v20 = vmul.f32 1.442695, %v2106_v56 }
 0x4b9   :  { %11757 = vst [vmem:[#allocation76_spill] sm:$0xff] %v9947_v23  ;;  %v2040_v12 = vpop.xlane.xlu1 %2039  ;;  %v2374_v8 = vsel %vm120_vm1, %v9947_v23, 0.0  ;;  %v9953_v53 = vpop.eup %8443  ;;  %v2119_v23 = vsub.f32 %v11772_v61, %v9955_v63 }
 0x4ba   :  { %11758 = vst [vmem:[#allocation77_spill] sm:$0xff] %v9953_v53  ;;  %8453 = vpow2.f32 %v2217_v20  ;;  %v2116_v9 = vsub.f32 %v9592_v18, %v2040_v12  ;;  %2375 = vadd.xlane.f32.xlu1 %v2374_v8  ;;  %2372 = vadd.xlane.f32.xlu0 %v2371_v54  ;;  %v2377_v45 = vsel %vm120_vm1, %v9953_v53, 0.0 }
 0x4bb   :  { %8455 = vpow2.f32 %v2235_v37 }
 0x4bc   :  { %v9958_v59 = vpop.eup %8445  ;;  %v2237_v47 = vmul.f32 1.442695, %v2116_v9 }
 0x4bd   :  { %11759 = vst [vmem:[#allocation78_spill] sm:$0xff] %v9958_v59  ;;  %v9960_v14 = vpop.xlane.xlu1 %2045  ;;  %v2380_v58 = vsel %vm120_vm1, %v9958_v59, 0.0  ;;  %v9966_v16 = vpop.eup %8447  ;;  %v11771_v59 = vld [vmem:[#allocation80_spill] sm:$0xff] }
 0x4be   :  { %11760 = vst [vmem:[#allocation79_spill] sm:$0xff] %v9966_v16  ;;  %8457 = vpow2.f32 %v2237_v47  ;;  %2381 = vadd.xlane.f32.xlu1 %v2380_v58  ;;  %2378 = vadd.xlane.f32.xlu0 %v2377_v45  ;;  %v2383_v20 = vsel %vm120_vm1, %v9966_v16, 0.0  ;;  %v2253_v45 = vpop.xlane.xlu0 %2252  ;;  %v2114_v31 = vsub.f32 %v11771_v59, %v9841_v34  ;;  %v11774_v34 = vld [vmem:[#allocation92_spill] sm:$0xff] }
 0x4bf   :  { %8459 = vrcp.f32 %v2253_v45 }
 0x4c0   :  { %v9968_v18 = vpop.eup %8449  ;;  %v2233_v10 = vmul.f32 1.442695, %v2114_v31  ;;  %v11776_v31 = vld [vmem:[#allocation97_spill] sm:$0xff] }
 0x4c1   :  { %11761 = vst [vmem:[#allocation110_spill] sm:$0xff] %v9968_v18  ;;  %v9972_v56 = vpop.xlane.xlu1 %2051  ;;  %v2386_v37 = vsel %vm120_vm1, %v9968_v18, 0.0  ;;  %v9978_v12 = vpop.eup %8451 }
 0x4c2   :  { %11762 = vst [vmem:[#allocation111_spill] sm:$0xff] %v9978_v12  ;;  %2387 = vadd.xlane.f32.xlu1 %v2386_v37  ;;  %2384 = vadd.xlane.f32.xlu0 %v2383_v20  ;;  %v2389_v47 = vsel %vm120_vm1, %v9978_v12, 0.0  ;;  %v2120_v59 = vsub.f32 %v11774_v34, %v9972_v56 }
 0x4c4   :  { %v9980_v8 = vpop.eup %8453 }
 0x4c5   :  { %11763 = vst [vmem:[#allocation112_spill] sm:$0xff] %v9980_v8  ;;  %v9982_v54 = vpop.xlane.xlu1 %2057  ;;  %v2392_v9 = vsel %vm120_vm1, %v9980_v8, 0.0  ;;  %v9988_v58 = vpop.eup %8455 }
 0x4c6   :  { %11764 = vst [vmem:[#allocation113_spill] sm:$0xff] %v9988_v58  ;;  %2393 = vadd.xlane.f32.xlu1 %v2392_v9  ;;  %2390 = vadd.xlane.f32.xlu0 %v2389_v47  ;;  %v2419_v18 = vsel %vm120_vm1, %v9988_v58, 0.0  ;;  %v11766_v47 = vmov 0  ;;  %v92_v58 = vld [vmem:[%s11547_s5 + $0xa8] sm:$0xff]  ;;  %v2122_v56 = vsub.f32 %v11776_v31, %v9982_v54 }
 0x4c7   :  { %v11767_v47 = vsel %vm10000_vm4, 4294967295, %v11766_v47 }
 0x4c8   :  { %v9990_v16 = vpop.eup %8457  ;;  %11768 = vst [vmem:[#allocation115_spill] sm:$0xff] %v11767_v47 }
 0x4c9   :  { %11765 = vst [vmem:[#allocation114_spill] sm:$0xff] %v9990_v16  ;;  %v2256_v37 = vpop.xlane.xlu1 %2255  ;;  %v2422_v20 = vsel %vm120_vm1, %v9990_v16, 0.0  ;;  %v8460_v8 = vpop.eup %8459 }
 0x4ca   :  { %2423 = vadd.xlane.f32.xlu1 %v2422_v20  ;;  %2420 = vadd.xlane.f32.xlu0 %v2419_v18  ;;  %8461 = vrcp.f32 %v2256_v37  ;;  %v2507_v53 = vmul.f32 %v8460_v8, %v9685_v24  ;;  %v11769_v18 = vmov 0.0|0.0   ;;  %v91_v24 = vld [vmem:[%s11547_s5 + $0xa0] sm:$0xff]  ;;  %v11770_v8 = vld [vmem:[#allocation81_spill] sm:$0xff]  ;;  %v2117_v20 = vsub.f32 %v9614_v41, %v9938_v22 }
 0x4cb   :  { %v2113_v37 = vsub.f32 %v11770_v8, %v9799_v25  ;;  %v11773_v25 = vld [vmem:[#allocation103_spill] sm:$0xff] }
 0x4d4   :  { %v8462_v12 = vpop.eup %8461 }
 0x4d5   :  { %v2508_v9 = vmul.f32 %v8462_v12, %v9701_v33  ;;  %v2262_v33 = vpop.xlane.xlu1 %2261 }
 0x4d6   :  { %8463 = vrcp.f32 %v2262_v33  ;;  %v2118_v33 = vsub.f32 %v9608_v42, %v9960_v14 }
 0x4d7   :  { %v7966_v45 = vpack.c.bf16 %v2508_v9, %v2507_v53  ;;  %v2231_v9 = vmul.f32 1.442695, %v2113_v37 }
 0x4d8   :  { %v2241_v42 = vmul.f32 1.442695, %v2118_v33 }
 0x4d9   :  { %7968 = vmatpush3.bf16.xpose.msk.msra.mxu0 %vm10000_vm4, %v7966_v45 }
 0x4da   :  { %7969 = vmatprep.subr.bf16.mxu0 %v11769_v18 }
 0x4db   :  { %307 = vperm.xlu1 %8312, %v92_v58  }
 0x4df   :  { %v10013_v53 = vpop.xlane.xlu1 %2351 }
 0x4e0   :  { %302 = vperm.xlu0 %8311, %v91_v24   ;;  %v8464_v16 = vpop.eup %8463  ;;  %v2239_v24 = vmul.f32 1.442695, %v2117_v20  ;;  %v2243_v20 = vmul.f32 1.442695, %v2119_v23 }
 0x4e1   :  { %v2510_v41 = vmul.f32 %v8464_v16, %v11773_v25  ;;  %v2245_v16 = vmul.f32 1.442695, %v2120_v59 }
 0x4e3   :  { %v2259_v12 = vpop.xlane.xlu0 %2258 }
 0x4e4   :  { %8465 = vrcp.f32 %v2259_v12 }
 0x4e7   :  { %v2268_v58 = vpop.xlane.xlu1 %2267  ;;  %v10019_v45 = vpop.xlane.xlu0 %2348 }
 0x4e8   :  { %8467 = vrcp.f32 %v2268_v58 }
 0x4e9   :  { %8469 = vpow2.f32 %v2231_v9 }
 0x4eb   :  { %v10029_v8 = vpop.xlane.xlu1 %2357 }
 0x4ee   :  { %v8466_v12 = vpop.eup %8465 }
 0x4ef   :  { %v2509_v22 = vmul.f32 %v8466_v12, %v9720_v11  ;;  %v2265_v37 = vpop.xlane.xlu0 %2264  ;;  %v11775_v11 = vld [vmem:[#allocation98_spill] sm:$0xff] }
 0x4f0   :  { %8471 = vrcp.f32 %v2265_v37  ;;  %v2121_v63 = vsub.f32 %v11775_v11, %v9970_v29 }
 0x4f1   :  { %8473 = vpow2.f32 %v2239_v24  ;;  %v7970_v14 = vpack.c.bf16 %v2510_v41, %v2509_v22 }
 0x4f2   :  { %8475 = vpow2.f32 %v2233_v10  ;;  %v8468_v9 = vpop.eup %8467  ;;  %v2247_v24 = vmul.f32 1.442695, %v2121_v63  ;;  %v2249_v10 = vmul.f32 1.442695, %v2122_v56 }
 0x4f3   :  { %v2274_v46 = vpop.xlane.xlu1 %2273  ;;  %7972 = vmatpush3.bf16.xpose.msk.msra.mxu0 %vm10000_vm4, %v7970_v14  ;;  %v10035_v61 = vpop.xlane.xlu0 %2354  ;;  %8477 = vpow2.f32 %v2241_v42  ;;  %v2512_v25 = vmul.f32 %v8468_v9, %v9728_v43 }
 0x4f4   :  { %7973 = vmatprep.subr.bf16.mxu0 %v11769_v18  ;;  %8479 = vpow2.f32 %v2243_v20  ;;  %v10044_v33 = vpop.eup %8469 }
 0x4f5   :  { %8481 = vrcp.f32 %v2274_v46  ;;  %v2413_v34 = vsel %vm120_vm1, %v10044_v33, 0.0 }
 0x4f6   :  { %8483 = vpow2.f32 %v2245_v16 }
 0x4f7   :  { %v10042_v23 = vpop.xlane.xlu1 %2363  ;;  %v2271_v58 = vpop.xlane.xlu0 %2270 }
 0x4f8   :  { %8485 = vrcp.f32 %v2271_v58 }
 0x4f9   :  { %8487 = vpow2.f32 %v2247_v24 }
 0x4fa   :  { %v8472_v29 = vpop.eup %8471  ;;  %8489 = vpow2.f32 %v2249_v10 }
 0x4fb   :  { %v10046_v12 = vpop.eup %8473  ;;  %v2511_v41 = vmul.f32 %v8472_v29, %v9743_v48  ;;  %v2280_v54 = vpop.xlane.xlu1 %2279 }
 0x4fc   :  { %v10050_v22 = vpop.xlane.xlu0 %2360  ;;  %v10052_v37 = vpop.eup %8475  ;;  %8491 = vrcp.f32 %v2280_v54  ;;  %v2425_v59 = vsel %vm120_vm1, %v10046_v12, 0.0 }
 0x4fd   :  { %v7974_v46 = vpack.c.bf16 %v2512_v25, %v2511_v41  ;;  %v10058_v42 = vpop.eup %8477  ;;  %v2416_v63 = vsel %vm120_vm1, %v10052_v37, 0.0 }
 0x4fe   :  { %v10060_v48 = vpop.eup %8479  ;;  %v2428_v11 = vsel %vm120_vm1, %v10058_v42, 0.0 }
 0x4ff   :  { %2414 = vadd.xlane.f32.xlu1 %v2413_v34  ;;  %2426 = vadd.xlane.f32.xlu0 %v2425_v59  ;;  %v8482_v14 = vpop.eup %8481  ;;  %v2431_v10 = vsel %vm120_vm1, %v10060_v48, 0.0 }
 0x500   :  { %v2277_v43 = vpop.xlane.xlu0 %2276  ;;  %7976 = vmatpush3.bf16.xpose.msk.msra.mxu0 %vm10000_vm4, %v7974_v46  ;;  %v10065_v20 = vpop.eup %8483  ;;  %v2514_v31 = vmul.f32 %v8482_v14, %v9750_v51 }
 0x501   :  { %8493 = vrcp.f32 %v2277_v43  ;;  %7977 = vmatprep.subr.bf16.mxu0 %v11769_v18  ;;  %v2434_v24 = vsel %vm120_vm1, %v10065_v20, 0.0 }
 0x502   :  { %v8486_v16 = vpop.eup %8485 }
 0x503   :  { %2429 = vadd.xlane.f32.xlu1 %v2428_v11  ;;  %2417 = vadd.xlane.f32.xlu0 %v2416_v63  ;;  %v2513_v56 = vmul.f32 %v8486_v16, %v9757_v44  ;;  %v2286_v58 = vpop.xlane.xlu1 %2285  ;;  %v10073_v9 = vpop.eup %8487  ;;  %v11777_v11 = vld [vmem:[#allocation15_spill] sm:$0xff] }
 0x504   :  { %v10079_v25 = vpop.eup %8489  ;;  %8495 = vrcp.f32 %v2286_v58  ;;  %v2437_v46 = vsel %vm120_vm1, %v10073_v9, 0.0  ;;  %v11778_v63 = vld [vmem:[#allocation11_spill] sm:$0xff] }
 0x505   :  { %v7978_v29 = vpack.c.bf16 %v2514_v31, %v2513_v56  ;;  %v2440_v44 = vsel %vm120_vm1, %v10079_v25, 0.0  ;;  %v10096_v16 = vadd.f32 %v11778_v63, %v11777_v11 }
 0x506   :  { %v8492_v54 = vpop.eup %8491 }
 0x507   :  { %2435 = vadd.xlane.f32.xlu1 %v2434_v24  ;;  %2432 = vadd.xlane.f32.xlu0 %v2431_v10  ;;  %v10081_v41 = vpop.xlane.xlu0 %2369  ;;  %v2516_v34 = vmul.f32 %v8492_v54, %v9769_v26  ;;  %v10092_v43 = vpop.xlane.xlu1 %2366 }
 0x508   :  { %7980 = vmatpush3.bf16.xpose.msk.msra.mxu0 %vm10000_vm4, %v7978_v29 }
 0x509   :  { %7997 = vmatprep.subr.bf16.mxu0 %v11769_v18 }
 0x50b   :  { %v8494_v51 = vpop.eup %8493  ;;  %2441 = vadd.xlane.f32.xlu1 %v2440_v44  ;;  %2438 = vadd.xlane.f32.xlu0 %v2437_v46  ;;  %v2283_v14 = vpop.xlane.xlu0 %2282 }
 0x50c   :  { %v2515_v59 = vmul.f32 %v8494_v51, %v9777_v36  ;;  %8497 = vrcp.f32 %v2283_v14  ;;  %v11779_v36 = vmov 0.0  }
 0x50e   :  { %v7982_v31 = vpack.c.bf16 %v2516_v34, %v2515_v59  ;;  %v8496_v10 = vpop.eup %8495  ;;  %v94_v59 = vld [vmem:[%s11547_s5 + $0xb8] sm:$0xff] }
 0x50f   :  { %7466 = vmatmul.mubr.msk.f32.vlgmr.msra.gmra.mrb[40].mxu0 %vm120_vm1, %v10096_v16  ;;  %v2292_v56 = vpop.xlane.xlu1 %2291  ;;  %v2289_v26 = vpop.xlane.xlu0 %2288  ;;  %v2518_v54 = vmul.f32 %v8496_v10, %v9783_v39 }
 0x510   :  { %7984 = vmatpush3.bf16.xpose.msk.msra.mxu1 %vm10000_vm4, %v7982_v31  ;;  %8499 = vrcp.f32 %v2292_v56  ;;  %7503 = vmatprep.mubr.msk.f32.mxu0 %vm8914_vm3, %v11779_v36  ;;  %v93_v56 = vld [vmem:[%s11547_s5 + $0xb0] sm:$0xff] }
 0x511   :  { %7985 = vmatprep.subr.bf16.mxu1 %v11769_v18  ;;  %8501 = vrcp.f32 %v2289_v26 }
 0x513   :  { %v10105_v58 = vpop.xlane.xlu1 %2399  ;;  %v10107_v24 = vpop.xlane.xlu0 %2396 }
 0x516   :  { %v8498_v29 = vpop.eup %8497 }
 0x517   :  { %v2517_v51 = vmul.f32 %v8498_v29, %v9801_v60  ;;  %v2298_v44 = vpop.xlane.xlu1 %2297  ;;  %v2295_v46 = vpop.xlane.xlu0 %2294  ;;  %v11780_v29 = vld [vmem:[#allocation6_spill] sm:$0xff] }
 0x518   :  { %8503 = vrcp.f32 %v2298_v44 }
 0x519   :  { %8505 = vrcp.f32 %v2295_v46  ;;  %v7986_v34 = vpack.c.bf16 %v2518_v54, %v2517_v51 }
 0x51a   :  { %v8500_v14 = vpop.eup %8499 }
 0x51b   :  { %v8502_v11 = vpop.eup %8501  ;;  %v10114_v63 = vpop.xlane.xlu1 %2405  ;;  %7988 = vmatpush3.bf16.xpose.msk.msra.mxu1 %vm10000_vm4, %v7986_v34  ;;  %v2520_v39 = vmul.f32 %v8500_v14, %v9809_v21  ;;  %v11781_v21 = vld [vmem:[#allocation16_spill] sm:$0xff]  ;;  %v11782_v14 = vld [vmem:[#allocation7_spill] sm:$0xff] }
 0x51c   :  { %v10118_v31 = vpop.xlane.xlu0 %2402  ;;  %317 = vperm.xlu1 %8312, %v94_v59   ;;  %7989 = vmatprep.subr.bf16.mxu1 %v11769_v18  ;;  %v2519_v60 = vmul.f32 %v8502_v11, %v9806_v13 }
 0x51e   :  { %v7990_v54 = vpack.c.bf16 %v2520_v39, %v2519_v60  ;;  %v11783_v60 = vld [vmem:[#allocation8_spill] sm:$0xff] }
 0x51f   :  { %v2304_v26 = vpop.xlane.xlu1 %2303 }
 0x520   :  { %v2301_v10 = vpop.xlane.xlu0 %2300  ;;  %8507 = vrcp.f32 %v2304_v26  ;;  %3348 = vrot.lane.b32.xlu1 %v11780_v29, %s8910_s25 }
 0x521   :  { %8509 = vrcp.f32 %v2301_v10  ;;  %312 = vperm.xlu0 %8311, %v93_v56   ;;  %v11784_v56 = vld [vmem:[#allocation19_spill] sm:$0xff] }
 0x522   :  { %v8504_v51 = vpop.eup %8503 }
 0x523   :  { %v8506_v44 = vpop.eup %8505  ;;  %v10128_v46 = vpop.xlane.xlu1 %2411  ;;  %7992 = vmatpush3.bf16.xpose.msk.msra.mxu1 %vm10000_vm4, %v7990_v54  ;;  %v2522_v34 = vmul.f32 %v8504_v51, %v9829_v30  ;;  %v11785_v51 = vld [vmem:[#allocation9_spill] sm:$0xff] }
 0x524   :  { %v10132_v13 = vpop.xlane.xlu0 %2408  ;;  %3614 = vrot.lane.b32.xlu1 %v11781_v21, %s8910_s25  ;;  %7993 = vmatprep.subr.bf16.mxu1 %v11769_v18  ;;  %v2521_v59 = vmul.f32 %v8506_v44, %v9826_v55  ;;  %v11786_v44 = vld [vmem:[#allocation34_spill] sm:$0xff]  ;;  %v11787_v21 = vld [vmem:[#allocation13_spill] sm:$0xff] }
 0x525   :  { %3481 = vrot.lane.b32.xlu0 %v11782_v14, %s8910_s25 }
 0x526   :  { %v7994_v26 = vpack.c.bf16 %v2522_v34, %v2521_v59  ;;  %v11788_v34 = vld [vmem:[#allocation10_spill] sm:$0xff] }
 0x527   :  { %v2310_v11 = vpop.xlane.xlu1 %2309  ;;  %v545_v59 = vadd.f32 %v11788_v34, %v11787_v21 }
 0x528   :  { %v2307_v39 = vpop.xlane.xlu0 %2306  ;;  %8511 = vrcp.f32 %v2310_v11  ;;  %3880 = vrot.lane.b32.xlu1 %v11783_v60, %s8910_s25  ;;  %v11791_v60 = vld [vmem:[#allocation12_spill] sm:$0xff] }
 0x529   :  { %8513 = vrcp.f32 %v2307_v39  ;;  %3747 = vrot.lane.b32.xlu0 %v11784_v56, %s8910_s25  ;;  %v11790_v39 = vld [vmem:[#allocation14_spill] sm:$0xff] }
 0x52a   :  { %v8508_v10 = vpop.eup %8507  ;;  %v10164_v56 = vadd.f32 %v11791_v60, %v11790_v39 }
 0x52b   :  { %v8510_v29 = vpop.eup %8509  ;;  %v2524_v30 = vmul.f32 %v8508_v10, %v9853_v28  ;;  %7996 = vmatpush3.bf16.xpose.msk.msra.mxu1 %vm10000_vm4, %v7994_v26 }
 0x52c   :  { %v2313_v55 = vpop.xlane.xlu0 %2312  ;;  %v2523_v54 = vmul.f32 %v8510_v29, %v9847_v27  ;;  %4146 = vrot.lane.b32.xlu1 %v11785_v51, %s8910_s25  ;;  %8013 = vmatprep.subr.bf16.mxu1 %v11769_v18  ;;  %v11789_v27 = vld [vmem:[#allocation36_spill] sm:$0xff]  ;;  %v11792_v51 = vld [vmem:[#allocation102_spill] sm:$0xff] }
 0x52d   :  { %4013 = vrot.lane.b32.xlu0 %v11786_v44, %s8910_s25  ;;  %8515 = vrcp.f32 %v2313_v55  ;;  %v11793_v44 = vld [vmem:[#allocation60_spill] sm:$0xff] }
 0x52e   :  { %v7998_v14 = vpack.c.bf16 %v2524_v30, %v2523_v54  ;;  %v550_v21 = vadd.f32 %v11793_v44, %v11792_v51 }
 0x52f   :  { %v2316_v28 = vpop.xlane.xlu1 %2315 }
 0x530   :  { %8517 = vrcp.f32 %v2316_v28  ;;  %8000 = vmatpush3.bf16.xpose.msk.msra.mxu0 %vm10000_vm4, %v7998_v14  ;;  %5213 = vrot.lane.b32.xlu1 %v545_v59, %s8910_s25 }
 0x531   :  { %4279 = vrot.lane.b32.xlu0 %v11789_v27, %s8910_s25  ;;  %8001 = vmatprep.subr.bf16.mxu0 %v11769_v18 }
 0x532   :  { %v8512_v11 = vpop.eup %8511  ;;  %7485 = vmatmul.mubr.msk.f32.vlgmr.msra.gmra.mrb[48].mxu1 %vm120_vm1, %v545_v59 }
 0x533   :  { %v8514_v26 = vpop.eup %8513  ;;  %v2526_v10 = vmul.f32 %v8512_v11, %v9873_v62  ;;  %v2319_v29 = vpop.xlane.xlu1 %2318  ;;  %7522 = vmatprep.mubr.msk.f32.mxu1 %vm8914_vm3, %v11779_v36 }
 0x534   :  { %v2322_v30 = vpop.xlane.xlu0 %2321  ;;  %v2525_v55 = vmul.f32 %v8514_v26, %v9870_v50  ;;  %8519 = vrcp.f32 %v2319_v29  ;;  %5409 = vrot.lane.b32.xlu1 %v10164_v56, %s8910_s25 }
 0x535   :  { %8521 = vrcp.f32 %v2322_v30  ;;  %5115 = vrot.lane.b32.xlu0 %v10096_v16, %s8910_s25 }
 0x536   :  { %v8002_v54 = vpack.c.bf16 %v2526_v10, %v2525_v55 }
 0x537   :  { %v2328_v62 = vpop.xlane.xlu1 %2327  ;;  %v8516_v59 = vpop.eup %8515 }
 0x538   :  { %v2325_v34 = vpop.xlane.xlu0 %2324  ;;  %8523 = vrcp.f32 %v2328_v62  ;;  %8004 = vmatpush3.bf16.xpose.msk.msra.mxu0 %vm10000_vm4, %v8002_v54  ;;  %v2527_v16 = vmul.f32 %v8516_v59, %v9880_v57 }
 0x539   :  { %8525 = vrcp.f32 %v2325_v34  ;;  %5311 = vrot.lane.b32.xlu0 %v550_v21, %s8910_s25  ;;  %8005 = vmatprep.subr.bf16.mxu0 %v11769_v18 }
 0x53a   :  { %v8518_v50 = vpop.eup %8517  ;;  %8527 = vrcp.f32 %v10019_v45 }
 0x53b   :  { %v2528_v14 = vmul.f32 %v8518_v50, %v9887_v6  ;;  %v2334_v28 = vpop.xlane.xlu1 %2333 }
 0x53c   :  { %v2331_v27 = vpop.xlane.xlu0 %2330  ;;  %8529 = vrcp.f32 %v2334_v28 }
 0x53d   :  { %8531 = vrcp.f32 %v2331_v27  ;;  %v8006_v11 = vpack.c.bf16 %v2528_v14, %v2527_v16 }
 0x53e   :  { %v8520_v39 = vpop.eup %8519  ;;  %8533 = vrcp.f32 %v10013_v53 }
 0x53f   :  { %v8522_v60 = vpop.eup %8521  ;;  %v2340_v26 = vpop.xlane.xlu1 %2339  ;;  %v2529_v57 = vmul.f32 %v8520_v39, %v9892_v49  ;;  %8535 = vrcp.f32 %v10035_v61 }
 0x540   :  { %8008 = vmatpush3.bf16.xpose.msk.msra.mxu0 %vm10000_vm4, %v8006_v11  ;;  %v2530_v6 = vmul.f32 %v8522_v60, %v9895_v38  ;;  %v2337_v10 = vpop.xlane.xlu0 %2336  ;;  %8537 = vrcp.f32 %v2340_v26 }
 0x541   :  { %8009 = vmatprep.subr.bf16.mxu0 %v11769_v18  ;;  %8539 = vrcp.f32 %v2337_v10 }
 0x542   :  { %v8524_v45 = vpop.eup %8523  ;;  %v8010_v51 = vpack.c.bf16 %v2530_v6, %v2529_v57  ;;  %8541 = vrcp.f32 %v10029_v8 }
 0x543   :  { %v8526_v29 = vpop.eup %8525  ;;  %v2532_v30 = vmul.f32 %v8524_v45, %v9905_v17  ;;  %v2346_v17 = vpop.xlane.xlu1 %2345  ;;  %8543 = vrcp.f32 %v10050_v22 }
 0x544   :  { %v2531_v55 = vmul.f32 %v8526_v29, %v9902_v7  ;;  %v8528_v53 = vpop.eup %8527  ;;  %v2343_v49 = vpop.xlane.xlu0 %2342  ;;  %8545 = vrcp.f32 %v2346_v17 }
 0x545   :  { %v2539_v7 = vmul.f32 %v8528_v53, %v9725_v1  ;;  %8547 = vrcp.f32 %v2343_v49 }
 0x546   :  { %v8530_v54 = vpop.eup %8529  ;;  %v8014_v44 = vpack.c.bf16 %v2532_v30, %v2531_v55  ;;  %8549 = vrcp.f32 %v10042_v23 }
 0x547   :  { %v8532_v62 = vpop.eup %8531  ;;  %v2534_v61 = vmul.f32 %v8530_v54, %v9915_v3  ;;  %8551 = vrcp.f32 %v10092_v43  ;;  %v11796_v54 = vld [vmem:[#allocation76_spill] sm:$0xff] }
 0x548   :  { %8012 = vmatpush3.bf16.xpose.msk.msra.mxu0 %vm10000_vm4, %v8010_v51  ;;  %8016 = vmatpush3.bf16.xpose.msk.msra.mxu1 %vm10000_vm4, %v8014_v44  ;;  %v8534_v38 = vpop.eup %8533  ;;  %v2533_v34 = vmul.f32 %v8532_v62, %v9912_v0  ;;  %v2373_v16 = vpop.xlane.xlu0 %2372  ;;  %8553 = vrcp.f32 %v10081_v41  ;;  %v11797_v44 = vld [vmem:[#allocation75_spill] sm:$0xff] }
 0x549   :  { %8017 = vmatprep.subr.bf16.mxu1 %v11769_v18  ;;  %8029 = vmatprep.subr.bf16.mxu0 %v11769_v18  ;;  %v2540_v8 = vmul.f32 %v8534_v38, %v9715_v15  ;;  %v8536_v59 = vpop.eup %8535  ;;  %v2376_v15 = vpop.xlane.xlu1 %2375 }
 0x54a   :  { %v8538_v50 = vpop.eup %8537  ;;  %v8018_v14 = vpack.c.bf16 %v2534_v61, %v2533_v34  ;;  %v2541_v0 = vmul.f32 %v8536_v59, %v9745_v52  ;;  %8555 = vrcp.f32 %v2376_v15 }
 0x54b   :  { %v8030_v28 = vpack.c.bf16 %v2540_v8, %v2539_v7  ;;  %v8540_v27 = vpop.eup %8539  ;;  %v2536_v3 = vmul.f32 %v8538_v50, %v9925_v5  ;;  %8557 = vrcp.f32 %v2373_v16  ;;  %v11799_v50 = vld [vmem:[#allocation106_spill] sm:$0xff] }
 0x54c   :  { %v8542_v1 = vpop.eup %8541  ;;  %v2535_v23 = vmul.f32 %v8540_v27, %v9922_v40  ;;  %8559 = vrcp.f32 %v10105_v58 }
 0x54d   :  { %v2542_v22 = vmul.f32 %v8542_v1, %v9738_v35  ;;  %v8544_v11 = vpop.eup %8543  ;;  %v2382_v5 = vpop.xlane.xlu1 %2381  ;;  %8561 = vrcp.f32 %v10107_v24 }
 0x54e   :  { %v8546_v39 = vpop.eup %8545  ;;  %v8022_v60 = vpack.c.bf16 %v2536_v3, %v2535_v23  ;;  %v2543_v35 = vmul.f32 %v8544_v11, %v9766_v4  ;;  %8563 = vrcp.f32 %v2382_v5  ;;  %v11802_v3 = vld [vmem:[#allocation70_spill] sm:$0xff] }
 0x54f   :  { %7504 = vmatmul.mubr.msk.f32.vlgmr.msra.gmra.mrb[42].mxu0 %vm120_vm1, %v550_v21  ;;  %v2379_v21 = vpop.xlane.xlu0 %2378  ;;  %v8034_v52 = vpack.c.bf16 %v2542_v22, %v2541_v0  ;;  %v8548_v26 = vpop.eup %8547  ;;  %v2538_v41 = vmul.f32 %v8546_v39, %v9935_v2  ;;  %v11804_v39 = vld [vmem:[#allocation108_spill] sm:$0xff] }
 0x550   :  { %8020 = vmatpush3.bf16.xpose.msk.msra.mxu1 %vm10000_vm4, %v8018_v14  ;;  %8032 = vmatpush3.bf16.xpose.msk.msra.mxu0 %vm10000_vm4, %v8030_v28  ;;  %v8550_v40 = vpop.eup %8549  ;;  %v2537_v43 = vmul.f32 %v8548_v26, %v9932_v32  ;;  %8565 = vrcp.f32 %v2379_v21  ;;  %v11794_v32 = vld [vmem:[#allocation104_spill] sm:$0xff]  ;;  %v11800_v14 = vld [vmem:[#allocation78_spill] sm:$0xff] }
 0x551   :  { %8021 = vmatprep.subr.bf16.mxu1 %v11769_v18  ;;  %8033 = vmatprep.subr.bf16.mxu0 %v11769_v18  ;;  %v8552_v57 = vpop.eup %8551  ;;  %v2544_v6 = vmul.f32 %v8550_v40, %v9760_v19  ;;  %v2388_v58 = vpop.xlane.xlu1 %2387  ;;  %v11795_v19 = vld [vmem:[#allocation105_spill] sm:$0xff]  ;;  %8567 = vrcp.f32 %v10114_v63  ;;  %v11798_v63 = vld [vmem:[#allocation107_spill] sm:$0xff]  ;;  %v11806_v40 = vld [vmem:[#allocation110_spill] sm:$0xff] }
 0x552   :  { %7541 = vmatprep.mubr.msk.f32.mxu0 %vm8914_vm3, %v11779_v36  ;;  %v8554_v10 = vpop.eup %8553  ;;  %v8026_v30 = vpack.c.bf16 %v2538_v41, %v2537_v43  ;;  %v2545_v2 = vmul.f32 %v8552_v57, %v11794_v32  ;;  %8569 = vrcp.f32 %v10118_v31  ;;  %v11810_v32 = vld [vmem:[#allocation112_spill] sm:$0xff] }
 0x553   :  { %v2385_v45 = vpop.xlane.xlu0 %2384  ;;  %v8038_v55 = vpack.c.bf16 %v2544_v6, %v2543_v35  ;;  %v2546_v24 = vmul.f32 %v8554_v10, %v11795_v19  ;;  %8571 = vrcp.f32 %v2388_v58  ;;  %v11807_v35 = vld [vmem:[#allocation79_spill] sm:$0xff] }
 0x554   :  { %v8556_v29 = vpop.eup %8555  ;;  %8573 = vrcp.f32 %v2385_v45  ;;  %v11811_v58 = vld [vmem:[#allocation111_spill] sm:$0xff] }
 0x555   :  { %v8558_v53 = vpop.eup %8557  ;;  %v2548_v51 = vmul.f32 %v8556_v29, %v11796_v54  ;;  %v8042_v61 = vpack.c.bf16 %v2546_v24, %v2545_v2  ;;  %v2394_v59 = vpop.xlane.xlu1 %2393  ;;  %8575 = vrcp.f32 %v10128_v46 }
 0x556   :  { %v2547_v62 = vmul.f32 %v8558_v53, %v11797_v44  ;;  %v8560_v49 = vpop.eup %8559  ;;  %8577 = vrcp.f32 %v10132_v13  ;;  %v11809_v53 = vld [vmem:[#allocation74_spill] sm:$0xff] }
 0x557   :  { %v2391_v4 = vpop.xlane.xlu0 %2390  ;;  %v8562_v38 = vpop.eup %8561  ;;  %v2556_v31 = vmul.f32 %v8560_v49, %v11798_v63  ;;  %8579 = vrcp.f32 %v2394_v59 }
 0x558   :  { %8024 = vmatpush3.bf16.xpose.msk.msra.mxu1 %vm10000_vm4, %v8022_v60  ;;  %8036 = vmatpush3.bf16.xpose.msk.msra.mxu0 %vm10000_vm4, %v8034_v52  ;;  %v8564_v17 = vpop.eup %8563  ;;  %v8046_v34 = vpack.c.bf16 %v2548_v51, %v2547_v62  ;;  %v2555_v16 = vmul.f32 %v8562_v38, %v11799_v50  ;;  %8581 = vrcp.f32 %v2391_v4  ;;  %v11805_v52 = vld [vmem:[#allocation73_spill] sm:$0xff]  ;;  %v11812_v62 = vld [vmem:[#allocation114_spill] sm:$0xff] }
 0x559   :  { %8025 = vmatprep.subr.bf16.mxu1 %v11769_v18  ;;  %8037 = vmatprep.subr.bf16.mxu0 %v11769_v18  ;;  %v2550_v28 = vmul.f32 %v8564_v17, %v11800_v14  ;;  %v2424_v13 = vpop.xlane.xlu1 %2423  ;;  %v11813_v38 = vld [vmem:[#allocation113_spill] sm:$0xff] }
 0x55a   :  { %v8566_v8 = vpop.eup %8565  ;;  %v8062_v46 = vpack.c.bf16 %v2556_v31, %v2555_v16  ;;  %8583 = vrcp.f32 %v2424_v13 }
 0x55b   :  { %v2421_v7 = vpop.xlane.xlu0 %2420  ;;  %v8568_v15 = vpop.eup %8567 }
 0x55c   :  { %v8570_v0 = vpop.eup %8569  ;;  %v2558_v60 = vmul.f32 %v8568_v15, %v11804_v39  ;;  %8585 = vrcp.f32 %v2421_v7 }
 0x55d   :  { %v8572_v22 = vpop.eup %8571  ;;  %v2557_v26 = vmul.f32 %v8570_v0, %v11805_v52  ;;  %v308_v7 = vpop.permute.xlu1 %307 }
 0x55e   :  { %v8574_v11 = vpop.eup %8573  ;;  %v2552_v5 = vmul.f32 %v8572_v22, %v11806_v40  ;;  %v11816_v40 = vld [vmem:[#allocation72_spill] sm:$0xff] }
 0x55f   :  { %v303_v1 = vpop.permute.xlu0 %302  ;;  %v2551_v41 = vmul.f32 %v8574_v11, %v11807_v35  ;;  %v8576_v43 = vpop.eup %8575  ;;  %v8066_v10 = vpack.c.bf16 %v2558_v60, %v2557_v26 }
 0x560   :  { %8028 = vmatpush3.bf16.xpose.msk.msra.mxu1 %vm10000_vm4, %v8026_v30  ;;  %8040 = vmatpush3.bf16.xpose.msk.msra.mxu0 %vm10000_vm4, %v8038_v55  ;;  %v10262_v23 = vadd.f32 %v11802_v3, %v303_v1  ;;  %v8578_v45 = vpop.eup %8577  ;;  %v11808_v30 = vld [vmem:[#allocation109_spill] sm:$0xff] }
 0x561   :  { %8041 = vmatprep.subr.bf16.mxu0 %v11769_v18  ;;  %8045 = vmatprep.subr.bf16.mxu1 %v11769_v18  ;;  %v8580_v57 = vpop.eup %8579  ;;  %v8054_v6 = vpack.c.bf16 %v2552_v5, %v2551_v41  ;;  %v2560_v55 = vmul.f32 %v8576_v43, %v11808_v30  ;;  %v2559_v4 = vmul.f32 %v8578_v45, %v11809_v53  ;;  %v11818_v45 = vld [vmem:[#allocation18_spill] sm:$0xff]  ;;  %v11824_v53 = vld [vmem:[#allocation71_spill] sm:$0xff] }
 0x562   :  { %11803 = vst [vmem:[#allocation81_spill] sm:$0xff] %v10262_v23  ;;  %v8582_v29 = vpop.eup %8581  ;;  %v2554_v2 = vmul.f32 %v8580_v57, %v11810_v32  ;;  %v11819_v57 = vld [vmem:[#allocation21_spill] sm:$0xff]  ;;  %v11826_v32 = vld [vmem:[#allocation31_spill] sm:$0xff] }
 0x563   :  { %v2553_v19 = vmul.f32 %v8582_v29, %v11811_v58  ;;  %v8070_v51 = vpack.c.bf16 %v2560_v55, %v2559_v4  ;;  %v11821_v55 = vld [vmem:[#allocation25_spill] sm:$0xff]  ;;  %v11827_v58 = vld [vmem:[#allocation32_spill] sm:$0xff] }
 0x564   :  { %v8584_v24 = vpop.eup %8583 }
 0x565   :  { %v8058_v54 = vpack.c.bf16 %v2554_v2, %v2553_v19  ;;  %v2564_v49 = vmul.f32 %v8584_v24, %v11812_v62  ;;  %v11828_v19 = vld [vmem:[#allocation17_spill] sm:$0xff]  ;;  %v11829_v24 = vld [vmem:[#allocation35_spill] sm:$0xff]  ;;  %v11832_v62 = vld [vmem:[#allocation22_spill] sm:$0xff] }
 0x566   :  { %v8586_v44 = vpop.eup %8585 }
 0x567   :  { %7523 = vmatmul.mubr.msk.f32.vlgmr.msra.gmra.mrb[50].mxu1 %vm120_vm1, %v10164_v56  ;;  %v11801_v56 = vld [vmem:[#allocation77_spill] sm:$0xff]  ;;  %v2563_v17 = vmul.f32 %v8586_v44, %v11813_v38  ;;  %v11833_v38 = vld [vmem:[#allocation38_spill] sm:$0xff] }
 0x568   :  { %8044 = vmatpush3.bf16.xpose.msk.msra.mxu0 %vm10000_vm4, %v8042_v61  ;;  %8048 = vmatpush3.bf16.xpose.msk.msra.mxu1 %vm10000_vm4, %v8046_v34  ;;  %v2549_v27 = vmul.f32 %v8566_v8, %v11801_v56  ;;  %v11814_v61 = vld [vmem:[#allocation69_spill] sm:$0xff] }
 0x569   :  { %8049 = vmatprep.subr.bf16.mxu1 %v11769_v18  ;;  %8061 = vmatprep.subr.bf16.mxu0 %v11769_v18  ;;  %v10297_v34 = vadd.f32 %v11814_v61, %v308_v7  ;;  %v8078_v8 = vpack.c.bf16 %v2564_v49, %v2563_v17  ;;  %v11834_v17 = vld [vmem:[#allocation24_spill] sm:$0xff]  ;;  %v11835_v7 = vld [vmem:[#allocation39_spill] sm:$0xff]  ;;  %v11836_v61 = vld [vmem:[#allocation26_spill] sm:$0xff] }
 0x56a   :  { %7560 = vmatprep.mubr.msk.f32.mxu1 %vm8914_vm3, %v11779_v36  ;;  %v8050_v21 = vpack.c.bf16 %v2550_v28, %v2549_v27 }
 0x56b   :  { %11815 = vst [vmem:[#allocation80_spill] sm:$0xff] %v10297_v34 }
 0x56f   :  { %7542 = vmatmul.mubr.msk.f32.vlgmr.msra.gmra.mrb[44].mxu0 %vm120_vm1, %v10262_v23 }
 0x570   :  { %8052 = vmatpush3.bf16.xpose.msk.msra.mxu1 %vm10000_vm4, %v8050_v21  ;;  %8064 = vmatpush3.bf16.xpose.msk.msra.mxu0 %vm10000_vm4, %v8062_v46 }
 0x571   :  { %8053 = vmatprep.subr.bf16.mxu1 %v11769_v18  ;;  %8065 = vmatprep.subr.bf16.mxu0 %v11769_v18 }
 0x572   :  { %7579 = vmatprep.mubr.msk.f32.mxu0 %vm8914_vm3, %v11779_v36 }
 0x578   :  { %8056 = vmatpush3.bf16.xpose.msk.msra.mxu1 %vm10000_vm4, %v8054_v6  ;;  %8068 = vmatpush3.bf16.xpose.msk.msra.mxu0 %vm10000_vm4, %v8066_v10  ;;  %v11820_v10 = vld [vmem:[#allocation23_spill] sm:$0xff] }
 0x579   :  { %8057 = vmatprep.subr.bf16.mxu1 %v11769_v18  ;;  %8069 = vmatprep.subr.bf16.mxu0 %v11769_v18 }
 0x580   :  { %8060 = vmatpush3.bf16.xpose.msk.msra.mxu1 %vm10000_vm4, %v8058_v54  ;;  %8072 = vmatpush3.bf16.xpose.msk.msra.mxu0 %vm10000_vm4, %v8070_v51  ;;  %v11830_v54 = vld [vmem:[#allocation20_spill] sm:$0xff]  ;;  %v11831_v51 = vld [vmem:[#allocation37_spill] sm:$0xff] }
 0x581   :  { %8077 = vmatprep.subr.bf16.mxu1 %v11769_v18  ;;  %8073 = vmatprep.subr.bf16.mxu0 %v11769_v18 }
 0x587   :  { %7561 = vmatmul.mubr.msk.f32.vlgmr.msra.gmra.mrb[52].mxu1 %vm120_vm1, %v10297_v34 }
 0x588   :  { %8080 = vmatpush3.bf16.xpose.msk.msra.mxu1 %vm10000_vm4, %v8078_v8  ;;  %7598 = vmatprep.mubr.msk.f32.mxu1 %vm8914_vm3, %v11779_v36  ;;  %v11837_v8 = vld [vmem:[#allocation40_spill] sm:$0xff] }
 0x589   :  { %8081 = vmatprep.subr.bf16.mxu1 %v11769_v18 }
 0x58c   :  { %v2415_v63 = vpop.xlane.xlu1 %2414  ;;  %v2427_v31 = vpop.xlane.xlu0 %2426 }
 0x58d   :  { %8587 = vrcp.f32 %v2427_v31  ;;  %v11839_v31 = vld [vmem:[#allocation41_spill] sm:$0xff] }
 0x58e   :  { %8589 = vrcp.f32 %v2415_v63  ;;  %v11838_v63 = vld [vmem:[#allocation28_spill] sm:$0xff] }
 0x590   :  { %v2430_v59 = vpop.xlane.xlu1 %2429  ;;  %v2418_v50 = vpop.xlane.xlu0 %2417 }
 0x591   :  { %8591 = vrcp.f32 %v2430_v59  ;;  %v11840_v59 = vld [vmem:[#allocation30_spill] sm:$0xff] }
 0x592   :  { %8593 = vrcp.f32 %v2418_v50  ;;  %v11841_v50 = vld [vmem:[#allocation42_spill] sm:$0xff] }
 0x594   :  { %v2436_v16 = vpop.xlane.xlu1 %2435  ;;  %v2433_v14 = vpop.xlane.xlu0 %2432 }
 0x595   :  { %8595 = vrcp.f32 %v2436_v16  ;;  %v11842_v16 = vld [vmem:[#allocation33_spill] sm:$0xff] }
 0x596   :  { %8597 = vrcp.f32 %v2433_v14  ;;  %v11843_v14 = vld [vmem:[#allocation43_spill] sm:$0xff] }
 0x597   :  { %v8588_v56 = vpop.eup %8587 }
 0x598   :  { %v2442_v28 = vpop.xlane.xlu1 %2441  ;;  %v8590_v27 = vpop.eup %8589  ;;  %v2565_v3 = vmul.f32 %v8588_v56, %v10046_v12  ;;  %v11845_v56 = vld [vmem:[#allocation61_spill] sm:$0xff] }
 0x599   :  { %v2439_v1 = vpop.xlane.xlu0 %2438  ;;  %8599 = vrcp.f32 %v2442_v28  ;;  %v2561_v46 = vmul.f32 %v8590_v27, %v10044_v33  ;;  %v11844_v28 = vld [vmem:[#allocation44_spill] sm:$0xff]  ;;  %v11846_v27 = vld [vmem:[#allocation45_spill] sm:$0xff] }
 0x59a   :  { %8601 = vrcp.f32 %v2439_v1  ;;  %v11847_v1 = vld [vmem:[#allocation62_spill] sm:$0xff] }
 0x59b   :  { %v8592_v15 = vpop.eup %8591 }
 0x59c   :  { %v8594_v0 = vpop.eup %8593  ;;  %v2566_v22 = vmul.f32 %v8592_v15, %v10058_v42  ;;  %v318_v21 = vpop.permute.xlu1 %317 }
 0x59d   :  { %v2562_v11 = vmul.f32 %v8594_v0, %v10052_v37  ;;  %v10342_v4 = vadd.f32 %v11824_v53, %v318_v21  ;;  %v11848_v0 = vld [vmem:[#allocation46_spill] sm:$0xff]  ;;  %v11851_v21 = vld [vmem:[#allocation64_spill] sm:$0xff]  ;;  %v11877_v53 = vld [vmem:[#allocation85_spill] sm:$0xff] }
 0x59e   :  { %v8082_v13 = vpack.c.bf16 %v2566_v22, %v2565_v3  ;;  %v11849_v3 = vld [vmem:[#allocation63_spill] sm:$0xff]  ;;  %v11850_v22 = vld [vmem:[#allocation48_spill] sm:$0xff] }
 0x59f   :  { %v8596_v39 = vpop.eup %8595  ;;  %v8074_v60 = vpack.c.bf16 %v2562_v11, %v2561_v46  ;;  %11825 = vst [vmem:[#allocation103_spill] sm:$0xff] %v10342_v4  ;;  %v11852_v46 = vld [vmem:[#allocation50_spill] sm:$0xff]  ;;  %v11853_v11 = vld [vmem:[#allocation65_spill] sm:$0xff] }
 0x5a0   :  { %v8598_v52 = vpop.eup %8597  ;;  %v3349_v26 = vpop.permute.xlu1 %3348  ;;  %8084 = vmatpush3.bf16.xpose.msk.msra.mxu1 %vm10000_vm4, %v8082_v13  ;;  %v2568_v12 = vmul.f32 %v8596_v39, %v10065_v20  ;;  %v11854_v13 = vld [vmem:[#allocation53_spill] sm:$0xff]  ;;  %v11855_v39 = vld [vmem:[#allocation66_spill] sm:$0xff] }
 0x5a1   :  { %8076 = vmatpush3.bf16.xpose.msk.msra.mxu0 %vm10000_vm4, %v8074_v60  ;;  %8085 = vmatprep.subr.bf16.mxu1 %v11769_v18  ;;  %v2567_v33 = vmul.f32 %v8598_v52, %v10060_v48  ;;  %v313_v37 = vpop.permute.xlu0 %312  ;;  %v11856_v60 = vld [vmem:[#allocation55_spill] sm:$0xff] }
 0x5a2   :  { %7601 = vmatprep.subr.mxu0 %v3349_v26  ;;  %v10318_v5 = vadd.f32 %v11816_v40, %v313_v37  ;;  %v11857_v52 = vld [vmem:[#allocation67_spill] sm:$0xff]  ;;  %v11861_v37 = vld [vmem:[#allocation82_spill] sm:$0xff] }
 0x5a3   :  { %v8600_v42 = vpop.eup %8599  ;;  %v8086_v35 = vpack.c.bf16 %v2568_v12, %v2567_v33  ;;  %v11859_v12 = vld [vmem:[#allocation68_spill] sm:$0xff]  ;;  %v11860_v33 = vld [vmem:[#allocation47_spill] sm:$0xff] }
 0x5a4   :  { %11817 = vst [vmem:[#allocation93_spill] sm:$0xff] %v10318_v5  ;;  %v8602_v41 = vpop.eup %8601  ;;  %v3615_v43 = vpop.permute.xlu1 %3614  ;;  %v2570_v48 = vmul.f32 %v8600_v42, %v10079_v25  ;;  %v11823_v25 = vld [vmem:[#allocation29_spill] sm:$0xff]  ;;  %v11863_v40 = vld [vmem:[#allocation83_spill] sm:$0xff] }
 0x5a5   :  { %v2569_v20 = vmul.f32 %v8602_v41, %v10073_v9  ;;  %v3482_v30 = vpop.permute.xlu0 %3481  ;;  %v11822_v9 = vld [vmem:[#allocation27_spill] sm:$0xff]  ;;  %v11862_v42 = vld [vmem:[#allocation49_spill] sm:$0xff]  ;;  %v11865_v41 = vld [vmem:[#allocation84_spill] sm:$0xff] }
 0x5a7   :  { %v8090_v29 = vpack.c.bf16 %v2570_v48, %v2569_v20  ;;  %v11868_v48 = vld [vmem:[#allocation54_spill] sm:$0xff]  ;;  %v11869_v20 = vld [vmem:[#allocation88_spill] sm:$0xff] }
 0x5a8   :  { %7580 = vmatmul.mubr.msk.f32.vlgmr.msra.gmra.mrb[46].mxu0 %vm120_vm1, %v10318_v5  ;;  %8088 = vmatpush3.bf16.xpose.msk.msra.mxu1 %vm10000_vm4, %v8086_v35  ;;  %v3881_v6 = vpop.permute.xlu1 %3880  ;;  %v11864_v35 = vld [vmem:[#allocation51_spill] sm:$0xff] }
 0x5a9   :  { %7602 = vmatpush3.msra.mxu0 %v3349_v26  ;;  %7603 = vmatprep.mubr.msk.f32.mxu0 %vm834_vm2, %v11818_v45  ;;  %v3748_v2 = vpop.permute.xlu0 %3747  ;;  %v11858_v26 = vld [vmem:[#allocation58_spill] sm:$0xff] }
 0x5aa   :  { %7629 = vmatprep.subr.mxu0 %v3615_v43  ;;  %8089 = vmatprep.subr.bf16.mxu1 %v11769_v18  ;;  %v11867_v45 = vld [vmem:[#allocation86_spill] sm:$0xff] }
 0x5ac   :  { %7604 = vmatmul.mubr.msk.f32.vlgmr.msra.gmra.mrb[48].mxu0 %vm834_vm2, %v11819_v57  ;;  %v4147_v49 = vpop.permute.xlu1 %4146 }
 0x5ad   :  { %7630 = vmatpush3.msra.mxu0 %v3615_v43  ;;  %7606 = vmatprep.mubr.msk.f32.mxu0 %vm834_vm2, %v11820_v10  ;;  %v4014_v44 = vpop.permute.xlu0 %4013  ;;  %v11866_v43 = vld [vmem:[#allocation52_spill] sm:$0xff] }
 0x5ae   :  { %7657 = vmatprep.subr.mxu0 %v3881_v6  ;;  %v11871_v10 = vld [vmem:[#allocation56_spill] sm:$0xff] }
 0x5b0   :  { %7607 = vmatmul.mubr.msk.f32.gmra.mrb[50].mxu0 %vm834_vm2, %v11821_v55  ;;  %8092 = vmatpush3.bf16.xpose.msk.msra.mxu1 %vm10000_vm4, %v8090_v29  ;;  %v11872_v29 = vld [vmem:[#allocation90_spill] sm:$0xff] }
 0x5b1   :  { %7609 = vmatprep.mubr.msk.f32.mxu0 %vm834_vm2, %v11822_v9  ;;  %7615 = vmatprep.subr.mxu1 %v3482_v30  ;;  %v4280_v15 = vpop.permute.xlu0 %4279  ;;  %v11874_v55 = vld [vmem:[#allocation94_spill] sm:$0xff]  ;;  %v11875_v9 = vld [vmem:[#allocation59_spill] sm:$0xff] }
 0x5b4   :  { %7610 = vmatmul.mubr.msk.f32.gmra.mrb[52].mxu0 %vm834_vm2, %v11823_v25  ;;  %v11876_v25 = vld [vmem:[#allocation96_spill] sm:$0xff] }
 0x5b5   :  { %7612 = vmatprep.mubr.msk.f32.mxu0 %vm834_vm2, %v11826_v32  ;;  %v11878_v32 = vld [vmem:[#allocation87_spill] sm:$0xff] }
 0x5b7   :  { %7599 = vmatmul.mubr.msk.f32.vlgmr.msra.gmra.mrb[54].mxu1 %vm120_vm1, %v10342_v4 }
 0x5b8   :  { %7613 = vmatmul.mubr.msk.f32.gmra.mrb[54].mxu0 %vm834_vm2, %v11827_v58  ;;  %7616 = vmatpush3.msra.mxu1 %v3482_v30  ;;  %v11873_v30 = vld [vmem:[#allocation57_spill] sm:$0xff]  ;;  %v11880_v58 = vld [vmem:[#allocation91_spill] sm:$0xff] }
 0x5b9   :  { %7617 = vmatprep.mubr.msk.f32.mxu1 %vm834_vm2, %v11828_v19  ;;  %7631 = vmatprep.mubr.msk.f32.mxu0 %vm834_vm2, %v11829_v24  ;;  %v11881_v19 = vld [vmem:[#allocation95_spill] sm:$0xff] }
 0x5ba   :  { %7643 = vmatprep.subr.mxu1 %v3748_v2  ;;  %v11882_v24 = vld [vmem:[#allocation99_spill] sm:$0xff] }
 0x5bb   :  { %7618 = vmatmul.mubr.msk.f32.vlgmr.msra.gmra.mrb[56].mxu1 %vm834_vm2, %v11830_v54  ;;  %v11883_v54 = vld [vmem:[#allocation100_spill] sm:$0xff] }
 0x5bc   :  { %7632 = vmatmul.mubr.msk.f32.vlgmr.msra.gmra.mrb[56].mxu0 %vm834_vm2, %v11831_v51  ;;  %7644 = vmatpush3.msra.mxu1 %v3748_v2  ;;  %v11879_v2 = vld [vmem:[#allocation89_spill] sm:$0xff] }
 0x5bd   :  { %7658 = vmatpush3.msra.mxu0 %v3881_v6  ;;  %7620 = vmatprep.mubr.msk.f32.mxu1 %vm834_vm2, %v11832_v62  ;;  %v11884_v51 = vld [vmem:[#allocation101_spill] sm:$0xff] }
 0x5be   :  { %7634 = vmatprep.mubr.msk.f32.mxu0 %vm834_vm2, %v11833_v38  ;;  %7671 = vmatprep.subr.mxu1 %v4014_v44 }
 0x5bf   :  { %7685 = vmatprep.subr.mxu0 %v4147_v49  ;;  %7621 = vmatmul.mubr.msk.f32.gmra.mrb[58].mxu1 %vm834_vm2, %v11834_v17 }
 0x5c0   :  { %7635 = vmatmul.mubr.msk.f32.gmra.mrb[58].mxu0 %vm834_vm2, %v11835_v7  ;;  %7623 = vmatprep.mubr.msk.f32.mxu1 %vm834_vm2, %v11836_v61 }
 0x5c1   :  { %7637 = vmatprep.mubr.msk.f32.mxu0 %vm834_vm2, %v11837_v8 }
 0x5c3   :  { %7624 = vmatmul.mubr.msk.f32.gmra.mrb[60].mxu1 %vm834_vm2, %v11838_v63 }
 0x5c4   :  { %7638 = vmatmul.mubr.msk.f32.gmra.mrb[60].mxu0 %vm834_vm2, %v11839_v31  ;;  %7626 = vmatprep.mubr.msk.f32.mxu1 %vm834_vm2, %v11840_v59 }
 0x5c5   :  { %7640 = vmatprep.mubr.msk.f32.mxu0 %vm834_vm2, %v11841_v50 }
 0x5c7   :  { %7627 = vmatmul.mubr.msk.f32.gmra.mrb[62].mxu1 %vm834_vm2, %v11842_v16 }
 0x5c8   :  { %7641 = vmatmul.mubr.msk.f32.gmra.mrb[62].mxu0 %vm834_vm2, %v11843_v14  ;;  %7645 = vmatprep.mubr.msk.f32.mxu1 %vm834_vm2, %v11844_v28 }
 0x5c9   :  { %7659 = vmatprep.mubr.msk.f32.mxu0 %vm834_vm2, %v11845_v56 }
 0x5cb   :  { %7646 = vmatmul.mubr.msk.f32.vlgmr.msra.gmra.mrb[64].mxu1 %vm834_vm2, %v11846_v27 }
 0x5cc   :  { %7660 = vmatmul.mubr.msk.f32.vlgmr.msra.gmra.mrb[64].mxu0 %vm834_vm2, %v11847_v1  ;;  %7672 = vmatpush3.msra.mxu1 %v4014_v44 }
 0x5cd   :  { %7686 = vmatpush3.msra.mxu0 %v4147_v49  ;;  %7648 = vmatprep.mubr.msk.f32.mxu1 %vm834_vm2, %v11848_v0 }
 0x5ce   :  { %7662 = vmatprep.mubr.msk.f32.mxu0 %vm834_vm2, %v11849_v3  ;;  %7699 = vmatprep.subr.mxu1 %v4280_v15 }
 0x5cf   :  { %7649 = vmatmul.mubr.msk.f32.gmra.mrb[66].mxu1 %vm834_vm2, %v11850_v22  ;;  %8093 = vmatprep.subr.bf16.mxu0 %v11769_v18 }
 0x5d0   :  { %7663 = vmatmul.mubr.msk.f32.gmra.mrb[66].mxu0 %vm834_vm2, %v11851_v21  ;;  %7651 = vmatprep.mubr.msk.f32.mxu1 %vm834_vm2, %v11852_v46 }
 0x5d1   :  { %7665 = vmatprep.mubr.msk.f32.mxu0 %vm834_vm2, %v11853_v11 }
 0x5d3   :  { %7652 = vmatmul.mubr.msk.f32.gmra.mrb[68].mxu1 %vm834_vm2, %v11854_v13 }
 0x5d4   :  { %7666 = vmatmul.mubr.msk.f32.gmra.mrb[68].mxu0 %vm834_vm2, %v11855_v39  ;;  %7654 = vmatprep.mubr.msk.f32.mxu1 %vm834_vm2, %v11856_v60 }
 0x5d5   :  { %7668 = vmatprep.mubr.msk.f32.mxu0 %vm834_vm2, %v11857_v52 }
 0x5d7   :  { %7655 = vmatmul.mubr.msk.f32.gmra.mrb[70].mxu1 %vm834_vm2, %v11858_v26 }
 0x5d8   :  { %7669 = vmatmul.mubr.msk.f32.gmra.mrb[70].mxu0 %vm834_vm2, %v11859_v12  ;;  %7673 = vmatprep.mubr.msk.f32.mxu1 %vm834_vm2, %v11860_v33 }
 0x5d9   :  { %7687 = vmatprep.mubr.msk.f32.mxu0 %vm834_vm2, %v11861_v37 }
 0x5db   :  { %7674 = vmatmul.mubr.msk.f32.vlgmr.msra.gmra.mrb[72].mxu1 %vm834_vm2, %v11862_v42 }
 0x5dc   :  { %7688 = vmatmul.mubr.msk.f32.vlgmr.msra.gmra.mrb[72].mxu0 %vm834_vm2, %v11863_v40  ;;  %7700 = vmatpush3.msra.mxu1 %v4280_v15 }
 0x5dd   :  { %7676 = vmatprep.mubr.msk.f32.mxu1 %vm834_vm2, %v11864_v35  ;;  %7690 = vmatprep.mubr.msk.f32.mxu0 %vm834_vm2, %v11865_v41 }
 0x5de   :  { %8109 = vmatprep.subr.bf16.mxu1 %v11769_v18 }
 0x5df   :  { %7677 = vmatmul.mubr.msk.f32.gmra.mrb[74].mxu1 %vm834_vm2, %v11866_v43 }
 0x5e0   :  { %7691 = vmatmul.mubr.msk.f32.gmra.mrb[74].mxu0 %vm834_vm2, %v11867_v45  ;;  %7679 = vmatprep.mubr.msk.f32.mxu1 %vm834_vm2, %v11868_v48 }
 0x5e1   :  { %7693 = vmatprep.mubr.msk.f32.mxu0 %vm834_vm2, %v11869_v20 }
 0x5e2   :  { %v10436_v57 = vpop.f32.mrb[40].mxu0 }
 0x5e3   :  { %11870 = vst [vmem:[#allocation92_spill] sm:$0xff] %v10436_v57  ;;  %v7467_v6 = vpop.f32.mrb[41].mxu0  ;;  %7680 = vmatmul.mubr.msk.f32.gmra.mrb[76].mxu1 %vm834_vm2, %v11871_v10 }
 0x5e4   :  { %7694 = vmatmul.mubr.msk.f32.gmra.mrb[76].mxu0 %vm834_vm2, %v11872_v29  ;;  %7682 = vmatprep.mubr.msk.f32.mxu1 %vm834_vm2, %v11873_v30 }
 0x5e5   :  { %7696 = vmatprep.mubr.msk.f32.mxu0 %vm834_vm2, %v11874_v55 }
 0x5e7   :  { %7683 = vmatmul.mubr.msk.f32.gmra.mrb[78].mxu1 %vm834_vm2, %v11875_v9 }
 0x5e8   :  { %7697 = vmatmul.mubr.msk.f32.gmra.mrb[78].mxu0 %vm834_vm2, %v11876_v25  ;;  %7701 = vmatprep.mubr.msk.f32.mxu1 %vm834_vm2, %v11877_v53 }
 0x5e9   :  { %7729 = vmatprep.mubr.msk.f32.mxu0 %vm8914_vm3, %v11779_v36 }
 0x5eb   :  { %7702 = vmatmul.mubr.msk.f32.vlgmr.msra.gmra.mrb[80].mxu1 %vm834_vm2, %v11878_v32 }
 0x5ec   :  { %7704 = vmatprep.mubr.msk.f32.mxu1 %vm834_vm2, %v11879_v2 }
 0x5ef   :  { %7705 = vmatmul.mubr.msk.f32.gmra.mrb[82].mxu1 %vm834_vm2, %v11880_v58 }
 0x5f0   :  { %7707 = vmatprep.mubr.msk.f32.mxu1 %vm834_vm2, %v11881_v19 }
 0x5f3   :  { %7708 = vmatmul.mubr.msk.f32.gmra.mrb[84].mxu1 %vm834_vm2, %v11882_v24 }
 0x5f4   :  { %7710 = vmatprep.mubr.msk.f32.mxu1 %vm834_vm2, %v11883_v54 }
 0x5f7   :  { %7711 = vmatmul.mubr.msk.f32.gmra.mrb[86].mxu1 %vm834_vm2, %v11884_v51 }
 0x5f8   :  { %7748 = vmatprep.mubr.msk.f32.mxu1 %vm8914_vm3, %v11779_v36 }
 0x605   :  { %v10470_v44 = vpop.f32.mrb[48].mxu1 }
 0x606   :  { %11885 = vst [vmem:[#allocation98_spill] sm:$0xff] %v10470_v44  ;;  %v7486_v62 = vpop.f32.mrb[49].mxu1 }
 0x622   :  { %v10472_v49 = vpop.f32.mrb[42].mxu0 }
 0x623   :  { %11886 = vst [vmem:[#allocation97_spill] sm:$0xff] %v10472_v49  ;;  %v7505_v38 = vpop.f32.mrb[43].mxu0 }
 0x63a   :  { %v10474_v17 = vpop.f32.mrb[50].mxu1 }
 0x63b   :  { %11887 = vst [vmem:[#allocation15_spill] sm:$0xff] %v10474_v17  ;;  %v7524_v7 = vpop.f32.mrb[51].mxu1 }
 0x642   :  { %v10476_v61 = vpop.f32.mrb[44].mxu0 }
 0x643   :  { %11888 = vst [vmem:[#allocation11_spill] sm:$0xff] %v10476_v61  ;;  %v7543_v8 = vpop.f32.mrb[45].mxu0 }
 0x65a   :  { %v10478_v63 = vpop.f32.mrb[52].mxu1 }
 0x65b   :  { %11889 = vst [vmem:[#allocation6_spill] sm:$0xff] %v10478_v63  ;;  %v7562_v31 = vpop.f32.mrb[53].mxu1 }
 0x67b   :  { %v10480_v59 = vpop.f32.mrb[46].mxu0 }
 0x67c   :  { %11890 = vst [vmem:[#allocation16_spill] sm:$0xff] %v10480_v59  ;;  %v7581_v50 = vpop.f32.mrb[47].mxu0 }
 0x67f   :  { %v10482_v16 = vpop.f32.mrb[48].mxu0 }
 0x680   :  { %v10484_v14 = vpop.f32.mrb[49].mxu0  ;;  %v4414_v28 = vsel %vm120_vm1, %v10482_v16, -inf }
 0x681   :  { %4415 = vmax.xlane.f32.xlu0 %v4414_v28  ;;  %v4411_v56 = vsel %vm120_vm1, %v10484_v14, -inf }
 0x682   :  { %4412 = vmax.xlane.f32.xlu1 %v4411_v56 }
 0x683   :  { %v10490_v27 = vpop.f32.mrb[50].mxu0 }
 0x684   :  { %v10492_v1 = vpop.f32.mrb[51].mxu0  ;;  %v4420_v15 = vsel %vm120_vm1, %v10490_v27, -inf }
 0x685   :  { %v4417_v0 = vsel %vm120_vm1, %v10492_v1, -inf }
 0x686   :  { %4421 = vmax.xlane.f32.xlu1 %v4420_v15  ;;  %4418 = vmax.xlane.f32.xlu0 %v4417_v0 }
 0x687   :  { %v10498_v3 = vpop.f32.mrb[52].mxu0 }
 0x688   :  { %v10500_v22 = vpop.f32.mrb[53].mxu0  ;;  %v4426_v21 = vsel %vm120_vm1, %v10498_v3, -inf }
 0x689   :  { %v4423_v46 = vsel %vm120_vm1, %v10500_v22, -inf }
 0x68a   :  { %4427 = vmax.xlane.f32.xlu1 %v4426_v21  ;;  %4424 = vmax.xlane.f32.xlu0 %v4423_v46  ;;  %v10506_v11 = vpop.f32.mrb[54].mxu1 }
 0x68b   :  { %11891 = vst [vmem:[#allocation7_spill] sm:$0xff] %v10506_v11  ;;  %v10508_v13 = vpop.f32.mrb[54].mxu0  ;;  %v7600_v39 = vpop.f32.mrb[55].mxu1 }
 0x68c   :  { %v10510_v60 = vpop.f32.mrb[55].mxu0  ;;  %v4432_v52 = vsel %vm120_vm1, %v10508_v13, -inf }
 0x68d   :  { %v4429_v26 = vsel %vm120_vm1, %v10510_v60, -inf }
 0x68e   :  { %4433 = vmax.xlane.f32.xlu1 %v4432_v52  ;;  %4430 = vmax.xlane.f32.xlu0 %v4429_v26  ;;  %v10516_v12 = vpop.f32.mrb[56].mxu1 }
 0x68f   :  { %v10518_v33 = vpop.f32.mrb[56].mxu0  ;;  %v10520_v37 = vpop.f32.mrb[57].mxu1  ;;  %v4438_v42 = vsel %vm120_vm1, %v10516_v12, -inf }
 0x690   :  { %v10524_v40 = vpop.f32.mrb[57].mxu0  ;;  %v4435_v35 = vsel %vm120_vm1, %v10520_v37, -inf  ;;  %v4462_v20 = vsel %vm120_vm1, %v10518_v33, -inf }
 0x691   :  { %v4459_v6 = vsel %vm120_vm1, %v10524_v40, -inf }
 0x692   :  { %4439 = vmax.xlane.f32.xlu1 %v4438_v42  ;;  %4436 = vmax.xlane.f32.xlu0 %v4435_v35  ;;  %v10528_v41 = vpop.f32.mrb[58].mxu1 }
 0x693   :  { %v10530_v43 = vpop.f32.mrb[58].mxu0  ;;  %v10532_v45 = vpop.f32.mrb[59].mxu1  ;;  %v4444_v9 = vsel %vm120_vm1, %v10528_v41, -inf }
 0x694   :  { %v10534_v48 = vpop.f32.mrb[59].mxu0  ;;  %v4441_v25 = vsel %vm120_vm1, %v10532_v45, -inf  ;;  %v4468_v19 = vsel %vm120_vm1, %v10530_v43, -inf }
 0x695   :  { %v4465_v24 = vsel %vm120_vm1, %v10534_v48, -inf }
 0x696   :  { %4463 = vmax.xlane.f32.xlu1 %v4462_v20  ;;  %4460 = vmax.xlane.f32.xlu0 %v4459_v6  ;;  %v10540_v10 = vpop.f32.mrb[60].mxu1 }
 0x697   :  { %v10542_v29 = vpop.f32.mrb[60].mxu0  ;;  %v10544_v30 = vpop.f32.mrb[61].mxu1  ;;  %v4450_v7 = vsel %vm120_vm1, %v10540_v10, -inf }
 0x698   :  { %v10546_v55 = vpop.f32.mrb[61].mxu0  ;;  %v4447_v8 = vsel %vm120_vm1, %v10544_v30, -inf  ;;  %v4474_v15 = vsel %vm120_vm1, %v10542_v29, -inf }
 0x699   :  { %v4471_v0 = vsel %vm120_vm1, %v10546_v55, -inf }
 0x69a   :  { %4445 = vmax.xlane.f32.xlu1 %v4444_v9  ;;  %4442 = vmax.xlane.f32.xlu0 %v4441_v25  ;;  %v10552_v53 = vpop.f32.mrb[62].mxu1 }
 0x69b   :  { %v10554_v32 = vpop.f32.mrb[62].mxu0  ;;  %v10556_v2 = vpop.f32.mrb[63].mxu1  ;;  %v4456_v26 = vsel %vm120_vm1, %v10552_v53, -inf }
 0x69c   :  { %v10558_v58 = vpop.f32.mrb[63].mxu0  ;;  %v4453_v42 = vsel %vm120_vm1, %v10556_v2, -inf  ;;  %v4480_v25 = vsel %vm120_vm1, %v10554_v32, -inf }
 0x69e   :  { %4469 = vmax.xlane.f32.xlu1 %v4468_v19  ;;  %4466 = vmax.xlane.f32.xlu0 %v4465_v24  ;;  %v10564_v54 = vpop.f32.mrb[64].mxu1  ;;  %v4477_v19 = vsel %vm120_vm1, %v10558_v58, -inf }
 0x69f   :  { %v10566_v51 = vpop.f32.mrb[64].mxu0  ;;  %v10568_v62 = vpop.f32.mrb[65].mxu1 }
 0x6a0   :  { %v10570_v38 = vpop.f32.mrb[65].mxu0  ;;  %v4510_v59 = vsel %vm120_vm1, %v10566_v51, -inf }
 0x6a1   :  { %v4507_v63 = vsel %vm120_vm1, %v10570_v38, -inf }
 0x6a2   :  { %4451 = vmax.xlane.f32.xlu1 %v4450_v7  ;;  %4448 = vmax.xlane.f32.xlu0 %v4447_v8  ;;  %v10576_v31 = vpop.f32.mrb[66].mxu1 }
 0x6a3   :  { %v10578_v50 = vpop.f32.mrb[66].mxu0  ;;  %v10580_v28 = vpop.f32.mrb[67].mxu1  ;;  %v4492_v49 = vsel %vm120_vm1, %v10576_v31, -inf }
 0x6a4   :  { %v10582_v56 = vpop.f32.mrb[67].mxu0  ;;  %v4489_v44 = vsel %vm120_vm1, %v10580_v28, -inf  ;;  %v4516_v18 = vsel %vm120_vm1, %v10578_v50, -inf }
 0x6a5   :  { %11892 = vst [vmem:[#allocation8_spill] sm:$0xff] %v10582_v56  ;;  %v4513_v47 = vsel %vm120_vm1, %v10582_v56, -inf }
 0x6a6   :  { %4475 = vmax.xlane.f32.xlu1 %v4474_v15  ;;  %4472 = vmax.xlane.f32.xlu0 %v4471_v0  ;;  %v10588_v21 = vpop.f32.mrb[68].mxu1  ;;  %v4486_v0 = vsel %vm120_vm1, %v10564_v54, -inf }
 0x6a7   :  { %11893 = vst [vmem:[#allocation19_spill] sm:$0xff] %v10588_v21  ;;  %v10590_v46 = vpop.f32.mrb[68].mxu0  ;;  %v10592_v39 = vpop.f32.mrb[69].mxu1 }
 0x6a8   :  { %11894 = vst [vmem:[#allocation9_spill] sm:$0xff] %v10590_v46  ;;  %11895 = vst [vmem:[#allocation34_spill] sm:$0xff] %v10592_v39  ;;  %v10594_v52 = vpop.f32.mrb[69].mxu0  ;;  %v4495_v23 = vsel %vm120_vm1, %v10592_v39, -inf }
 0x6aa   :  { %4457 = vmax.xlane.f32.xlu1 %v4456_v26  ;;  %4454 = vmax.xlane.f32.xlu0 %v4453_v42  ;;  %v10600_v35 = vpop.f32.mrb[70].mxu1  ;;  %v4483_v26 = vsel %vm120_vm1, %v10568_v62, -inf }
 0x6ab   :  { %11896 = vst [vmem:[#allocation13_spill] sm:$0xff] %v10600_v35  ;;  %v10602_v20 = vpop.f32.mrb[70].mxu0  ;;  %v10604_v6 = vpop.f32.mrb[71].mxu1 }
 0x6ac   :  { %11897 = vst [vmem:[#allocation10_spill] sm:$0xff] %v10604_v6  ;;  %v10606_v9 = vpop.f32.mrb[71].mxu0 }
 0x6ae   :  { %4481 = vmax.xlane.f32.xlu1 %v4480_v25  ;;  %4478 = vmax.xlane.f32.xlu0 %v4477_v19  ;;  %v10612_v24 = vpop.f32.mrb[72].mxu1 }
 0x6af   :  { %v10614_v7 = vpop.f32.mrb[72].mxu0  ;;  %v10616_v8 = vpop.f32.mrb[73].mxu1 }
 0x6b0   :  { %v10618_v15 = vpop.f32.mrb[73].mxu0 }
 0x6b2   :  { %4487 = vmax.xlane.f32.xlu1 %v4486_v0  ;;  %4484 = vmax.xlane.f32.xlu0 %v4483_v26  ;;  %v10624_v42 = vpop.f32.mrb[74].mxu1 }
 0x6b3   :  { %v10626_v25 = vpop.f32.mrb[74].mxu0  ;;  %v10628_v19 = vpop.f32.mrb[75].mxu1 }
 0x6b4   :  { %v10630_v11 = vpop.f32.mrb[75].mxu0 }
 0x6b6   :  { %4511 = vmax.xlane.f32.xlu1 %v4510_v59  ;;  %4508 = vmax.xlane.f32.xlu0 %v4507_v63  ;;  %v10636_v61 = vpop.f32.mrb[76].mxu1 }
 0x6b7   :  { %v10638_v0 = vpop.f32.mrb[76].mxu0  ;;  %v10640_v26 = vpop.f32.mrb[77].mxu1 }
 0x6b8   :  { %v10642_v17 = vpop.f32.mrb[77].mxu0 }
 0x6ba   :  { %4493 = vmax.xlane.f32.xlu1 %v4492_v49  ;;  %4490 = vmax.xlane.f32.xlu0 %v4489_v44  ;;  %v10648_v57 = vpop.f32.mrb[78].mxu1  ;;  %v4498_v44 = vsel %vm120_vm1, %v10588_v21, -inf }
 0x6bb   :  { %v10650_v59 = vpop.f32.mrb[78].mxu0  ;;  %v10652_v63 = vpop.f32.mrb[79].mxu1 }
 0x6bc   :  { %v10654_v36 = vpop.f32.mrb[79].mxu0 }
 0x6be   :  { %4517 = vmax.xlane.f32.xlu1 %v4516_v18  ;;  %4514 = vmax.xlane.f32.xlu0 %v4513_v47  ;;  %v10660_v4 = vpop.f32.mrb[80].mxu1  ;;  %v4522_v18 = vsel %vm120_vm1, %v10590_v46, -inf  ;;  %v4519_v47 = vsel %vm120_vm1, %v10594_v52, -inf }
 0x6bf   :  { %11898 = vst [vmem:[#allocation36_spill] sm:$0xff] %v10660_v4  ;;  %v10662_v49 = vpop.f32.mrb[81].mxu1 }
 0x6c0   :  { %11899 = vst [vmem:[#allocation14_spill] sm:$0xff] %v10662_v49 }
 0x6c2   :  { %4499 = vmax.xlane.f32.xlu1 %v4498_v44  ;;  %4496 = vmax.xlane.f32.xlu0 %v4495_v23  ;;  %v10668_v5 = vpop.f32.mrb[82].mxu1  ;;  %v4504_v44 = vsel %vm120_vm1, %v10600_v35, -inf  ;;  %v4501_v23 = vsel %vm120_vm1, %v10604_v6, -inf  ;;  %v4534_v35 = vsel %vm120_vm1, %v10612_v24, -inf  ;;  %v4531_v6 = vsel %vm120_vm1, %v10616_v8, -inf }
 0x6c3   :  { %11900 = vst [vmem:[#allocation12_spill] sm:$0xff] %v10668_v5  ;;  %v10670_v34 = vpop.f32.mrb[83].mxu1 }
 0x6c4   :  { %11901 = vst [vmem:[#allocation102_spill] sm:$0xff] %v10670_v34 }
 0x6c6   :  { %4523 = vmax.xlane.f32.xlu1 %v4522_v18  ;;  %4520 = vmax.xlane.f32.xlu0 %v4519_v47  ;;  %v10676_v56 = vpop.f32.mrb[84].mxu1  ;;  %v4528_v18 = vsel %vm120_vm1, %v10602_v20, -inf  ;;  %v4525_v47 = vsel %vm120_vm1, %v10606_v9, -inf }
 0x6c7   :  { %11902 = vst [vmem:[#allocation60_spill] sm:$0xff] %v10676_v56  ;;  %v10678_v21 = vpop.f32.mrb[85].mxu1 }
 0x6c8   :  { %11903 = vst [vmem:[#allocation104_spill] sm:$0xff] %v10678_v21 }
 0x6ca   :  { %4505 = vmax.xlane.f32.xlu1 %v4504_v44  ;;  %4502 = vmax.xlane.f32.xlu0 %v4501_v23  ;;  %v10684_v39 = vpop.f32.mrb[86].mxu1  ;;  %v4558_v44 = vsel %vm120_vm1, %v10614_v7, -inf  ;;  %v4555_v23 = vsel %vm120_vm1, %v10618_v15, -inf }
 0x6cb   :  { %11904 = vst [vmem:[#allocation105_spill] sm:$0xff] %v10684_v39  ;;  %v10686_v46 = vpop.f32.mrb[87].mxu1 }
 0x6cc   :  { %11905 = vst [vmem:[#allocation76_spill] sm:$0xff] %v10686_v46 }
 0x6ce   :  { %4529 = vmax.xlane.f32.xlu1 %v4528_v18  ;;  %4526 = vmax.xlane.f32.xlu0 %v4525_v47  ;;  %v4540_v18 = vsel %vm120_vm1, %v10624_v42, -inf  ;;  %v4537_v47 = vsel %vm120_vm1, %v10628_v19, -inf }
 0x6d2   :  { %4535 = vmax.xlane.f32.xlu1 %v4534_v35  ;;  %4532 = vmax.xlane.f32.xlu0 %v4531_v6  ;;  %v4564_v35 = vsel %vm120_vm1, %v10626_v25, -inf  ;;  %v4561_v6 = vsel %vm120_vm1, %v10630_v11, -inf }
 0x6d6   :  { %4559 = vmax.xlane.f32.xlu1 %v4558_v44  ;;  %4556 = vmax.xlane.f32.xlu0 %v4555_v23  ;;  %v4546_v44 = vsel %vm120_vm1, %v10636_v61, -inf  ;;  %v4543_v23 = vsel %vm120_vm1, %v10640_v26, -inf }
 0x6da   :  { %4541 = vmax.xlane.f32.xlu1 %v4540_v18  ;;  %4538 = vmax.xlane.f32.xlu0 %v4537_v47  ;;  %v4570_v18 = vsel %vm120_vm1, %v10638_v0, -inf  ;;  %v4567_v47 = vsel %vm120_vm1, %v10642_v17, -inf }
 0x6de   :  { %4565 = vmax.xlane.f32.xlu1 %v4564_v35  ;;  %4562 = vmax.xlane.f32.xlu0 %v4561_v6  ;;  %v4552_v35 = vsel %vm120_vm1, %v10648_v57, -inf  ;;  %v4549_v6 = vsel %vm120_vm1, %v10652_v63, -inf }
 0x6e2   :  { %4547 = vmax.xlane.f32.xlu1 %v4546_v44  ;;  %4544 = vmax.xlane.f32.xlu0 %v4543_v23  ;;  %v4576_v44 = vsel %vm120_vm1, %v10650_v59, -inf  ;;  %v4573_v23 = vsel %vm120_vm1, %v10654_v36, -inf }
 0x6e6   :  { %4571 = vmax.xlane.f32.xlu1 %v4570_v18  ;;  %4568 = vmax.xlane.f32.xlu0 %v4567_v47  ;;  %v4582_v18 = vsel %vm120_vm1, %v10660_v4, -inf  ;;  %v4579_v47 = vsel %vm120_vm1, %v10662_v49, -inf }
 0x6ea   :  { %4553 = vmax.xlane.f32.xlu1 %v4552_v35  ;;  %4550 = vmax.xlane.f32.xlu0 %v4549_v6  ;;  %v4588_v35 = vsel %vm120_vm1, %v10668_v5, -inf  ;;  %v4585_v6 = vsel %vm120_vm1, %v10670_v34, -inf  ;;  %v10740_v5 = vpop.permute.xlu0 %5115 }
 0x6eb   :  { %11906 = vst [vmem:[#allocation75_spill] sm:$0xff] %v10740_v5 }
 0x6ee   :  { %4577 = vmax.xlane.f32.xlu1 %v4576_v44  ;;  %4574 = vmax.xlane.f32.xlu0 %v4573_v23  ;;  %v4594_v44 = vsel %vm120_vm1, %v10676_v56, -inf  ;;  %v4591_v23 = vsel %vm120_vm1, %v10678_v21, -inf }
 0x6f2   :  { %4583 = vmax.xlane.f32.xlu1 %v4582_v18  ;;  %4580 = vmax.xlane.f32.xlu0 %v4579_v47  ;;  %v4600_v18 = vsel %vm120_vm1, %v10684_v39, -inf  ;;  %v4597_v47 = vsel %vm120_vm1, %v10686_v46, -inf }
 0x6f6   :  { %4589 = vmax.xlane.f32.xlu1 %v4588_v35  ;;  %4586 = vmax.xlane.f32.xlu0 %v4585_v6  ;;  %v10742_v35 = vpop.permute.xlu1 %5213  ;;  %v10744_v6 = vpop.permute.xlu0 %5311 }
 0x6f7   :  { %11907 = vst [vmem:[#allocation107_spill] sm:$0xff] %v10742_v35  ;;  %11908 = vst [vmem:[#allocation106_spill] sm:$0xff] %v10744_v6 }
 0x6fa   :  { %4595 = vmax.xlane.f32.xlu1 %v4594_v44  ;;  %4592 = vmax.xlane.f32.xlu0 %v4591_v23  ;;  %v10746_v56 = vpop.permute.xlu1 %5409 }
 0x6fb   :  { %11909 = vst [vmem:[#allocation78_spill] sm:$0xff] %v10746_v56 }
 0x6fe   :  { %4601 = vmax.xlane.f32.xlu1 %v4600_v18  ;;  %4598 = vmax.xlane.f32.xlu0 %v4597_v47 }
 0x70e   :  { %v4416_v34 = vpop.xlane.xlu0 %4415 }
 0x70f   :  { %v4604_v44 = vsub.f32 %v10482_v16, %v4416_v34  ;;  %v4413_v23 = vpop.xlane.xlu1 %4412 }
 0x710   :  { %v4603_v21 = vsub.f32 %v10484_v14, %v4413_v23 }
 0x711   :  { %v4669_v39 = vmul.f32 1.442695, %v4604_v44 }
 0x712   :  { %v4667_v49 = vmul.f32 1.442695, %v4603_v21 }
 0x713   :  { %8603 = vpow2.f32 %v4669_v39  ;;  %v4422_v46 = vpop.xlane.xlu1 %4421  ;;  %v4419_v18 = vpop.xlane.xlu0 %4418 }
 0x714   :  { %8605 = vpow2.f32 %v4667_v49  ;;  %v4606_v47 = vsub.f32 %v10490_v27, %v4422_v46  ;;  %v4605_v35 = vsub.f32 %v10492_v1, %v4419_v18 }
 0x716   :  { %v4673_v5 = vmul.f32 1.442695, %v4606_v47  ;;  %v4671_v6 = vmul.f32 1.442695, %v4605_v35 }
 0x717   :  { %v4428_v4 = vpop.xlane.xlu1 %4427  ;;  %v4425_v56 = vpop.xlane.xlu0 %4424 }
 0x718   :  { %8607 = vpow2.f32 %v4673_v5  ;;  %v4608_v34 = vsub.f32 %v10498_v3, %v4428_v4  ;;  %v4607_v16 = vsub.f32 %v10500_v22, %v4425_v56 }
 0x719   :  { %8609 = vpow2.f32 %v4671_v6 }
 0x71a   :  { %v4677_v14 = vmul.f32 1.442695, %v4608_v34  ;;  %v4675_v21 = vmul.f32 1.442695, %v4607_v16 }
 0x71b   :  { %v4434_v39 = vpop.xlane.xlu1 %4433  ;;  %v4431_v44 = vpop.xlane.xlu0 %4430 }
 0x71c   :  { %8611 = vpow2.f32 %v4677_v14  ;;  %v4610_v49 = vsub.f32 %v10508_v13, %v4434_v39  ;;  %v4609_v27 = vsub.f32 %v10510_v60, %v4431_v44 }
 0x71d   :  { %v10756_v1 = vpop.eup %8603  ;;  %8613 = vpow2.f32 %v4675_v21 }
 0x71e   :  { %v10758_v46 = vpop.eup %8605  ;;  %v4681_v5 = vmul.f32 1.442695, %v4610_v49  ;;  %v4679_v35 = vmul.f32 1.442695, %v4609_v27  ;;  %v4798_v4 = vsel %vm120_vm1, %v10756_v1, 0.0 }
 0x71f   :  { %v4440_v3 = vpop.xlane.xlu1 %4439  ;;  %4799 = vadd.xlane.f32.xlu1 %v4798_v4  ;;  %v4437_v22 = vpop.xlane.xlu0 %4436  ;;  %v4795_v56 = vsel %vm120_vm1, %v10758_v46, 0.0 }
 0x720   :  { %8615 = vpow2.f32 %v4681_v5  ;;  %v4612_v13 = vsub.f32 %v10516_v12, %v4440_v3  ;;  %v4611_v60 = vsub.f32 %v10520_v37, %v4437_v22  ;;  %4796 = vadd.xlane.f32.xlu0 %v4795_v56 }
 0x721   :  { %8617 = vpow2.f32 %v4679_v35 }
 0x722   :  { %v10766_v6 = vpop.eup %8607  ;;  %v4685_v23 = vmul.f32 1.442695, %v4612_v13  ;;  %v4683_v18 = vmul.f32 1.442695, %v4611_v60 }
 0x723   :  { %v10768_v47 = vpop.eup %8609  ;;  %v4464_v34 = vpop.xlane.xlu1 %4463  ;;  %v4804_v14 = vsel %vm120_vm1, %v10766_v6, 0.0 }
 0x724   :  { %v4461_v16 = vpop.xlane.xlu0 %4460  ;;  %8619 = vpow2.f32 %v4685_v23  ;;  %v4620_v21 = vsub.f32 %v10518_v33, %v4464_v34  ;;  %4805 = vadd.xlane.f32.xlu1 %v4804_v14  ;;  %v4801_v37 = vsel %vm120_vm1, %v10768_v47, 0.0 }
 0x725   :  { %v4619_v12 = vsub.f32 %v10524_v40, %v4461_v16  ;;  %8621 = vpow2.f32 %v4683_v18  ;;  %4802 = vadd.xlane.f32.xlu0 %v4801_v37 }
 0x726   :  { %v10776_v39 = vpop.eup %8611  ;;  %v4701_v44 = vmul.f32 1.442695, %v4620_v21 }
 0x727   :  { %v4699_v49 = vmul.f32 1.442695, %v4619_v12  ;;  %v10778_v27 = vpop.eup %8613  ;;  %v4446_v5 = vpop.xlane.xlu1 %4445  ;;  %v4810_v4 = vsel %vm120_vm1, %v10776_v39, 0.0 }
 0x728   :  { %v4443_v35 = vpop.xlane.xlu0 %4442  ;;  %8623 = vpow2.f32 %v4701_v44  ;;  %v4614_v33 = vsub.f32 %v10528_v41, %v4446_v5  ;;  %4811 = vadd.xlane.f32.xlu1 %v4810_v4  ;;  %v4807_v3 = vsel %vm120_vm1, %v10778_v27, 0.0 }
 0x729   :  { %v4613_v40 = vsub.f32 %v10532_v45, %v4443_v35  ;;  %8625 = vpow2.f32 %v4699_v49  ;;  %4808 = vadd.xlane.f32.xlu0 %v4807_v3 }
 0x72a   :  { %v10786_v22 = vpop.eup %8615  ;;  %v4689_v56 = vmul.f32 1.442695, %v4614_v33 }
 0x72b   :  { %v4687_v13 = vmul.f32 1.442695, %v4613_v40  ;;  %v10788_v60 = vpop.eup %8617  ;;  %v4470_v23 = vpop.xlane.xlu1 %4469  ;;  %v4816_v34 = vsel %vm120_vm1, %v10786_v22, 0.0 }
 0x72c   :  { %v4467_v18 = vpop.xlane.xlu0 %4466  ;;  %8627 = vpow2.f32 %v4689_v56  ;;  %v4622_v41 = vsub.f32 %v10530_v43, %v4470_v23  ;;  %4817 = vadd.xlane.f32.xlu1 %v4816_v34  ;;  %v4813_v16 = vsel %vm120_vm1, %v10788_v60, 0.0 }
 0x72d   :  { %v4621_v45 = vsub.f32 %v10534_v48, %v4467_v18  ;;  %8629 = vpow2.f32 %v4687_v13  ;;  %4814 = vadd.xlane.f32.xlu0 %v4813_v16 }
 0x72e   :  { %v10796_v14 = vpop.eup %8619  ;;  %v4705_v21 = vmul.f32 1.442695, %v4622_v41 }
 0x72f   :  { %v4703_v12 = vmul.f32 1.442695, %v4621_v45  ;;  %v10798_v37 = vpop.eup %8621  ;;  %v4452_v44 = vpop.xlane.xlu1 %4451  ;;  %v4822_v5 = vsel %vm120_vm1, %v10796_v14, 0.0 }
 0x730   :  { %v4449_v49 = vpop.xlane.xlu0 %4448  ;;  %8631 = vpow2.f32 %v4705_v21  ;;  %v4616_v43 = vsub.f32 %v10540_v10, %v4452_v44  ;;  %4823 = vadd.xlane.f32.xlu1 %v4822_v5  ;;  %v4819_v35 = vsel %vm120_vm1, %v10798_v37, 0.0 }
 0x731   :  { %v4615_v48 = vsub.f32 %v10544_v30, %v4449_v49  ;;  %8633 = vpow2.f32 %v4703_v12  ;;  %4820 = vadd.xlane.f32.xlu0 %v4819_v35 }
 0x732   :  { %v10806_v4 = vpop.eup %8623  ;;  %v4693_v33 = vmul.f32 1.442695, %v4616_v43 }
 0x733   :  { %v4691_v40 = vmul.f32 1.442695, %v4615_v48  ;;  %v10808_v3 = vpop.eup %8625  ;;  %v4476_v56 = vpop.xlane.xlu1 %4475  ;;  %v4846_v23 = vsel %vm120_vm1, %v10806_v4, 0.0 }
 0x734   :  { %v4473_v13 = vpop.xlane.xlu0 %4472  ;;  %8635 = vpow2.f32 %v4693_v33  ;;  %v4624_v10 = vsub.f32 %v10542_v29, %v4476_v56  ;;  %4847 = vadd.xlane.f32.xlu1 %v4846_v23  ;;  %v4843_v18 = vsel %vm120_vm1, %v10808_v3, 0.0 }
 0x735   :  { %v4623_v30 = vsub.f32 %v10546_v55, %v4473_v13  ;;  %8637 = vpow2.f32 %v4691_v40  ;;  %4844 = vadd.xlane.f32.xlu0 %v4843_v18 }
 0x736   :  { %v10816_v34 = vpop.eup %8627  ;;  %v4709_v41 = vmul.f32 1.442695, %v4624_v10 }
 0x737   :  { %v4707_v45 = vmul.f32 1.442695, %v4623_v30  ;;  %v10818_v16 = vpop.eup %8629  ;;  %v4458_v21 = vpop.xlane.xlu1 %4457  ;;  %v4828_v44 = vsel %vm120_vm1, %v10816_v34, 0.0 }
 0x738   :  { %v4455_v12 = vpop.xlane.xlu0 %4454  ;;  %8639 = vpow2.f32 %v4709_v41  ;;  %v4618_v29 = vsub.f32 %v10552_v53, %v4458_v21  ;;  %4829 = vadd.xlane.f32.xlu1 %v4828_v44  ;;  %v4825_v49 = vsel %vm120_vm1, %v10818_v16, 0.0 }
 0x739   :  { %v4617_v55 = vsub.f32 %v10556_v2, %v4455_v12  ;;  %8641 = vpow2.f32 %v4707_v45  ;;  %4826 = vadd.xlane.f32.xlu0 %v4825_v49 }
 0x73a   :  { %v10826_v5 = vpop.eup %8631  ;;  %v4697_v43 = vmul.f32 1.442695, %v4618_v29 }
 0x73b   :  { %v4695_v48 = vmul.f32 1.442695, %v4617_v55  ;;  %v10828_v35 = vpop.eup %8633  ;;  %v4482_v33 = vpop.xlane.xlu1 %4481  ;;  %v4852_v56 = vsel %vm120_vm1, %v10826_v5, 0.0 }
 0x73c   :  { %v4479_v40 = vpop.xlane.xlu0 %4478  ;;  %8643 = vpow2.f32 %v4697_v43  ;;  %v4626_v53 = vsub.f32 %v10554_v32, %v4482_v33  ;;  %4853 = vadd.xlane.f32.xlu1 %v4852_v56  ;;  %v4849_v13 = vsel %vm120_vm1, %v10828_v35, 0.0 }
 0x73d   :  { %v4625_v2 = vsub.f32 %v10558_v58, %v4479_v40  ;;  %8645 = vpow2.f32 %v4695_v48  ;;  %4850 = vadd.xlane.f32.xlu0 %v4849_v13 }
 0x73e   :  { %v10836_v23 = vpop.eup %8635  ;;  %v4713_v10 = vmul.f32 1.442695, %v4626_v53 }
 0x73f   :  { %v4711_v30 = vmul.f32 1.442695, %v4625_v2  ;;  %v10838_v18 = vpop.eup %8637  ;;  %v4488_v41 = vpop.xlane.xlu1 %4487  ;;  %v4834_v21 = vsel %vm120_vm1, %v10836_v23, 0.0 }
 0x740   :  { %v4485_v45 = vpop.xlane.xlu0 %4484  ;;  %8647 = vpow2.f32 %v4713_v10  ;;  %v4628_v32 = vsub.f32 %v10564_v54, %v4488_v41  ;;  %4835 = vadd.xlane.f32.xlu1 %v4834_v21  ;;  %v4831_v58 = vsel %vm120_vm1, %v10838_v18, 0.0 }
 0x741   :  { %8649 = vpow2.f32 %v4711_v30  ;;  %4832 = vadd.xlane.f32.xlu0 %v4831_v58  ;;  %v4627_v29 = vsub.f32 %v10568_v62, %v4485_v45 }
 0x742   :  { %v10845_v12 = vpop.eup %8639  ;;  %v4717_v44 = vmul.f32 1.442695, %v4628_v32 }
 0x743   :  { %v10848_v55 = vpop.eup %8641  ;;  %v4512_v49 = vpop.xlane.xlu1 %4511  ;;  %v4858_v48 = vsel %vm120_vm1, %v10845_v12, 0.0  ;;  %v4715_v62 = vmul.f32 1.442695, %v4627_v29 }
 0x744   :  { %v4509_v43 = vpop.xlane.xlu0 %4508  ;;  %8651 = vpow2.f32 %v4717_v44  ;;  %v4636_v54 = vsub.f32 %v10566_v51, %v4512_v49  ;;  %4859 = vadd.xlane.f32.xlu1 %v4858_v48  ;;  %v4855_v40 = vsel %vm120_vm1, %v10848_v55, 0.0 }
 0x745   :  { %v4635_v33 = vsub.f32 %v10570_v38, %v4509_v43  ;;  %4856 = vadd.xlane.f32.xlu0 %v4855_v40  ;;  %v11910_v43 = vld [vmem:[#allocation8_spill] sm:$0xff] }
 0x746   :  { %v10856_v56 = vpop.eup %8643  ;;  %v4733_v53 = vmul.f32 1.442695, %v4636_v54 }
 0x747   :  { %v4731_v2 = vmul.f32 1.442695, %v4635_v33  ;;  %v10858_v13 = vpop.eup %8645  ;;  %v4494_v10 = vpop.xlane.xlu1 %4493  ;;  %v4840_v41 = vsel %vm120_vm1, %v10856_v56, 0.0 }
 0x748   :  { %v4491_v30 = vpop.xlane.xlu0 %4490  ;;  %8653 = vpow2.f32 %v4733_v53  ;;  %v4630_v51 = vsub.f32 %v10576_v31, %v4494_v10  ;;  %4841 = vadd.xlane.f32.xlu1 %v4840_v41  ;;  %v4837_v45 = vsel %vm120_vm1, %v10858_v13, 0.0  ;;  %v11912_v41 = vld [vmem:[#allocation34_spill] sm:$0xff] }
 0x749   :  { %v4629_v38 = vsub.f32 %v10580_v28, %v4491_v30  ;;  %8655 = vpow2.f32 %v4731_v2  ;;  %4838 = vadd.xlane.f32.xlu0 %v4837_v45  ;;  %v11911_v30 = vld [vmem:[#allocation19_spill] sm:$0xff] }
 0x74a   :  { %v10866_v21 = vpop.eup %8647  ;;  %8657 = vpow2.f32 %v4715_v62  ;;  %v4721_v32 = vmul.f32 1.442695, %v4630_v51 }
 0x74b   :  { %v4719_v58 = vmul.f32 1.442695, %v4629_v38  ;;  %v10868_v44 = vpop.eup %8649  ;;  %v4518_v29 = vpop.xlane.xlu1 %4517  ;;  %v4864_v31 = vsel %vm120_vm1, %v10866_v21, 0.0 }
 0x74c   :  { %v4515_v49 = vpop.xlane.xlu0 %4514  ;;  %8659 = vpow2.f32 %v4721_v32  ;;  %v4638_v28 = vsub.f32 %v10578_v50, %v4518_v29  ;;  %4865 = vadd.xlane.f32.xlu1 %v4864_v31  ;;  %v4861_v54 = vsel %vm120_vm1, %v10868_v44, 0.0 }
 0x74d   :  { %v4637_v48 = vsub.f32 %v11910_v43, %v4515_v49  ;;  %4862 = vadd.xlane.f32.xlu0 %v4861_v54  ;;  %8661 = vpow2.f32 %v4719_v58  ;;  %v11913_v43 = vld [vmem:[#allocation9_spill] sm:$0xff] }
 0x74e   :  { %v10876_v33 = vpop.eup %8651  ;;  %v4737_v40 = vmul.f32 1.442695, %v4638_v28 }
 0x74f   :  { %v4735_v62 = vmul.f32 1.442695, %v4637_v48  ;;  %v4500_v53 = vpop.xlane.xlu1 %4499  ;;  %v4870_v10 = vsel %vm120_vm1, %v10876_v33, 0.0 }
 0x750   :  { %v4497_v2 = vpop.xlane.xlu0 %4496  ;;  %8663 = vpow2.f32 %v4737_v40  ;;  %v4632_v50 = vsub.f32 %v11911_v30, %v4500_v53  ;;  %4871 = vadd.xlane.f32.xlu1 %v4870_v10 }
 0x751   :  { %v4631_v51 = vsub.f32 %v11912_v41, %v4497_v2  ;;  %8665 = vpow2.f32 %v4735_v62 }
 0x752   :  { %v10882_v38 = vpop.eup %8653  ;;  %v4725_v45 = vmul.f32 1.442695, %v4632_v50 }
 0x753   :  { %v4723_v32 = vmul.f32 1.442695, %v4631_v51  ;;  %v10884_v29 = vpop.eup %8655  ;;  %v4524_v58 = vpop.xlane.xlu1 %4523  ;;  %v4894_v31 = vsel %vm120_vm1, %v10882_v38, 0.0 }
 0x754   :  { %v4521_v49 = vpop.xlane.xlu0 %4520  ;;  %v10888_v28 = vpop.eup %8657  ;;  %8667 = vpow2.f32 %v4725_v45  ;;  %v4640_v48 = vsub.f32 %v11913_v43, %v4524_v58  ;;  %4895 = vadd.xlane.f32.xlu0 %v4894_v31  ;;  %v4891_v40 = vsel %vm120_vm1, %v10884_v29, 0.0  ;;  %v11916_v58 = vld [vmem:[#allocation10_spill] sm:$0xff] }
 0x755   :  { %v4639_v54 = vsub.f32 %v10594_v52, %v4521_v49  ;;  %4892 = vadd.xlane.f32.xlu1 %v4891_v40  ;;  %8669 = vpow2.f32 %v4723_v32  ;;  %v4867_v50 = vsel %vm120_vm1, %v10888_v28, 0.0  ;;  %v11915_v52 = vld [vmem:[#allocation13_spill] sm:$0xff] }
 0x756   :  { %v10894_v62 = vpop.eup %8659  ;;  %v4741_v53 = vmul.f32 1.442695, %v4640_v48 }
 0x757   :  { %11914 = vst [vmem:[#allocation77_spill] sm:$0xff] %v10894_v62  ;;  %v4739_v2 = vmul.f32 1.442695, %v4639_v54  ;;  %v4506_v10 = vpop.xlane.xlu1 %4505  ;;  %v4876_v41 = vsel %vm120_vm1, %v10894_v62, 0.0  ;;  %v10900_v51 = vpop.eup %8661 }
 0x758   :  { %v4503_v30 = vpop.xlane.xlu0 %4502  ;;  %8671 = vpow2.f32 %v4741_v53  ;;  %v4634_v45 = vsub.f32 %v11915_v52, %v4506_v10  ;;  %4868 = vadd.xlane.f32.xlu0 %v4867_v50  ;;  %v4873_v62 = vsel %vm120_vm1, %v10900_v51, 0.0 }
 0x759   :  { %v4633_v49 = vsub.f32 %v11916_v58, %v4503_v30  ;;  %4877 = vadd.xlane.f32.xlu1 %v4876_v41  ;;  %8673 = vpow2.f32 %v4739_v2 }
 0x75a   :  { %v10904_v32 = vpop.eup %8663  ;;  %v4729_v31 = vmul.f32 1.442695, %v4634_v45 }
 0x75b   :  { %v4727_v43 = vmul.f32 1.442695, %v4633_v49  ;;  %v4530_v48 = vpop.xlane.xlu1 %4529  ;;  %v4900_v40 = vsel %vm120_vm1, %v10904_v32, 0.0  ;;  %v10910_v53 = vpop.eup %8665 }
 0x75c   :  { %v4527_v54 = vpop.xlane.xlu0 %4526  ;;  %8675 = vpow2.f32 %v4729_v31  ;;  %v4642_v10 = vsub.f32 %v10602_v20, %v4530_v48  ;;  %4874 = vadd.xlane.f32.xlu0 %v4873_v62  ;;  %v4897_v49 = vsel %vm120_vm1, %v10910_v53, 0.0 }
 0x75d   :  { %v4641_v30 = vsub.f32 %v10606_v9, %v4527_v54  ;;  %4901 = vadd.xlane.f32.xlu1 %v4900_v40  ;;  %8677 = vpow2.f32 %v4727_v43 }
 0x75e   :  { %v10914_v2 = vpop.eup %8667  ;;  %v4745_v50 = vmul.f32 1.442695, %v4642_v10 }
 0x75f   :  { %v4743_v41 = vmul.f32 1.442695, %v4641_v30  ;;  %v4536_v52 = vpop.xlane.xlu1 %4535  ;;  %v4882_v58 = vsel %vm120_vm1, %v10914_v2, 0.0  ;;  %v10920_v31 = vpop.eup %8669 }
 0x760   :  { %v4533_v45 = vpop.xlane.xlu0 %4532  ;;  %8679 = vpow2.f32 %v4745_v50  ;;  %v4644_v20 = vsub.f32 %v10612_v24, %v4536_v52  ;;  %4898 = vadd.xlane.f32.xlu0 %v4897_v49  ;;  %v4879_v10 = vsel %vm120_vm1, %v10920_v31, 0.0 }
 0x761   :  { %4883 = vadd.xlane.f32.xlu1 %v4882_v58  ;;  %8681 = vpow2.f32 %v4743_v41  ;;  %v4643_v43 = vsub.f32 %v10616_v8, %v4533_v45 }
 0x762   :  { %v10923_v9 = vpop.eup %8671  ;;  %v4749_v62 = vmul.f32 1.442695, %v4644_v20 }
 0x763   :  { %11917 = vst [vmem:[#allocation70_spill] sm:$0xff] %v10923_v9  ;;  %v4560_v48 = vpop.xlane.xlu1 %4559  ;;  %v4906_v40 = vsel %vm120_vm1, %v10923_v9, 0.0  ;;  %v10930_v30 = vpop.eup %8673  ;;  %v4747_v8 = vmul.f32 1.442695, %v4643_v43 }
 0x764   :  { %v4557_v54 = vpop.xlane.xlu0 %4556  ;;  %8683 = vpow2.f32 %v4749_v62  ;;  %v4652_v24 = vsub.f32 %v10614_v7, %v4560_v48  ;;  %4880 = vadd.xlane.f32.xlu0 %v4879_v10  ;;  %v4903_v9 = vsel %vm120_vm1, %v10930_v30, 0.0 }
 0x765   :  { %v4651_v50 = vsub.f32 %v10618_v15, %v4557_v54  ;;  %4907 = vadd.xlane.f32.xlu1 %v4906_v40 }
 0x766   :  { %v10934_v41 = vpop.eup %8675  ;;  %v4765_v52 = vmul.f32 1.442695, %v4652_v24 }
 0x767   :  { %v4763_v45 = vmul.f32 1.442695, %v4651_v50  ;;  %v4542_v58 = vpop.xlane.xlu1 %4541  ;;  %v4888_v20 = vsel %vm120_vm1, %v10934_v41, 0.0  ;;  %v10940_v62 = vpop.eup %8677 }
 0x768   :  { %v4539_v49 = vpop.xlane.xlu0 %4538  ;;  %8685 = vpow2.f32 %v4765_v52  ;;  %v4646_v7 = vsub.f32 %v10624_v42, %v4542_v58  ;;  %4904 = vadd.xlane.f32.xlu0 %v4903_v9  ;;  %v4885_v50 = vsel %vm120_vm1, %v10940_v62, 0.0 }
 0x769   :  { %v4645_v15 = vsub.f32 %v10628_v19, %v4539_v49  ;;  %8687 = vpow2.f32 %v4763_v45  ;;  %4889 = vadd.xlane.f32.xlu1 %v4888_v20 }
 0x76a   :  { %v10944_v43 = vpop.eup %8679  ;;  %8689 = vpow2.f32 %v4747_v8  ;;  %v4753_v48 = vmul.f32 1.442695, %v4646_v7 }
 0x76b   :  { %v4751_v54 = vmul.f32 1.442695, %v4645_v15  ;;  %v4566_v40 = vpop.xlane.xlu1 %4565  ;;  %v4912_v24 = vsel %vm120_vm1, %v10944_v43, 0.0  ;;  %v10950_v52 = vpop.eup %8681 }
 0x76c   :  { %v4563_v10 = vpop.xlane.xlu0 %4562  ;;  %8691 = vpow2.f32 %v4753_v48  ;;  %v4654_v42 = vsub.f32 %v10626_v25, %v4566_v40  ;;  %4886 = vadd.xlane.f32.xlu0 %v4885_v50  ;;  %v4909_v7 = vsel %vm120_vm1, %v10950_v52, 0.0 }
 0x76d   :  { %v4653_v19 = vsub.f32 %v10630_v11, %v4563_v10  ;;  %4913 = vadd.xlane.f32.xlu1 %v4912_v24  ;;  %8693 = vpow2.f32 %v4751_v54 }
 0x76e   :  { %v10954_v9 = vpop.eup %8683  ;;  %v4769_v8 = vmul.f32 1.442695, %v4654_v42 }
 0x76f   :  { %v4767_v45 = vmul.f32 1.442695, %v4653_v19  ;;  %v4548_v58 = vpop.xlane.xlu1 %4547  ;;  %v4918_v20 = vsel %vm120_vm1, %v10954_v9, 0.0 }
 0x770   :  { %v4545_v49 = vpop.xlane.xlu0 %4544  ;;  %8695 = vpow2.f32 %v4769_v8  ;;  %v4648_v25 = vsub.f32 %v10636_v61, %v4548_v58  ;;  %4910 = vadd.xlane.f32.xlu0 %v4909_v7 }
 0x771   :  { %v4647_v11 = vsub.f32 %v10640_v26, %v4545_v49  ;;  %4919 = vadd.xlane.f32.xlu1 %v4918_v20  ;;  %8697 = vpow2.f32 %v4767_v45 }
 0x772   :  { %v10962_v15 = vpop.eup %8685  ;;  %v4757_v48 = vmul.f32 1.442695, %v4648_v25 }
 0x773   :  { %11918 = vst [vmem:[#allocation108_spill] sm:$0xff] %v10962_v15  ;;  %v4755_v54 = vmul.f32 1.442695, %v4647_v11  ;;  %v10964_v40 = vpop.eup %8687  ;;  %v4572_v10 = vpop.xlane.xlu1 %4571  ;;  %v4942_v50 = vsel %vm120_vm1, %v10962_v15, 0.0 }
 0x774   :  { %v4569_v24 = vpop.xlane.xlu0 %4568  ;;  %v10968_v42 = vpop.eup %8689  ;;  %8699 = vpow2.f32 %v4757_v48  ;;  %v4656_v61 = vsub.f32 %v10638_v0, %v4572_v10  ;;  %4943 = vadd.xlane.f32.xlu0 %v4942_v50  ;;  %v4939_v19 = vsel %vm120_vm1, %v10964_v40, 0.0 }
 0x775   :  { %v4655_v26 = vsub.f32 %v10642_v17, %v4569_v24  ;;  %4940 = vadd.xlane.f32.xlu1 %v4939_v19  ;;  %8701 = vpow2.f32 %v4755_v54  ;;  %v4915_v7 = vsel %vm120_vm1, %v10968_v42, 0.0 }
 0x776   :  { %v10974_v8 = vpop.eup %8691  ;;  %v4773_v45 = vmul.f32 1.442695, %v4656_v61 }
 0x777   :  { %v4771_v58 = vmul.f32 1.442695, %v4655_v26  ;;  %v4554_v49 = vpop.xlane.xlu1 %4553  ;;  %v4924_v0 = vsel %vm120_vm1, %v10974_v8, 0.0  ;;  %v10980_v25 = vpop.eup %8693 }
 0x778   :  { %v4551_v20 = vpop.xlane.xlu0 %4550  ;;  %8703 = vpow2.f32 %v4773_v45  ;;  %v4650_v17 = vsub.f32 %v10648_v57, %v4554_v49  ;;  %4916 = vadd.xlane.f32.xlu0 %v4915_v7  ;;  %v4921_v26 = vsel %vm120_vm1, %v10980_v25, 0.0 }
 0x779   :  { %v4649_v11 = vsub.f32 %v10652_v63, %v4551_v20  ;;  %4925 = vadd.xlane.f32.xlu1 %v4924_v0  ;;  %8705 = vpow2.f32 %v4771_v58 }
 0x77a   :  { %v10984_v48 = vpop.eup %8695  ;;  %v4761_v54 = vmul.f32 1.442695, %v4650_v17 }
 0x77b   :  { %11919 = vst [vmem:[#allocation73_spill] sm:$0xff] %v10984_v48  ;;  %v4759_v10 = vmul.f32 1.442695, %v4649_v11  ;;  %v4578_v24 = vpop.xlane.xlu1 %4577  ;;  %v4948_v61 = vsel %vm120_vm1, %v10984_v48, 0.0  ;;  %v10990_v19 = vpop.eup %8697 }
 0x77c   :  { %v4575_v50 = vpop.xlane.xlu0 %4574  ;;  %11920 = vst [vmem:[#allocation110_spill] sm:$0xff] %v10990_v19  ;;  %8707 = vpow2.f32 %v4761_v54  ;;  %v4658_v57 = vsub.f32 %v10650_v59, %v4578_v24  ;;  %4922 = vadd.xlane.f32.xlu0 %v4921_v26  ;;  %v4945_v17 = vsel %vm120_vm1, %v10990_v19, 0.0  ;;  %v11921_v59 = vld [vmem:[#allocation36_spill] sm:$0xff]  ;;  %v11922_v54 = vld [vmem:[#allocation14_spill] sm:$0xff] }
 0x77d   :  { %v4657_v63 = vsub.f32 %v10654_v36, %v4575_v50  ;;  %4949 = vadd.xlane.f32.xlu1 %v4948_v61  ;;  %8709 = vpow2.f32 %v4759_v10 }
 0x77e   :  { %v10994_v45 = vpop.eup %8699  ;;  %v4777_v58 = vmul.f32 1.442695, %v4658_v57 }
 0x77f   :  { %v4775_v49 = vmul.f32 1.442695, %v4657_v63  ;;  %v4584_v20 = vpop.xlane.xlu1 %4583  ;;  %v4930_v0 = vsel %vm120_vm1, %v10994_v45, 0.0  ;;  %v11000_v11 = vpop.eup %8701 }
 0x780   :  { %v4581_v7 = vpop.xlane.xlu0 %4580  ;;  %8711 = vpow2.f32 %v4777_v58  ;;  %v4660_v36 = vsub.f32 %v11921_v59, %v4584_v20  ;;  %4946 = vadd.xlane.f32.xlu0 %v4945_v17  ;;  %v4927_v48 = vsel %vm120_vm1, %v11000_v11, 0.0  ;;  %v11925_v20 = vld [vmem:[#allocation12_spill] sm:$0xff]  ;;  %v11926_v17 = vld [vmem:[#allocation102_spill] sm:$0xff] }
 0x781   :  { %v4659_v24 = vsub.f32 %v11922_v54, %v4581_v7  ;;  %4931 = vadd.xlane.f32.xlu1 %v4930_v0  ;;  %8713 = vpow2.f32 %v4775_v49 }
 0x782   :  { %v11004_v10 = vpop.eup %8703  ;;  %v4781_v50 = vmul.f32 1.442695, %v4660_v36 }
 0x783   :  { %11923 = vst [vmem:[#allocation79_spill] sm:$0xff] %v11004_v10  ;;  %v4779_v61 = vmul.f32 1.442695, %v4659_v24  ;;  %v4590_v26 = vpop.xlane.xlu1 %4589  ;;  %v4954_v63 = vsel %vm120_vm1, %v11004_v10, 0.0  ;;  %v11010_v58 = vpop.eup %8705 }
 0x784   :  { %v4587_v57 = vpop.xlane.xlu0 %4586  ;;  %11924 = vst [vmem:[#allocation109_spill] sm:$0xff] %v11010_v58  ;;  %8715 = vpow2.f32 %v4781_v50  ;;  %v4662_v7 = vsub.f32 %v11925_v20, %v4590_v26  ;;  %4928 = vadd.xlane.f32.xlu0 %v4927_v48  ;;  %v4951_v19 = vsel %vm120_vm1, %v11010_v58, 0.0  ;;  %v11927_v26 = vld [vmem:[#allocation60_spill] sm:$0xff] }
 0x785   :  { %v4661_v0 = vsub.f32 %v11926_v17, %v4587_v57  ;;  %4955 = vadd.xlane.f32.xlu1 %v4954_v63  ;;  %8717 = vpow2.f32 %v4779_v61  ;;  %v11928_v48 = vld [vmem:[#allocation104_spill] sm:$0xff] }
 0x786   :  { %v11014_v49 = vpop.eup %8707  ;;  %v4785_v59 = vmul.f32 1.442695, %v4662_v7 }
 0x787   :  { %v4783_v36 = vmul.f32 1.442695, %v4661_v0  ;;  %v4596_v54 = vpop.xlane.xlu1 %4595  ;;  %v4936_v10 = vsel %vm120_vm1, %v11014_v49, 0.0  ;;  %v11020_v50 = vpop.eup %8709 }
 0x788   :  { %v4593_v24 = vpop.xlane.xlu0 %4592  ;;  %8719 = vpow2.f32 %v4785_v59  ;;  %v4664_v57 = vsub.f32 %v11927_v26, %v4596_v54  ;;  %4952 = vadd.xlane.f32.xlu0 %v4951_v19  ;;  %v4933_v58 = vsel %vm120_vm1, %v11020_v50, 0.0  ;;  %v11931_v54 = vld [vmem:[#allocation105_spill] sm:$0xff]  ;;  %v11932_v19 = vld [vmem:[#allocation76_spill] sm:$0xff] }
 0x789   :  { %v4663_v63 = vsub.f32 %v11928_v48, %v4593_v24  ;;  %4937 = vadd.xlane.f32.xlu1 %v4936_v10  ;;  %8721 = vpow2.f32 %v4783_v36 }
 0x78a   :  { %v11024_v61 = vpop.eup %8711  ;;  %v4789_v20 = vmul.f32 1.442695, %v4664_v57 }
 0x78b   :  { %11929 = vst [vmem:[#allocation74_spill] sm:$0xff] %v11024_v61  ;;  %v4787_v7 = vmul.f32 1.442695, %v4663_v63  ;;  %v4602_v17 = vpop.xlane.xlu1 %4601  ;;  %v4960_v15 = vsel %vm120_vm1, %v11024_v61, 0.0  ;;  %v11030_v59 = vpop.eup %8713 }
 0x78c   :  { %v4599_v0 = vpop.xlane.xlu0 %4598  ;;  %11930 = vst [vmem:[#allocation112_spill] sm:$0xff] %v11030_v59  ;;  %8723 = vpow2.f32 %v4789_v20  ;;  %v4666_v24 = vsub.f32 %v11931_v54, %v4602_v17  ;;  %4934 = vadd.xlane.f32.xlu0 %v4933_v58  ;;  %v4957_v63 = vsel %vm120_vm1, %v11030_v59, 0.0  ;;  %v11942_v59 = vld [vmem:[#allocation81_spill] sm:$0xff] }
 0x78d   :  { %v4665_v10 = vsub.f32 %v11932_v19, %v4599_v0  ;;  %4961 = vadd.xlane.f32.xlu1 %v4960_v15  ;;  %8725 = vpow2.f32 %v4787_v7 }
 0x78e   :  { %v11034_v36 = vpop.eup %8715  ;;  %v4793_v26 = vmul.f32 1.442695, %v4666_v24 }
 0x78f   :  { %11933 = vst [vmem:[#allocation111_spill] sm:$0xff] %v11034_v36  ;;  %v4791_v57 = vmul.f32 1.442695, %v4665_v10  ;;  %v4966_v48 = vsel %vm120_vm1, %v11034_v36, 0.0  ;;  %v11040_v61 = vpop.eup %8717  ;;  %v11945_v36 = vmov 0.0|0.0  }
 0x790   :  { %8727 = vpow2.f32 %v4793_v26  ;;  %4958 = vadd.xlane.f32.xlu0 %v4957_v63  ;;  %v4963_v58 = vsel %vm120_vm1, %v11040_v61, 0.0 }
 0x791   :  { %4967 = vadd.xlane.f32.xlu1 %v4966_v48  ;;  %8729 = vpow2.f32 %v4791_v57 }
 0x792   :  { %v11042_v20 = vpop.eup %8719 }
 0x793   :  { %11934 = vst [vmem:[#allocation114_spill] sm:$0xff] %v11042_v20  ;;  %v4972_v15 = vsel %vm120_vm1, %v11042_v20, 0.0  ;;  %v11048_v7 = vpop.eup %8721 }
 0x794   :  { %11935 = vst [vmem:[#allocation113_spill] sm:$0xff] %v11048_v7  ;;  %4964 = vadd.xlane.f32.xlu0 %v4963_v58  ;;  %v4969_v54 = vsel %vm120_vm1, %v11048_v7, 0.0  ;;  %v11940_v58 = vld [vmem:[#allocation80_spill] sm:$0xff] }
 0x795   :  { %4973 = vadd.xlane.f32.xlu1 %v4972_v15 }
 0x796   :  { %v11050_v17 = vpop.eup %8723 }
 0x797   :  { %11936 = vst [vmem:[#allocation69_spill] sm:$0xff] %v11050_v17  ;;  %v4978_v0 = vsel %vm120_vm1, %v11050_v17, 0.0  ;;  %v11056_v24 = vpop.eup %8725 }
 0x798   :  { %11937 = vst [vmem:[#allocation72_spill] sm:$0xff] %v11056_v24  ;;  %4970 = vadd.xlane.f32.xlu0 %v4969_v54  ;;  %v4975_v26 = vsel %vm120_vm1, %v11056_v24, 0.0  ;;  %v11941_v54 = vld [vmem:[#allocation93_spill] sm:$0xff] }
 0x799   :  { %4979 = vadd.xlane.f32.xlu1 %v4978_v0 }
 0x79a   :  { %v11058_v19 = vpop.eup %8727 }
 0x79b   :  { %11938 = vst [vmem:[#allocation18_spill] sm:$0xff] %v11058_v19  ;;  %v4984_v10 = vsel %vm120_vm1, %v11058_v19, 0.0  ;;  %v11064_v57 = vpop.eup %8729 }
 0x79c   :  { %11939 = vst [vmem:[#allocation21_spill] sm:$0xff] %v11064_v57  ;;  %4976 = vadd.xlane.f32.xlu0 %v4975_v26  ;;  %v4981_v48 = vsel %vm120_vm1, %v11064_v57, 0.0 }
 0x79d   :  { %4985 = vadd.xlane.f32.xlu1 %v4984_v10 }
 0x7a0   :  { %4982 = vadd.xlane.f32.xlu0 %v4981_v48 }
 0x7ac   :  { %v4800_v63 = vpop.xlane.xlu1 %4799 }
 0x7ad   :  { %8731 = vrcp.f32 %v4800_v63  ;;  %v4797_v15 = vpop.xlane.xlu0 %4796 }
 0x7ae   :  { %5605 = vrot.lane.b32.xlu1 %v11940_v58, %s8910_s25  ;;  %8733 = vrcp.f32 %v4797_v15 }
 0x7b1   :  { %v4806_v0 = vpop.xlane.xlu1 %4805 }
 0x7b2   :  { %8735 = vrcp.f32 %v4806_v0  ;;  %5703 = vrot.lane.b32.xlu1 %v11941_v54, %s8910_s25  ;;  %v4803_v19 = vpop.xlane.xlu0 %4802  ;;  %v11943_v0 = vld [vmem:[#allocation103_spill] sm:$0xff] }
 0x7b3   :  { %8737 = vrcp.f32 %v4803_v19 }
 0x7b5   :  { %v4812_v26 = vpop.xlane.xlu1 %4811 }
 0x7b6   :  { %v4809_v10 = vpop.xlane.xlu0 %4808  ;;  %5507 = vrot.lane.b32.xlu0 %v11942_v59, %s8910_s25  ;;  %8739 = vrcp.f32 %v4812_v26 }
 0x7b7   :  { %v8732_v48 = vpop.eup %8731  ;;  %8741 = vrcp.f32 %v4809_v10 }
 0x7b8   :  { %v8734_v57 = vpop.eup %8733  ;;  %v5052_v63 = vmul.f32 %v8732_v48, %v10756_v1 }
 0x7b9   :  { %v5051_v17 = vmul.f32 %v8734_v57, %v10758_v46  ;;  %v4818_v15 = vpop.xlane.xlu1 %4817 }
 0x7ba   :  { %v4815_v58 = vpop.xlane.xlu0 %4814  ;;  %5801 = vrot.lane.b32.xlu0 %v11943_v0, %s8910_s25 }
 0x7bb   :  { %v8094_v54 = vpack.c.bf16 %v5052_v63, %v5051_v17 }
 0x7bc   :  { %v8736_v19 = vpop.eup %8735 }
 0x7bd   :  { %v8738_v24 = vpop.eup %8737  ;;  %v4824_v20 = vpop.xlane.xlu1 %4823  ;;  %8096 = vmatpush3.bf16.xpose.msk.msra.mxu0 %vm10000_vm4, %v8094_v54  ;;  %v5054_v1 = vmul.f32 %v8736_v19, %v10766_v6 }
 0x7be   :  { %8743 = vrcp.f32 %v4824_v20  ;;  %v4821_v59 = vpop.xlane.xlu0 %4820  ;;  %8097 = vmatprep.subr.bf16.mxu0 %v11945_v36  ;;  %v5053_v46 = vmul.f32 %v8738_v24, %v10768_v47 }
 0x7bf   :  { %8745 = vrcp.f32 %v4821_v59 }
 0x7c0   :  { %8747 = vrcp.f32 %v4818_v15  ;;  %v8740_v17 = vpop.eup %8739  ;;  %v8098_v10 = vpack.c.bf16 %v5054_v1, %v5053_v46 }
 0x7c1   :  { %v4848_v57 = vpop.xlane.xlu1 %4847  ;;  %8749 = vrcp.f32 %v4815_v58  ;;  %v8742_v48 = vpop.eup %8741  ;;  %v5056_v6 = vmul.f32 %v8740_v17, %v10776_v39 }
 0x7c2   :  { %v4845_v26 = vpop.xlane.xlu0 %4844  ;;  %v5055_v47 = vmul.f32 %v8742_v48, %v10778_v27 }
 0x7c4   :  { %v8102_v1 = vpack.c.bf16 %v5056_v6, %v5055_v47 }
 0x7c5   :  { %v4830_v63 = vpop.xlane.xlu1 %4829  ;;  %8100 = vmatpush3.bf16.xpose.msk.msra.mxu0 %vm10000_vm4, %v8098_v10 }
 0x7c6   :  { %8751 = vrcp.f32 %v4830_v63  ;;  %v4827_v20 = vpop.xlane.xlu0 %4826  ;;  %8101 = vmatprep.subr.bf16.mxu0 %v11945_v36 }
 0x7c7   :  { %8753 = vrcp.f32 %v4827_v20 }
 0x7c8   :  { %v8744_v24 = vpop.eup %8743  ;;  %8755 = vrcp.f32 %v4848_v57 }
 0x7c9   :  { %v8746_v15 = vpop.eup %8745  ;;  %v5060_v58 = vmul.f32 %v8744_v24, %v10796_v14  ;;  %v4854_v0 = vpop.xlane.xlu1 %4853  ;;  %8757 = vrcp.f32 %v4845_v26 }
 0x7ca   :  { %v5059_v54 = vmul.f32 %v8746_v15, %v10798_v37  ;;  %v4851_v19 = vpop.xlane.xlu0 %4850  ;;  %v8748_v59 = vpop.eup %8747 }
 0x7cb   :  { %v8750_v46 = vpop.eup %8749  ;;  %v5058_v27 = vmul.f32 %v8748_v59, %v10786_v22 }
 0x7cc   :  { %v8110_v10 = vpack.c.bf16 %v5060_v58, %v5059_v54  ;;  %v5057_v14 = vmul.f32 %v8750_v46, %v10788_v60 }
 0x7cd   :  { %v4836_v63 = vpop.xlane.xlu1 %4835  ;;  %8104 = vmatpush3.bf16.xpose.msk.msra.mxu0 %vm10000_vm4, %v8102_v1 }
 0x7ce   :  { %8759 = vrcp.f32 %v4836_v63  ;;  %8112 = vmatpush3.bf16.xpose.msk.msra.mxu1 %vm10000_vm4, %v8110_v10  ;;  %v4833_v39 = vpop.xlane.xlu0 %4832  ;;  %8105 = vmatprep.subr.bf16.mxu0 %v11945_v36  ;;  %v8106_v47 = vpack.c.bf16 %v5058_v27, %v5057_v14  ;;  %v11946_v63 = vld [vmem:[#allocation75_spill] sm:$0xff]  ;;  %v11947_v27 = vmov 0.0  }
 0x7cf   :  { %8761 = vrcp.f32 %v4833_v39  ;;  %8113 = vmatprep.subr.bf16.mxu1 %v11945_v36 }
 0x7d0   :  { %v8752_v37 = vpop.eup %8751  ;;  %8763 = vrcp.f32 %v4854_v0 }
 0x7d1   :  { %v8754_v57 = vpop.eup %8753  ;;  %v5062_v26 = vmul.f32 %v8752_v37, %v10816_v34  ;;  %v4860_v17 = vpop.xlane.xlu1 %4859  ;;  %8765 = vrcp.f32 %v4851_v19 }
 0x7d2   :  { %v5061_v48 = vmul.f32 %v8754_v57, %v10818_v16  ;;  %v4857_v20 = vpop.xlane.xlu0 %4856  ;;  %v8756_v6 = vpop.eup %8755 }
 0x7d3   :  { %v8758_v24 = vpop.eup %8757  ;;  %v5068_v34 = vmul.f32 %v8756_v6, %v10806_v4 }
 0x7d4   :  { %v8114_v15 = vpack.c.bf16 %v5062_v26, %v5061_v48  ;;  %v5067_v16 = vmul.f32 %v8758_v24, %v10808_v3 }
 0x7d5   :  { %v4842_v22 = vpop.xlane.xlu1 %4841  ;;  %8108 = vmatpush3.bf16.xpose.msk.msra.mxu0 %vm10000_vm4, %v8106_v47 }
 0x7d6   :  { %8767 = vrcp.f32 %v4842_v22  ;;  %8116 = vmatpush3.bf16.xpose.msk.msra.mxu1 %vm10000_vm4, %v8114_v15  ;;  %v4839_v60 = vpop.xlane.xlu0 %4838  ;;  %8125 = vmatprep.subr.bf16.mxu0 %v11945_v36  ;;  %v8126_v46 = vpack.c.bf16 %v5068_v34, %v5067_v16 }
 0x7d7   :  { %8769 = vrcp.f32 %v4839_v60  ;;  %8117 = vmatprep.subr.bf16.mxu1 %v11945_v36 }
 0x7d8   :  { %v8760_v58 = vpop.eup %8759  ;;  %8771 = vrcp.f32 %v4860_v17 }
 0x7d9   :  { %v8762_v0 = vpop.eup %8761  ;;  %v5064_v54 = vmul.f32 %v8760_v58, %v10836_v23  ;;  %v4866_v19 = vpop.xlane.xlu1 %4865  ;;  %8773 = vrcp.f32 %v4857_v20  ;;  %v11948_v58 = vld [vmem:[#allocation107_spill] sm:$0xff] }
 0x7da   :  { %v5063_v59 = vmul.f32 %v8762_v0, %v10838_v18  ;;  %v8764_v1 = vpop.eup %8763  ;;  %v4863_v3 = vpop.xlane.xlu0 %4862  ;;  %8775 = vrcp.f32 %v4866_v19 }
 0x7db   :  { %v8766_v10 = vpop.eup %8765  ;;  %v5070_v23 = vmul.f32 %v8764_v1, %v10826_v5  ;;  %8777 = vrcp.f32 %v4863_v3 }
 0x7dc   :  { %7730 = vmatmul.mubr.msk.f32.vlgmr.msra.gmra.mrb[80].mxu0 %vm120_vm1, %v11946_v63  ;;  %v8118_v4 = vpack.c.bf16 %v5064_v54, %v5063_v59  ;;  %v5069_v18 = vmul.f32 %v8766_v10, %v10828_v35 }
 0x7dd   :  { %v4872_v39 = vpop.xlane.xlu1 %4871  ;;  %8128 = vmatpush3.bf16.xpose.msk.msra.mxu0 %vm10000_vm4, %v8126_v46  ;;  %7767 = vmatprep.mubr.msk.f32.mxu0 %vm8914_vm3, %v11947_v27 }
 0x7de   :  { %8120 = vmatpush3.bf16.xpose.msk.msra.mxu1 %vm10000_vm4, %v8118_v4  ;;  %8129 = vmatprep.subr.bf16.mxu0 %v11945_v36  ;;  %v8130_v6 = vpack.c.bf16 %v5070_v23, %v5069_v18  ;;  %8779 = vrcp.f32 %v4872_v39 }
 0x7df   :  { %8121 = vmatprep.subr.bf16.mxu1 %v11945_v36 }
 0x7e0   :  { %v8768_v14 = vpop.eup %8767 }
 0x7e1   :  { %v8770_v37 = vpop.eup %8769  ;;  %v5066_v57 = vmul.f32 %v8768_v14, %v10856_v56  ;;  %v4896_v26 = vpop.xlane.xlu0 %4895 }
 0x7e2   :  { %v5065_v17 = vmul.f32 %v8770_v37, %v10858_v13  ;;  %v4893_v48 = vpop.xlane.xlu1 %4892  ;;  %v8772_v20 = vpop.eup %8771 }
 0x7e3   :  { %v8774_v47 = vpop.eup %8773  ;;  %v5072_v56 = vmul.f32 %v8772_v20, %v10845_v12 }
 0x7e4   :  { %v8122_v24 = vpack.c.bf16 %v5066_v57, %v5065_v17  ;;  %v5071_v13 = vmul.f32 %v8774_v47, %v10848_v55  ;;  %v8776_v60 = vpop.eup %8775  ;;  %v11949_v57 = vld [vmem:[#allocation77_spill] sm:$0xff] }
 0x7e5   :  { %8132 = vmatpush3.bf16.xpose.msk.msra.mxu0 %vm10000_vm4, %v8130_v6  ;;  %v4869_v5 = vpop.xlane.xlu0 %4868  ;;  %v8778_v16 = vpop.eup %8777  ;;  %v5074_v54 = vmul.f32 %v8776_v60, %v10866_v21 }
 0x7e6   :  { %v4878_v35 = vpop.xlane.xlu1 %4877  ;;  %8124 = vmatpush3.bf16.xpose.msk.msra.mxu1 %vm10000_vm4, %v8122_v24  ;;  %8781 = vrcp.f32 %v4869_v5  ;;  %8133 = vmatprep.subr.bf16.mxu0 %v11945_v36  ;;  %v8134_v34 = vpack.c.bf16 %v5072_v56, %v5071_v13  ;;  %v5073_v19 = vmul.f32 %v8778_v16, %v10868_v44  ;;  %v11950_v5 = vld [vmem:[#allocation106_spill] sm:$0xff] }
 0x7e7   :  { %8141 = vmatprep.subr.bf16.mxu1 %v11945_v36  ;;  %8783 = vrcp.f32 %v4896_v26 }
 0x7e8   :  { %8785 = vrcp.f32 %v4893_v48  ;;  %v8780_v0 = vpop.eup %8779  ;;  %v8138_v39 = vpack.c.bf16 %v5074_v54, %v5073_v19  ;;  %v11951_v19 = vld [vmem:[#allocation70_spill] sm:$0xff] }
 0x7e9   :  { %v4875_v15 = vpop.xlane.xlu0 %4874  ;;  %v5076_v1 = vmul.f32 %v8780_v0, %v10876_v33 }
 0x7ea   :  { %v4902_v22 = vpop.xlane.xlu1 %4901  ;;  %8787 = vrcp.f32 %v4875_v15 }
 0x7eb   :  { %8789 = vrcp.f32 %v4878_v35 }
 0x7ed   :  { %7749 = vmatmul.mubr.msk.f32.vlgmr.msra.gmra.mrb[88].mxu1 %vm120_vm1, %v11948_v58  ;;  %8136 = vmatpush3.bf16.xpose.msk.msra.mxu0 %vm10000_vm4, %v8134_v34  ;;  %v4899_v12 = vpop.xlane.xlu0 %4898 }
 0x7ee   :  { %v4884_v55 = vpop.xlane.xlu1 %4883  ;;  %8137 = vmatprep.subr.bf16.mxu0 %v11945_v36  ;;  %7786 = vmatprep.mubr.msk.f32.mxu1 %vm8914_vm3, %v11947_v27  ;;  %8791 = vrcp.f32 %v4899_v12 }
 0x7f0   :  { %v8782_v59 = vpop.eup %8781 }
 0x7f1   :  { %v5075_v46 = vmul.f32 %v8782_v59, %v10888_v28  ;;  %v4881_v10 = vpop.xlane.xlu0 %4880  ;;  %v8784_v63 = vpop.eup %8783 }
 0x7f2   :  { %v4908_v4 = vpop.xlane.xlu1 %4907  ;;  %8793 = vrcp.f32 %v4881_v10  ;;  %v8786_v3 = vpop.eup %8785  ;;  %v5084_v14 = vmul.f32 %v8784_v63, %v10882_v38 }
 0x7f3   :  { %8795 = vrcp.f32 %v4902_v22  ;;  %v8142_v23 = vpack.c.bf16 %v5076_v1, %v5075_v46  ;;  %v5083_v28 = vmul.f32 %v8786_v3, %v10884_v29 }
 0x7f4   :  { %v8788_v18 = vpop.eup %8787  ;;  %8797 = vrcp.f32 %v4884_v55 }
 0x7f5   :  { %8140 = vmatpush3.bf16.xpose.msk.msra.mxu0 %vm10000_vm4, %v8138_v39  ;;  %8144 = vmatpush3.bf16.xpose.msk.msra.mxu1 %vm10000_vm4, %v8142_v23  ;;  %v4905_v21 = vpop.xlane.xlu0 %4904  ;;  %v8790_v44 = vpop.eup %8789  ;;  %v5077_v37 = vmul.f32 %v8788_v18, %v10900_v51  ;;  %v8158_v47 = vpack.c.bf16 %v5084_v14, %v5083_v28 }
 0x7f6   :  { %v4890_v33 = vpop.xlane.xlu1 %4889  ;;  %8145 = vmatprep.subr.bf16.mxu1 %v11945_v36  ;;  %8157 = vmatprep.subr.bf16.mxu0 %v11945_v36  ;;  %v5078_v26 = vmul.f32 %v8790_v44, %v11949_v57  ;;  %8799 = vrcp.f32 %v4905_v21 }
 0x7f8   :  { %v8792_v20 = vpop.eup %8791  ;;  %v8146_v6 = vpack.c.bf16 %v5078_v26, %v5077_v37 }
 0x7f9   :  { %v4887_v17 = vpop.xlane.xlu0 %4886  ;;  %v5085_v56 = vmul.f32 %v8792_v20, %v10910_v53 }
 0x7fa   :  { %v4914_v48 = vpop.xlane.xlu1 %4913  ;;  %8801 = vrcp.f32 %v4887_v17  ;;  %v11952_v17 = vld [vmem:[#allocation78_spill] sm:$0xff] }
 0x7fb   :  { %8803 = vrcp.f32 %v4908_v4 }
 0x7fc   :  { %v8794_v24 = vpop.eup %8793  ;;  %8805 = vrcp.f32 %v4890_v33  ;;  %7768 = vmatmul.mubr.msk.f32.vlgmr.msra.gmra.mrb[82].mxu0 %vm120_vm1, %v11950_v5 }
 0x7fd   :  { %v8796_v29 = vpop.eup %8795  ;;  %8148 = vmatpush3.bf16.xpose.msk.msra.mxu1 %vm10000_vm4, %v8146_v6  ;;  %8160 = vmatpush3.bf16.xpose.msk.msra.mxu0 %vm10000_vm4, %v8158_v47  ;;  %v4911_v38 = vpop.xlane.xlu0 %4910  ;;  %v5079_v13 = vmul.f32 %v8794_v24, %v10920_v31 }
 0x7fe   :  { %v8798_v51 = vpop.eup %8797  ;;  %v4920_v35 = vpop.xlane.xlu1 %4919  ;;  %8149 = vmatprep.subr.bf16.mxu1 %v11945_v36  ;;  %8161 = vmatprep.subr.bf16.mxu0 %v11945_v36  ;;  %v5086_v15 = vmul.f32 %v8796_v29, %v10904_v32  ;;  %8807 = vrcp.f32 %v4911_v38 }
 0x7ff   :  { %7805 = vmatprep.mubr.msk.f32.mxu0 %vm8914_vm3, %v11947_v27  ;;  %v5080_v22 = vmul.f32 %v8798_v51, %v10914_v2  ;;  %8809 = vrcp.f32 %v4914_v48 }
 0x800   :  { %v8800_v16 = vpop.eup %8799  ;;  %v8162_v12 = vpack.c.bf16 %v5086_v15, %v5085_v56  ;;  %8811 = vrcp.f32 %v4920_v35 }
 0x801   :  { %v11167_v60 = vpop.xlane.xlu0 %4943  ;;  %v8150_v58 = vpack.c.bf16 %v5080_v22, %v5079_v13  ;;  %v5087_v55 = vmul.f32 %v8800_v16, %v10930_v30 }
 0x802   :  { %v11169_v34 = vpop.xlane.xlu1 %4940 }
 0x804   :  { %v8802_v0 = vpop.eup %8801 }
 0x805   :  { %v8804_v53 = vpop.eup %8803  ;;  %8152 = vmatpush3.bf16.xpose.msk.msra.mxu1 %vm10000_vm4, %v8150_v58  ;;  %8164 = vmatpush3.bf16.xpose.msk.msra.mxu0 %vm10000_vm4, %v8162_v12  ;;  %v4917_v32 = vpop.xlane.xlu0 %4916  ;;  %v5081_v54 = vmul.f32 %v8802_v0, %v10940_v62 }
 0x806   :  { %v8806_v2 = vpop.eup %8805  ;;  %v4926_v31 = vpop.xlane.xlu1 %4925  ;;  %8813 = vrcp.f32 %v4917_v32  ;;  %8153 = vmatprep.subr.bf16.mxu1 %v11945_v36  ;;  %8165 = vmatprep.subr.bf16.mxu0 %v11945_v36  ;;  %v5088_v59 = vmul.f32 %v8804_v53, %v11951_v19  ;;  %v11953_v32 = vld [vmem:[#allocation108_spill] sm:$0xff] }
 0x807   :  { %v5082_v1 = vmul.f32 %v8806_v2, %v10934_v41 }
 0x808   :  { %v8166_v4 = vpack.c.bf16 %v5088_v59, %v5087_v55  ;;  %v8808_v3 = vpop.eup %8807 }
 0x809   :  { %v4923_v46 = vpop.xlane.xlu0 %4922  ;;  %v8154_v63 = vpack.c.bf16 %v5082_v1, %v5081_v54  ;;  %v8810_v39 = vpop.eup %8809  ;;  %v5089_v41 = vmul.f32 %v8808_v3, %v10950_v52  ;;  %v11954_v54 = vld [vmem:[#allocation111_spill] sm:$0xff] }
 0x80a   :  { %v11181_v10 = vpop.xlane.xlu1 %4949  ;;  %8815 = vrcp.f32 %v4923_v46  ;;  %v8812_v62 = vpop.eup %8811  ;;  %v5090_v21 = vmul.f32 %v8810_v39, %v10944_v43 }
 0x80b   :  { %8817 = vrcp.f32 %v4926_v31  ;;  %v5092_v44 = vmul.f32 %v8812_v62, %v10954_v9 }
 0x80c   :  { %v8170_v37 = vpack.c.bf16 %v5090_v21, %v5089_v41 }
 0x80d   :  { %8156 = vmatpush3.bf16.xpose.msk.msra.mxu1 %vm10000_vm4, %v8154_v63  ;;  %8168 = vmatpush3.bf16.xpose.msk.msra.mxu0 %vm10000_vm4, %v8166_v4  ;;  %v4947_v30 = vpop.xlane.xlu0 %4946  ;;  %v11955_v4 = vld [vmem:[#allocation110_spill] sm:$0xff] }
 0x80e   :  { %v4932_v23 = vpop.xlane.xlu1 %4931  ;;  %8169 = vmatprep.subr.bf16.mxu0 %v11945_v36  ;;  %8173 = vmatprep.subr.bf16.mxu1 %v11945_v36 }
 0x810   :  { %v8814_v18 = vpop.eup %8813 }
 0x811   :  { %v5091_v33 = vmul.f32 %v8814_v18, %v10968_v42  ;;  %v4929_v28 = vpop.xlane.xlu0 %4928  ;;  %v11958_v18 = vld [vmem:[#allocation114_spill] sm:$0xff] }
 0x812   :  { %v4956_v14 = vpop.xlane.xlu1 %4955  ;;  %8819 = vrcp.f32 %v4929_v28 }
 0x813   :  { %v8174_v57 = vpack.c.bf16 %v5092_v44, %v5091_v33  ;;  %8821 = vrcp.f32 %v4932_v23  ;;  %v11957_v23 = vld [vmem:[#allocation113_spill] sm:$0xff] }
 0x814   :  { %v8816_v26 = vpop.eup %8815  ;;  %7787 = vmatmul.mubr.msk.f32.vlgmr.msra.gmra.mrb[90].mxu1 %vm120_vm1, %v11952_v17  ;;  %v11960_v17 = vld [vmem:[#allocation79_spill] sm:$0xff] }
 0x815   :  { %8172 = vmatpush3.bf16.xpose.msk.msra.mxu0 %vm10000_vm4, %v8170_v37  ;;  %8176 = vmatpush3.bf16.xpose.msk.msra.mxu1 %vm10000_vm4, %v8174_v57  ;;  %v4953_v43 = vpop.xlane.xlu0 %4952  ;;  %v8818_v52 = vpop.eup %8817  ;;  %v5093_v42 = vmul.f32 %v8816_v26, %v10980_v25  ;;  %v11959_v37 = vld [vmem:[#allocation109_spill] sm:$0xff] }
 0x816   :  { %v4938_v9 = vpop.xlane.xlu1 %4937  ;;  %8177 = vmatprep.subr.bf16.mxu1 %v11945_v36  ;;  %8189 = vmatprep.subr.bf16.mxu0 %v11945_v36  ;;  %v5094_v48 = vmul.f32 %v8818_v52, %v10974_v8  ;;  %v11961_v52 = vld [vmem:[#allocation72_spill] sm:$0xff] }
 0x817   :  { %7824 = vmatprep.mubr.msk.f32.mxu1 %vm8914_vm3, %v11947_v27 }
 0x818   :  { %v8178_v47 = vpack.c.bf16 %v5094_v48, %v5093_v42  ;;  %v11962_v42 = vld [vmem:[#allocation69_spill] sm:$0xff] }
 0x819   :  { %v4935_v20 = vpop.xlane.xlu0 %4934 }
 0x81a   :  { %v11205_v6 = vpop.xlane.xlu1 %4961  ;;  %8823 = vrcp.f32 %v4935_v20 }
 0x81b   :  { %8825 = vrcp.f32 %v4938_v9 }
 0x81c   :  { %v8820_v24 = vpop.eup %8819  ;;  %8827 = vrcp.f32 %v11167_v60 }
 0x81d   :  { %8180 = vmatpush3.bf16.xpose.msk.msra.mxu1 %vm10000_vm4, %v8178_v47  ;;  %v4959_v5 = vpop.xlane.xlu0 %4958  ;;  %v8822_v29 = vpop.eup %8821  ;;  %v5095_v25 = vmul.f32 %v8820_v24, %v11000_v11  ;;  %8829 = vrcp.f32 %v11169_v34 }
 0x81e   :  { %v4968_v38 = vpop.xlane.xlu1 %4967  ;;  %8181 = vmatprep.subr.bf16.mxu1 %v11945_v36  ;;  %v5096_v8 = vmul.f32 %v8822_v29, %v10994_v45  ;;  %v11963_v29 = vld [vmem:[#allocation112_spill] sm:$0xff] }
 0x820   :  { %v8182_v56 = vpack.c.bf16 %v5096_v8, %v5095_v25  ;;  %v11964_v8 = vld [vmem:[#allocation74_spill] sm:$0xff] }
 0x821   :  { %v4965_v51 = vpop.xlane.xlu0 %4964 }
 0x822   :  { %v4974_v35 = vpop.xlane.xlu1 %4973  ;;  %8831 = vrcp.f32 %v4965_v51 }
 0x823   :  { %8833 = vrcp.f32 %v4968_v38 }
 0x824   :  { %v8824_v13 = vpop.eup %8823  ;;  %8835 = vrcp.f32 %v4947_v30  ;;  %v11956_v30 = vld [vmem:[#allocation73_spill] sm:$0xff] }
 0x825   :  { %8184 = vmatpush3.bf16.xpose.msk.msra.mxu1 %vm10000_vm4, %v8182_v56  ;;  %v4971_v15 = vpop.xlane.xlu0 %4970  ;;  %v8826_v22 = vpop.eup %8825  ;;  %v5097_v60 = vmul.f32 %v8824_v13, %v11020_v50  ;;  %8837 = vrcp.f32 %v11181_v10  ;;  %v11966_v13 = vld [vmem:[#allocation18_spill] sm:$0xff] }
 0x826   :  { %8185 = vmatprep.subr.bf16.mxu1 %v11945_v36  ;;  %v4980_v11 = vpop.xlane.xlu1 %4979  ;;  %v8828_v34 = vpop.eup %8827  ;;  %v5098_v45 = vmul.f32 %v8826_v22, %v11014_v49  ;;  %8839 = vrcp.f32 %v4971_v15 }
 0x827   :  { %v8830_v58 = vpop.eup %8829  ;;  %8841 = vrcp.f32 %v4974_v35  ;;  %v5100_v2 = vmul.f32 %v8828_v34, %v11953_v32  ;;  %v11965_v35 = vld [vmem:[#allocation21_spill] sm:$0xff] }
 0x828   :  { %v8186_v12 = vpack.c.bf16 %v5098_v45, %v5097_v60  ;;  %v5099_v53 = vmul.f32 %v8830_v58, %v10964_v40  ;;  %8843 = vrcp.f32 %v4953_v43 }
 0x829   :  { %v4977_v16 = vpop.xlane.xlu0 %4976  ;;  %8845 = vrcp.f32 %v4956_v14 }
 0x82a   :  { %v4986_v31 = vpop.xlane.xlu1 %4985  ;;  %v8190_v1 = vpack.c.bf16 %v5100_v2, %v5099_v53  ;;  %8847 = vrcp.f32 %v4977_v16 }
 0x82b   :  { %8849 = vrcp.f32 %v4980_v11 }
 0x82c   :  { %v8832_v0 = vpop.eup %8831  ;;  %8851 = vrcp.f32 %v4959_v5 }
 0x82d   :  { %8188 = vmatpush3.bf16.xpose.msk.msra.mxu1 %vm10000_vm4, %v8186_v12  ;;  %v4983_v50 = vpop.xlane.xlu0 %4982  ;;  %v8834_v55 = vpop.eup %8833  ;;  %v5107_v49 = vmul.f32 %v8832_v0, %v11040_v61  ;;  %8853 = vrcp.f32 %v11205_v6 }
 0x82e   :  { %8205 = vmatprep.subr.bf16.mxu1 %v11945_v36  ;;  %v5108_v19 = vmul.f32 %v8834_v55, %v11954_v54  ;;  %v8836_v46 = vpop.eup %8835  ;;  %v5606_v10 = vpop.permute.xlu1 %5605  ;;  %8855 = vrcp.f32 %v4983_v50 }
 0x82f   :  { %v8838_v40 = vpop.eup %8837  ;;  %v5101_v3 = vmul.f32 %v8836_v46, %v11955_v4  ;;  %8857 = vrcp.f32 %v4986_v31  ;;  %v11287_v4 = vld [vmem:[%s11547_s5 + $0x8] sm:$0xff] }
 0x830   :  { %v8206_v63 = vpack.c.bf16 %v5108_v19, %v5107_v49  ;;  %v8840_v61 = vpop.eup %8839  ;;  %v5102_v62 = vmul.f32 %v8838_v40, %v11956_v30  ;;  %v47_v19 = vld [vmem:[%s11549_s2] sm:$0xff]  ;;  %v11300_v30 = vld [vmem:[%s11547_s5 + $0x18] sm:$0xff] }
 0x831   :  { %v5508_v59 = vpop.permute.xlu0 %5507  ;;  %v8842_v39 = vpop.eup %8841  ;;  %v5109_v41 = vmul.f32 %v8840_v61, %v11957_v23  ;;  %v11281_v61 = vld [vmem:[%s11547_s5] sm:$0xff] }
 0x832   :  { %7806 = vmatmul.mubr.msk.f32.vlgmr.msra.gmra.mrb[84].mxu0 %vm120_vm1, %v5508_v59  ;;  %v5110_v21 = vmul.f32 %v8842_v39, %v11958_v18  ;;  %v8194_v44 = vpack.c.bf16 %v5102_v62, %v5101_v3  ;;  %v8844_v33 = vpop.eup %8843  ;;  %v5704_v11 = vpop.permute.xlu1 %5703  ;;  %v11293_v3 = vld [vmem:[%s11547_s5 + $0x10] sm:$0xff]  ;;  %v8917_v39 = vmov 4   ;;  %v8918_v18 = vmov 5  }
 0x833   :  { %8192 = vmatpush3.bf16.xpose.msk.msra.mxu0 %vm10000_vm4, %v8190_v1  ;;  %7843 = vmatprep.mubr.msk.f32.mxu0 %vm8914_vm3, %v11947_v27  ;;  %v8846_v28 = vpop.eup %8845  ;;  %v5103_v57 = vmul.f32 %v8844_v33, %v11959_v37  ;;  %v11968_v33 = vld [vmem:[#allocation98_spill] sm:$0xff] }
 0x834   :  { %7825 = vmatmul.mubr.msk.f32.vlgmr.msra.gmra.mrb[92].mxu1 %vm120_vm1, %v5606_v10  ;;  %8193 = vmatprep.subr.bf16.mxu0 %v11945_v36  ;;  %v8848_v14 = vpop.eup %8847  ;;  %v5104_v43 = vmul.f32 %v8846_v28, %v11960_v17 }
 0x835   :  { %8208 = vmatpush3.bf16.xpose.msk.msra.mxu1 %vm10000_vm4, %v8206_v63  ;;  %7862 = vmatprep.mubr.msk.f32.mxu1 %vm8914_vm3, %v11947_v27  ;;  %v8210_v27 = vpack.c.bf16 %v5110_v21, %v5109_v41  ;;  %v8850_v26 = vpop.eup %8849  ;;  %v5111_v9 = vmul.f32 %v8848_v14, %v11961_v52  ;;  %v5802_v34 = vpop.permute.xlu0 %5801  ;;  %v8916_v63 = vmov 6   ;;  %v11967_v21 = vld [vmem:[#allocation92_spill] sm:$0xff] }
 0x836   :  { %8209 = vmatprep.subr.bf16.mxu1 %v11945_v36  ;;  %v5112_v48 = vmul.f32 %v8850_v26, %v11962_v42  ;;  %v8198_v20 = vpack.c.bf16 %v5104_v43, %v5103_v57  ;;  %v8852_v6 = vpop.eup %8851  ;;  %8333 = vset.pattern.permute.xlu1 %v8916_v63  ;;  %v11969_v26 = vld [vmem:[#allocation97_spill] sm:$0xff]  ;;  %v11970_v43 = vld [vmem:[#allocation15_spill] sm:$0xff] }
 0x837   :  { %v8854_v47 = vpop.eup %8853  ;;  %v5105_v38 = vmul.f32 %v8852_v6, %v11963_v29  ;;  %8334 = vset.pattern.permute.xlu0 %v8916_v63  ;;  %v11971_v6 = vld [vmem:[#allocation11_spill] sm:$0xff] }
 0x838   :  { %v8214_v24 = vpack.c.bf16 %v5112_v48, %v5111_v9  ;;  %v8856_v5 = vpop.eup %8855  ;;  %v5106_v51 = vmul.f32 %v8854_v47, %v11964_v8 }
 0x839   :  { %v8858_v25 = vpop.eup %8857  ;;  %v5113_v56 = vmul.f32 %v8856_v5, %v11965_v35 }
 0x83a   :  { %v5114_v15 = vmul.f32 %v8858_v25, %v11966_v13  ;;  %v8202_v22 = vpack.c.bf16 %v5106_v51, %v5105_v38  ;;  %v11973_v51 = vld [vmem:[#allocation16_spill] sm:$0xff] }
 0x83b   :  { %8196 = vmatpush3.bf16.xpose.msk.msra.mxu0 %vm10000_vm4, %v8194_v44 }
 0x83c   :  { %8197 = vmatprep.subr.bf16.mxu0 %v11945_v36  ;;  %v8218_v60 = vpack.c.bf16 %v5114_v15, %v5113_v56  ;;  %v11974_v56 = vld [vmem:[#allocation7_spill] sm:$0xff] }
 0x83d   :  { %8212 = vmatpush3.bf16.xpose.msk.msra.mxu1 %vm10000_vm4, %v8210_v27 }
 0x83e   :  { %8213 = vmatprep.subr.bf16.mxu1 %v11945_v36 }
 0x843   :  { %8200 = vmatpush3.bf16.xpose.msk.msra.mxu0 %vm10000_vm4, %v8198_v20 }
 0x844   :  { %8201 = vmatprep.subr.bf16.mxu0 %v11945_v36 }
 0x845   :  { %8216 = vmatpush3.bf16.xpose.msk.msra.mxu1 %vm10000_vm4, %v8214_v24  ;;  %v11972_v24 = vld [vmem:[#allocation6_spill] sm:$0xff] }
 0x846   :  { %8217 = vmatprep.subr.bf16.mxu1 %v11945_v36 }
 0x84b   :  { %8204 = vmatpush3.bf16.xpose.msk.msra.mxu0 %vm10000_vm4, %v8202_v22  ;;  %v48_v22 = vld [vmem:[%s11549_s2 + $0x8] sm:$0xff] }
 0x84d   :  { %8220 = vmatpush3.bf16.xpose.msk.msra.mxu1 %vm10000_vm4, %v8218_v60  ;;  %v49_v60 = vld [vmem:[%s11549_s2 + $0x10] sm:$0xff] }
 0x852   :  { %7844 = vmatmul.mubr.msk.f32.vlgmr.msra.gmra.mrb[86].mxu0 %vm120_vm1, %v5704_v11  ;;  %v50_v11 = vld [vmem:[%s11549_s2 + $0x18] sm:$0xff] }
 0x853   :  { %7881 = vmatprep.mubr.msk.f32.mxu0 %vm120_vm1, %v47_v19  ;;  %v8904_v19 = vld [vmem:[%s11547_s5 + $0x58] sm:$0xff] }
 0x854   :  { %7863 = vmatmul.mubr.msk.f32.vlgmr.msra.gmra.mrb[94].mxu1 %vm120_vm1, %v5802_v34  ;;  %v51_v34 = vld [vmem:[%s11550_s3] sm:$0xff] }
 0x855   :  { %7895 = vmatprep.mubr.msk.f32.mxu1 %vm320_vm0, %v51_v34 }
 0x8af   :  { %v5209_v36 = vpop.f32.mrb[80].mxu0 }
 0x8b0   :  { %v7731_v45 = vpop.f32.mrb[81].mxu0 }
 0x8b1   :  { %v8897_v45 = vld [vmem:[%s11547_s5 + $0x20] sm:$0xff] }
 0x8c0   :  { %v5307_v16 = vpop.f32.mrb[88].mxu1 }
 0x8c1   :  { %v8313_v58 = vpack.i.bf16 %v5307_v16, %v5209_v36  ;;  %v7750_v12 = vpop.f32.mrb[89].mxu1  ;;  %v8919_v36 = vmov 1   ;;  %v8898_v16 = vld [vmem:[%s11547_s5 + $0x28] sm:$0xff] }
 0x8c2   :  { %v8899_v12 = vld [vmem:[%s11547_s5 + $0x30] sm:$0xff] }
 0x8c3   :  { %8314 = vrot.lane.b32.xlu1 %v8313_v58, %s8910_s25 }
 0x8cf   :  { %v5405_v0 = vpop.f32.mrb[82].mxu0 }
 0x8d0   :  { %v7769_v53 = vpop.f32.mrb[83].mxu0 }
 0x8e7   :  { %v5503_v32 = vpop.f32.mrb[90].mxu1 }
 0x8e8   :  { %v8318_v2 = vpack.i.bf16 %v5503_v32, %v5405_v0  ;;  %v7788_v31 = vpop.f32.mrb[91].mxu1  ;;  %v8900_v0 = vld [vmem:[%s11547_s5 + $0x38] sm:$0xff] }
 0x8e9   :  { %v8902_v31 = vld [vmem:[%s11547_s5 + $0x48] sm:$0xff] }
 0x8ea   :  { %8319 = vrot.lane.b32.xlu0 %v8318_v2, %s8910_s25  ;;  %v8901_v2 = vld [vmem:[%s11547_s5 + $0x40] sm:$0xff] }
 0x905   :  { %v5601_v7 = vpop.f32.mrb[84].mxu0 }
 0x906   :  { %v7807_v50 = vpop.f32.mrb[85].mxu0 }
 0x907   :  { %v5699_v55 = vpop.f32.mrb[92].mxu1 }
 0x908   :  { %v8323_v49 = vpack.i.bf16 %v5699_v55, %v5601_v7  ;;  %v7826_v54 = vpop.f32.mrb[93].mxu1 }
 0x909   :  { %v8903_v54 = vld [vmem:[%s11547_s5 + $0x50] sm:$0xff] }
 0x90a   :  { %8324 = vrot.lane.b32.xlu1 %v8323_v49, %s8910_s25 }
 0x90e   :  { %5940 = vperm.xlu1 %8333, %v11281_v61  }
 0x912   :  { %5948 = vperm.xlu1 %8333, %v11293_v3  }
 0x916   :  { %5952 = vperm.xlu1 %8333, %v11300_v30  }
 0x91a   :  { %8336 = vset.pattern.permute.xlu1 %v8917_v39 }
 0x91b   :  { %6095 = vperm.xlu1 %8336, %v11287_v4  }
 0x91f   :  { %8337 = vset.pattern.permute.xlu1 %v8918_v18 }
 0x920   :  { %6111 = vperm.xlu1 %8337, %v11281_v61  }
 0x924   :  { %8339 = vset.pattern.permute.xlu1 %v8917_v39 }
 0x925   :  { %v5797_v59 = vpop.f32.mrb[86].mxu0  ;;  %6099 = vperm.xlu1 %8339, %v11293_v3  }
 0x926   :  { %v7845_v1 = vpop.f32.mrb[87].mxu0 }
 0x927   :  { %v5895_v46 = vpop.f32.mrb[94].mxu1 }
 0x928   :  { %v8328_v40 = vpack.i.bf16 %v5895_v46, %v5797_v59  ;;  %v7864_v10 = vpop.f32.mrb[95].mxu1  ;;  %v11975_v59 = vld [vmem:[#allocation3_spill] sm:$0xff]  ;;  %v11976_v46 = vld [vmem:[#allocation2_spill] sm:$0xff] }
 0x929   :  { %6103 = vperm.xlu1 %8339, %v11300_v30  }
 0x92a   :  { %8329 = vrot.lane.b32.xlu0 %v8328_v40, %s8910_s25 }
 0x92d   :  { %8340 = vset.pattern.permute.xlu1 %v8918_v18 }
 0x92e   :  { %5944 = vperm.xlu0 %8334, %v11287_v4   ;;  %6123 = vperm.xlu1 %8340, %v11300_v30  }
 0x932   :  { %8335 = vset.pattern.permute.xlu0 %v8917_v39  ;;  %8342 = vset.pattern.permute.xlu1 %v8919_v36 }
 0x933   :  { %6091 = vperm.xlu0 %8335, %v11281_v61   ;;  %6135 = vperm.xlu1 %8342, %v11287_v4  }
 0x935   :  { %v8315_v62 = vpop.permute.xlu1 %8314 }
 0x936   :  { %v8317_v23 = vunpack.i.h.bf16 %v8315_v62  ;;  %v8316_v41 = vunpack.i.l.bf16 %v8315_v62 }
 0x937   :  { %8338 = vset.pattern.permute.xlu0 %v8918_v18  ;;  %6139 = vperm.xlu1 %8342, %v11293_v3   ;;  %v8906_v18 = vld [vmem:[%s11547_s5 + $0x68] sm:$0xff] }
 0x938   :  { %v5931_v44 = vsel %vm120_vm1, %v11967_v21, %v8316_v41  ;;  %v5932_v28 = vsel %vm120_vm1, %v11968_v33, %v8317_v23  ;;  %6115 = vperm.xlu0 %8338, %v11287_v4   ;;  %v8905_v41 = vld [vmem:[%s11547_s5 + $0x60] sm:$0xff] }
 0x939   :  { %v8221_v27 = vpack.c.bf16 %v5932_v28, %v5931_v44  ;;  %v11977_v44 = vld [vmem:[#allocation4_spill] sm:$0xff]  ;;  %v11978_v28 = vld [vmem:[#allocation5_spill] sm:$0xff] }
 0x93b   :  { %8222 = vmatprep.subr.bf16.mxu0 %v8221_v27  ;;  %6147 = vperm.xlu1 %8342, %v8897_v45  }
 0x93c   :  { %8224 = vmatpush3.bf16.msra.mxu0 %v8221_v27  ;;  %6119 = vperm.xlu0 %8338, %v11293_v3  }
 0x93f   :  { %6155 = vperm.xlu1 %8342, %v8899_v12  }
 0x940   :  { %8341 = vset.pattern.permute.xlu0 %v8919_v36 }
 0x941   :  { %6131 = vperm.xlu0 %8341, %v11281_v61  }
 0x943   :  { %6163 = vperm.xlu1 %8342, %v8901_v2  }
 0x945   :  { %6143 = vperm.xlu0 %8341, %v11300_v30  }
 0x947   :  { %6171 = vperm.xlu1 %8342, %v8903_v54  }
 0x949   :  { %6151 = vperm.xlu0 %8341, %v8898_v16  }
 0x94b   :  { %6179 = vperm.xlu1 %8342, %v8905_v41  }
 0x94d   :  { %6159 = vperm.xlu0 %8341, %v8900_v0  }
 0x951   :  { %6167 = vperm.xlu0 %8341, %v8902_v31  }
 0x955   :  { %6175 = vperm.xlu0 %8341, %v8904_v19  }
 0x959   :  { %6183 = vperm.xlu0 %8341, %v8906_v18  }
 0x95c   :  { %v8320_v14 = vpop.permute.xlu0 %8319 }
 0x95d   :  { %v8322_v37 = vunpack.i.h.bf16 %v8320_v14  ;;  %v8321_v57 = vunpack.i.l.bf16 %v8320_v14 }
 0x95f   :  { %v5933_v17 = vsel %vm120_vm1, %v11969_v26, %v8321_v57  ;;  %v5934_v52 = vsel %vm120_vm1, %v11970_v43, %v8322_v37  ;;  %v8907_v37 = vld [vmem:[%s11547_s5 + $0x70] sm:$0xff]  ;;  %v8908_v57 = vld [vmem:[%s11547_s5 + $0x78] sm:$0xff] }
 0x960   :  { %v8225_v9 = vpack.c.bf16 %v5934_v52, %v5933_v17  ;;  %6187 = vperm.xlu1 %8342, %v8907_v37   ;;  %6191 = vperm.xlu0 %8341, %v8908_v57   ;;  %v56_v37 = vld [vmem:[%s11550_s3 + $0x28] sm:$0xff]  ;;  %v57_v57 = vld [vmem:[%s11550_s3 + $0x30] sm:$0xff] }
 0x962   :  { %8226 = vmatprep.subr.bf16.mxu0 %v8225_v9 }
 0x963   :  { %8228 = vmatpush3.bf16.msra.mxu0 %v8225_v9 }
 0x97c   :  { %v8325_v42 = vpop.permute.xlu1 %8324 }
 0x97d   :  { %v8327_v48 = vunpack.i.h.bf16 %v8325_v42  ;;  %v8326_v20 = vunpack.i.l.bf16 %v8325_v42 }
 0x97f   :  { %v5935_v47 = vsel %vm120_vm1, %v11971_v6, %v8326_v20  ;;  %v5936_v5 = vsel %vm120_vm1, %v11972_v24, %v8327_v48 }
 0x980   :  { %v8229_v29 = vpack.c.bf16 %v5936_v5, %v5935_v47 }
 0x982   :  { %8230 = vmatprep.subr.bf16.mxu0 %v8229_v29 }
 0x983   :  { %8232 = vmatpush3.bf16.msra.mxu0 %v8229_v29 }
 0x98d   :  { %v5941_v58 = vpop.permute.xlu1 %5940 }
 0x991   :  { %v5949_v32 = vpop.permute.xlu1 %5948 }
 0x995   :  { %v5953_v63 = vpop.permute.xlu1 %5952 }
 0x99c   :  { %v8330_v38 = vpop.permute.xlu0 %8329 }
 0x99d   :  { %v8332_v25 = vunpack.i.h.bf16 %v8330_v38  ;;  %v8331_v8 = vunpack.i.l.bf16 %v8330_v38 }
 0x99f   :  { %v5937_v35 = vsel %vm120_vm1, %v11973_v51, %v8331_v8  ;;  %v5938_v13 = vsel %vm120_vm1, %v11974_v56, %v8332_v25 }
 0x9a0   :  { %v8233_v15 = vpack.c.bf16 %v5938_v13, %v5937_v35 }
 0x9a2   :  { %8234 = vmatprep.subr.bf16.mxu0 %v8233_v15 }
 0x9a3   :  { %8236 = vmatpush3.bf16.msra.mxu0 %v8233_v15 }
 0x9a6   :  { %7882 = vmatmul.mubr.msk.f32.vlgmr.msra.gmra.mrb[88].mxu0 %vm120_vm1, %v48_v22  ;;  %v6096_v22 = vpop.permute.xlu1 %6095 }
 0x9a7   :  { %7884 = vmatprep.mubr.msk.f32.mxu0 %vm120_vm1, %v49_v60 }
 0x9aa   :  { %7885 = vmatmul.mubr.msk.f32.gmra.mrb[90].mxu0 %vm120_vm1, %v50_v11  ;;  %v6112_v45 = vpop.permute.xlu1 %6111 }
 0x9ad   :  { %v5945_v53 = vpop.permute.xlu0 %5944 }
 0x9ae   :  { %v6100_v12 = vpop.permute.xlu1 %6099 }
 0x9b2   :  { %v6092_v0 = vpop.permute.xlu0 %6091 }
 0xa79   :  { %v7883_v7 = vpop.f32.mrb[88].mxu0 }
 0xa7a   :  { %v6039_v50 = vadd.f32 %v7883_v7, %v5945_v53  ;;  %v6033_v55 = vpop.f32.mrb[89].mxu0  ;;  %v6104_v53 = vpop.permute.xlu1 %6103 }
 0xa7b   :  { %v6034_v49 = vadd.f32 %v6033_v55, %v5941_v58 }
 0xa7c   :  { %v11371_v1 = vadd.f32 %v6039_v50, %v11975_v59 }
 0xa7d   :  { %v11374_v40 = vadd.f32 %v6034_v49, %v11976_v46  ;;  %v7886_v10 = vpop.f32.mrb[90].mxu0 }
 0xa7e   :  { %v6043_v39 = vpop.f32.mrb[91].mxu0  ;;  %v6049_v62 = vadd.f32 %v7886_v10, %v5953_v63  ;;  %v6124_v49 = vpop.permute.xlu1 %6123 }
 0xa7f   :  { %v6044_v23 = vadd.f32 %v6043_v39, %v5949_v32  ;;  %v6056_v21 = vadd.f32 %v11371_v1, %v11374_v40  ;;  %v6116_v32 = vpop.permute.xlu0 %6115 }
 0xa80   :  { %v11388_v27 = vadd.f32 %v6049_v62, %v11978_v28  ;;  %v54_v28 = vld [vmem:[%s11550_s3 + $0x18] sm:$0xff] }
 0xa81   :  { %v11385_v33 = vadd.f32 %v6044_v23, %v11977_v44  ;;  %v53_v44 = vld [vmem:[%s11550_s3 + $0x10] sm:$0xff] }
 0xa83   :  { %v6057_v14 = vadd.f32 %v6056_v21, %v11385_v33  ;;  %v6120_v54 = vpop.permute.xlu0 %6119  ;;  %v52_v21 = vld [vmem:[%s11550_s3 + $0x8] sm:$0xff] }
 0xa85   :  { %v6058_v26 = vadd.f32 %v6057_v14, %v11388_v27  ;;  %v55_v14 = vld [vmem:[%s11550_s3 + $0x20] sm:$0xff] }
 0xa87   :  { %v6059_v17 = vrot.slane %v6058_v26, 4 }
 0xa89   :  { %v6060_v43 = vadd.f32 %v6059_v17, %v6058_v26  ;;  %v58_v26 = vld [vmem:[%s11550_s3 + $0x38] sm:$0xff]  ;;  %v59_v17 = vld [vmem:[%s11550_s3 + $0x40] sm:$0xff] }
 0xa8b   :  { %v6061_v52 = vrot.slane %v6060_v43, 2 }
 0xa8d   :  { %v6062_v9 = vadd.f32 %v6061_v52, %v6060_v43  ;;  %v60_v43 = vld [vmem:[%s11550_s3 + $0x48] sm:$0xff]  ;;  %v61_v52 = vld [vmem:[%s11550_s3 + $0x50] sm:$0xff] }
 0xa8f   :  { %v6063_v42 = vrot.slane %v6062_v9, 1 }
 0xa91   :  { %v6064_v48 = vadd.f32 %v6063_v42, %v6062_v9  ;;  %v62_v9 = vld [vmem:[%s11550_s3 + $0x58] sm:$0xff]  ;;  %v63_v42 = vld [vmem:[%s11550_s3 + $0x60] sm:$0xff] }
 0xa93   :  { %v6065_v20 = vmul.f32 0.03125, %v6064_v48  ;;  %v64_v48 = vld [vmem:[%s11550_s3 + $0x68] sm:$0xff] }
 0xa95   :  { %v6068_v6 = vsub.f32 %v11385_v33, %v6065_v20  ;;  %v6066_v47 = vsub.f32 %v11374_v40, %v6065_v20  ;;  %v6067_v24 = vsub.f32 %v11371_v1, %v6065_v20  ;;  %v6069_v5 = vsub.f32 %v11388_v27, %v6065_v20  ;;  %v65_v20 = vld [vmem:[%s11550_s3 + $0x70] sm:$0xff] }
 0xa97   :  { %v6070_v29 = vmul.f32 %v6066_v47, %v6066_v47  ;;  %v6071_v38 = vmul.f32 %v6067_v24, %v6067_v24  ;;  %v6072_v25 = vmul.f32 %v6068_v6, %v6068_v6  ;;  %v6073_v51 = vmul.f32 %v6069_v5, %v6069_v5 }
 0xa99   :  { %v6074_v8 = vadd.f32 %v6071_v38, %v6070_v29  ;;  %v6132_v29 = vpop.permute.xlu0 %6131  ;;  %v6136_v38 = vpop.permute.xlu1 %6135 }
 0xa9b   :  { %v6075_v35 = vadd.f32 %v6074_v8, %v6072_v25 }
 0xa9d   :  { %v6076_v56 = vadd.f32 %v6075_v35, %v6073_v51  ;;  %v6144_v25 = vpop.permute.xlu0 %6143  ;;  %v6140_v8 = vpop.permute.xlu1 %6139 }
 0xa9f   :  { %v6077_v13 = vrot.slane %v6076_v56, 4 }
 0xaa1   :  { %v6078_v15 = vadd.f32 %v6077_v13, %v6076_v56  ;;  %v6152_v51 = vpop.permute.xlu0 %6151  ;;  %v6148_v35 = vpop.permute.xlu1 %6147 }
 0xaa3   :  { %v6079_v60 = vrot.slane %v6078_v15, 2 }
 0xaa5   :  { %v6080_v11 = vadd.f32 %v6079_v60, %v6078_v15 }
 0xaa7   :  { %v6081_v34 = vrot.slane %v6080_v11, 1 }
 0xaa9   :  { %v6082_v36 = vadd.f32 %v6081_v34, %v6080_v11  ;;  %v6160_v11 = vpop.permute.xlu0 %6159 }
 0xaab   :  { %v6083_v16 = vmul.f32 0.03125, %v6082_v36  ;;  %v6156_v36 = vpop.permute.xlu1 %6155 }
 0xaad   :  { %v6084_v58 = vadd.f32 1e-05, %v6083_v16 }
 0xaaf   :  { %8859 = vrsqrt.f32 %v6084_v58 }
 0xab9   :  { %v8860_v2 = vpop.eup %8859 }
 0xaba   :  { %v6087_v31 = vmul.f32 %v8860_v2, %v6067_v24  ;;  %v6088_v7 = vmul.f32 %v8860_v2, %v6068_v6  ;;  %v6086_v50 = vmul.f32 %v8860_v2, %v6066_v47  ;;  %v6089_v55 = vmul.f32 %v8860_v2, %v6069_v5  ;;  %v66_v6 = vld [vmem:[%s11550_s3 + $0x78] sm:$0xff]  ;;  %v67_v47 = vld [vmem:[%s11551_s4] sm:$0xff]  ;;  %v69_v24 = vld [vmem:[%s11551_s4 + $0x10] sm:$0xff]  ;;  %v6164_v2 = vpop.permute.xlu1 %6163 }
 0xabb   :  { %7951 = vmatprep.mubr.f32.mxu0 %v67_v47  ;;  %v8920_v5 = vmov 7  }
 0xabc   :  { %v6107_v19 = vmul.f32 %v6096_v22, %v6087_v31  ;;  %v6108_v59 = vmul.f32 %v6100_v12, %v6088_v7  ;;  %v6106_v46 = vmul.f32 %v6092_v0, %v6086_v50  ;;  %v6109_v10 = vmul.f32 %v6104_v53, %v6089_v55  ;;  %8343 = vset.pattern.permute.xlu1 %v8920_v5  ;;  %v6168_v53 = vpop.permute.xlu0 %6167 }
 0xabd   :  { %8344 = vset.pattern.permute.xlu0 %v8920_v5  ;;  %6468 = vperm.xlu1 %8343, %v11281_v61  }
 0xabe   :  { %v6126_v63 = vadd.f32 %v6112_v45, %v6106_v46  ;;  %v6127_v39 = vadd.f32 %v6116_v32, %v6107_v19  ;;  %v6129_v62 = vadd.f32 %v6124_v49, %v6109_v10  ;;  %v6128_v23 = vadd.f32 %v6120_v54, %v6108_v59  ;;  %6472 = vperm.xlu0 %8344, %v11287_v4  }
 0xac0   :  { %v8237_v41 = vpack.c.bf16 %v6127_v39, %v6126_v63  ;;  %v8241_v18 = vpack.c.bf16 %v6129_v62, %v6128_v23  ;;  %v6176_v10 = vpop.permute.xlu0 %6175 }
 0xac1   :  { %6476 = vperm.xlu1 %8343, %v11293_v3  }
 0xac2   :  { %8238 = vmatprep.subr.bf16.mxu1 %v8237_v41 }
 0xac3   :  { %8240 = vmatpush3.bf16.msra.mxu1 %v8237_v41  ;;  %v6172_v41 = vpop.permute.xlu1 %6171 }
 0xac4   :  { %8242 = vmatprep.subr.bf16.mxu1 %v8241_v18 }
 0xac5   :  { %6480 = vperm.xlu1 %8343, %v11300_v30  }
 0xac7   :  { %8244 = vmatpush3.bf16.msra.mxu1 %v8241_v18 }
 0xaca   :  { %7896 = vmatmul.mubr.msk.f32.vlgmr.msra.gmra.mrb[96].mxu1 %vm320_vm0, %v52_v21 }
 0xacb   :  { %7898 = vmatprep.mubr.msk.f32.mxu1 %vm320_vm0, %v53_v44 }
 0xace   :  { %7899 = vmatmul.mubr.msk.f32.gmra.mrb[98].mxu1 %vm320_vm0, %v54_v28 }
 0xacf   :  { %7901 = vmatprep.mubr.msk.f32.mxu1 %vm320_vm0, %v55_v14 }
 0xad2   :  { %7902 = vmatmul.mubr.msk.f32.gmra.mrb[100].mxu1 %vm320_vm0, %v56_v37 }
 0xad3   :  { %7904 = vmatprep.mubr.msk.f32.mxu1 %vm320_vm0, %v57_v57 }
 0xad6   :  { %7905 = vmatmul.mubr.msk.f32.gmra.mrb[102].mxu1 %vm320_vm0, %v58_v26 }
 0xad7   :  { %7907 = vmatprep.mubr.msk.f32.mxu1 %vm320_vm0, %v59_v17 }
 0xada   :  { %7908 = vmatmul.mubr.msk.f32.gmra.mrb[104].mxu1 %vm320_vm0, %v60_v43 }
 0xadb   :  { %7910 = vmatprep.mubr.msk.f32.mxu1 %vm320_vm0, %v61_v52 }
 0xade   :  { %7911 = vmatmul.mubr.msk.f32.gmra.mrb[106].mxu1 %vm320_vm0, %v62_v9 }
 0xadf   :  { %7913 = vmatprep.mubr.msk.f32.mxu1 %vm320_vm0, %v63_v42 }
 0xae2   :  { %7914 = vmatmul.mubr.msk.f32.gmra.mrb[108].mxu1 %vm320_vm0, %v64_v48 }
 0xae3   :  { %7916 = vmatprep.mubr.msk.f32.mxu1 %vm320_vm0, %v65_v20 }
 0xae6   :  { %7917 = vmatmul.mubr.msk.f32.gmra.mrb[110].mxu1 %vm320_vm0, %v66_v6 }
 0xae7   :  { %7954 = vmatprep.mubr.f32.mxu1 %v69_v24 }
 0xb9d   :  { %v7897_v56 = vpop.f32.mrb[96].mxu1 }
 0xb9e   :  { %v6314_v13 = vadd.f32 %v7897_v56, %v6136_v38  ;;  %v6308_v15 = vpop.f32.mrb[97].mxu1 }
 0xb9f   :  { %v6309_v22 = vadd.f32 %v6308_v15, %v6132_v29  ;;  %v6184_v29 = vpop.permute.xlu0 %6183 }
 0xba0   :  { %v6404_v60 = vmul.f32 0.70710677, %v6314_v13  ;;  %v6388_v63 = vmul.f32 0.5, %v6314_v13 }
 0xba1   :  { %v6403_v34 = vmul.f32 0.70710677, %v6309_v22  ;;  %v7900_v61 = vpop.f32.mrb[98].mxu1  ;;  %v6387_v18 = vmul.f32 0.5, %v6309_v22 }
 0xba2   :  { %8861 = verf.f32 %v6404_v60  ;;  %v6324_v4 = vadd.f32 %v7900_v61, %v6144_v25  ;;  %v6318_v3 = vpop.f32.mrb[99].mxu1 }
 0xba3   :  { %8863 = verf.f32 %v6403_v34  ;;  %v6319_v30 = vadd.f32 %v6318_v3, %v6140_v8 }
 0xba4   :  { %v6406_v45 = vmul.f32 0.70710677, %v6324_v4  ;;  %v6390_v52 = vmul.f32 0.5, %v6324_v4 }
 0xba5   :  { %v6405_v16 = vmul.f32 0.70710677, %v6319_v30  ;;  %v7903_v58 = vpop.f32.mrb[100].mxu1  ;;  %v6389_v42 = vmul.f32 0.5, %v6319_v30 }
 0xba6   :  { %8865 = verf.f32 %v6406_v45  ;;  %v6334_v12 = vadd.f32 %v7903_v58, %v6152_v51  ;;  %v6328_v0 = vpop.f32.mrb[101].mxu1  ;;  %v6180_v51 = vpop.permute.xlu1 %6179 }
 0xba7   :  { %8867 = verf.f32 %v6405_v16  ;;  %v6329_v32 = vadd.f32 %v6328_v0, %v6148_v35 }
 0xba8   :  { %v6408_v31 = vmul.f32 0.70710677, %v6334_v12  ;;  %v6392_v15 = vmul.f32 0.5, %v6334_v12 }
 0xba9   :  { %v6407_v7 = vmul.f32 0.70710677, %v6329_v32  ;;  %v7906_v50 = vpop.f32.mrb[102].mxu1  ;;  %v6391_v60 = vmul.f32 0.5, %v6329_v32 }
 0xbaa   :  { %8869 = verf.f32 %v6408_v31  ;;  %v11472_v55 = vadd.f32 %v7906_v50, %v6160_v11  ;;  %v6338_v49 = vpop.f32.mrb[103].mxu1 }
 0xbab   :  { %8871 = verf.f32 %v6407_v7  ;;  %v11474_v54 = vadd.f32 %v6338_v49, %v6156_v36  ;;  %v6188_v49 = vpop.permute.xlu1 %6187 }
 0xbac   :  { %v8862_v19 = vpop.eup %8861  ;;  %v6410_v59 = vmul.f32 0.70710677, %v11472_v55  ;;  %v6394_v32 = vmul.f32 0.5, %v11472_v55 }
 0xbad   :  { %v8864_v46 = vpop.eup %8863  ;;  %v6436_v39 = vadd.f32 1.0, %v8862_v19  ;;  %v6409_v62 = vmul.f32 0.70710677, %v11474_v54  ;;  %v7909_v23 = vpop.f32.mrb[104].mxu1  ;;  %v6393_v31 = vmul.f32 0.5, %v11474_v54 }
 0xbae   :  { %v6435_v21 = vadd.f32 1.0, %v8864_v46  ;;  %8873 = verf.f32 %v6410_v59  ;;  %v11478_v44 = vadd.f32 %v7909_v23, %v6168_v53  ;;  %v6348_v28 = vpop.f32.mrb[105].mxu1  ;;  %v6192_v53 = vpop.permute.xlu0 %6191 }
 0xbaf   :  { %v6452_v14 = vmul.f32 %v6436_v39, %v6388_v63  ;;  %8875 = verf.f32 %v6409_v62  ;;  %v11480_v37 = vadd.f32 %v6348_v28, %v6164_v2 }
 0xbb0   :  { %v8866_v57 = vpop.eup %8865  ;;  %v6451_v26 = vmul.f32 %v6435_v21, %v6387_v18  ;;  %v6412_v17 = vmul.f32 0.70710677, %v11478_v44 }
 0xbb1   :  { %v8868_v43 = vpop.eup %8867  ;;  %v6438_v9 = vadd.f32 1.0, %v8866_v57  ;;  %v6411_v48 = vmul.f32 0.70710677, %v11480_v37  ;;  %v7912_v20 = vpop.f32.mrb[106].mxu1 }
 0xbb2   :  { %v8245_v6 = vpack.c.bf16 %v6452_v14, %v6451_v26  ;;  %v6437_v47 = vadd.f32 1.0, %v8868_v43  ;;  %8877 = verf.f32 %v6412_v17  ;;  %v11484_v24 = vadd.f32 %v7912_v20, %v6176_v10  ;;  %v6358_v5 = vpop.f32.mrb[107].mxu1 }
 0xbb3   :  { %v6454_v38 = vmul.f32 %v6438_v9, %v6390_v52  ;;  %8879 = verf.f32 %v6411_v48  ;;  %v11486_v25 = vadd.f32 %v6358_v5, %v6172_v41  ;;  %v6396_v41 = vmul.f32 0.5, %v11478_v44 }
 0xbb4   :  { %v8870_v8 = vpop.eup %8869  ;;  %v6453_v35 = vmul.f32 %v6437_v47, %v6389_v42  ;;  %v6414_v56 = vmul.f32 0.70710677, %v11484_v24  ;;  %8246 = vmatprep.subr.bf16.mxu0 %v8245_v6  ;;  %8277 = vmatprep.subr.bf16.mxu1 %v8245_v6  ;;  %v6395_v14 = vmul.f32 0.5, %v11480_v37  ;;  %v6398_v9 = vmul.f32 0.5, %v11484_v24 }
 0xbb5   :  { %v8872_v13 = vpop.eup %8871  ;;  %v6440_v22 = vadd.f32 1.0, %v8870_v8  ;;  %v6413_v11 = vmul.f32 0.70710677, %v11486_v25  ;;  %v7915_v34 = vpop.f32.mrb[108].mxu1  ;;  %8248 = vmatpush3.bf16.msra.mxu0 %v8245_v6  ;;  %8285 = vmatpush3.bf16.msra.mxu1 %v8245_v6  ;;  %v6397_v48 = vmul.f32 0.5, %v11486_v25 }
 0xbb6   :  { %v8249_v61 = vpack.c.bf16 %v6454_v38, %v6453_v35  ;;  %v6439_v36 = vadd.f32 1.0, %v8872_v13  ;;  %8881 = verf.f32 %v6414_v56  ;;  %v6374_v4 = vadd.f32 %v7915_v34, %v6184_v29  ;;  %v6368_v3 = vpop.f32.mrb[109].mxu1 }
 0xbb7   :  { %v6456_v30 = vmul.f32 %v6440_v22, %v6392_v15  ;;  %8883 = verf.f32 %v6413_v11  ;;  %v11490_v45 = vadd.f32 %v6368_v3, %v6180_v51  ;;  %v68_v3 = vld [vmem:[%s11551_s4 + $0x8] sm:$0xff] }
 0xbb8   :  { %v8874_v16 = vpop.eup %8873  ;;  %v6455_v58 = vmul.f32 %v6439_v36, %v6391_v60  ;;  %v6416_v0 = vmul.f32 0.70710677, %v6374_v4  ;;  %8250 = vmatprep.subr.bf16.mxu0 %v8249_v61  ;;  %8278 = vmatprep.subr.bf16.mxu1 %v8249_v61  ;;  %v6400_v29 = vmul.f32 0.5, %v6374_v4 }
 0xbb9   :  { %v8876_v12 = vpop.eup %8875  ;;  %v6442_v2 = vadd.f32 1.0, %v8874_v16  ;;  %v6415_v7 = vmul.f32 0.70710677, %v11490_v45  ;;  %v7918_v50 = vpop.f32.mrb[110].mxu1  ;;  %8252 = vmatpush3.bf16.msra.mxu0 %v8249_v61  ;;  %8286 = vmatpush3.bf16.msra.mxu1 %v8249_v61  ;;  %v6399_v24 = vmul.f32 0.5, %v11490_v45 }
 0xbba   :  { %v8253_v19 = vpack.c.bf16 %v6456_v30, %v6455_v58  ;;  %v6441_v59 = vadd.f32 1.0, %v8876_v12  ;;  %8885 = verf.f32 %v6416_v0  ;;  %v6384_v46 = vadd.f32 %v7918_v50, %v6192_v53  ;;  %v6378_v10 = vpop.f32.mrb[111].mxu1  ;;  %v70_v30 = vld [vmem:[%s11551_s4 + $0x18] sm:$0xff]  ;;  %v6469_v45 = vpop.permute.xlu1 %6468 }
 0xbbb   :  { %v6458_v63 = vmul.f32 %v6442_v2, %v6394_v32  ;;  %8887 = verf.f32 %v6415_v7  ;;  %v6379_v39 = vadd.f32 %v6378_v10, %v6188_v49  ;;  %v6473_v58 = vpop.permute.xlu0 %6472 }
 0xbbc   :  { %v8878_v62 = vpop.eup %8877  ;;  %v6457_v23 = vmul.f32 %v6441_v59, %v6393_v31  ;;  %v6418_v55 = vmul.f32 0.70710677, %v6384_v46  ;;  %8254 = vmatprep.subr.bf16.mxu0 %v8253_v19  ;;  %8279 = vmatprep.subr.bf16.mxu1 %v8253_v19  ;;  %v6402_v15 = vmul.f32 0.5, %v6384_v46 }
 0xbbd   :  { %v8880_v54 = vpop.eup %8879  ;;  %v6444_v18 = vadd.f32 1.0, %v8878_v62  ;;  %v6417_v21 = vmul.f32 0.70710677, %v6379_v39  ;;  %8256 = vmatpush3.bf16.msra.mxu0 %v8253_v19  ;;  %8287 = vmatpush3.bf16.msra.mxu1 %v8253_v19  ;;  %v6401_v11 = vmul.f32 0.5, %v6379_v39 }
 0xbbe   :  { %v8257_v28 = vpack.c.bf16 %v6458_v63, %v6457_v23  ;;  %v6443_v57 = vadd.f32 1.0, %v8880_v54  ;;  %8889 = verf.f32 %v6418_v55  ;;  %v6477_v16 = vpop.permute.xlu1 %6476 }
 0xbbf   :  { %v6460_v26 = vmul.f32 %v6444_v18, %v6396_v41  ;;  %8891 = verf.f32 %v6417_v21 }
 0xbc0   :  { %v8882_v17 = vpop.eup %8881  ;;  %v6459_v43 = vmul.f32 %v6443_v57, %v6395_v14  ;;  %8258 = vmatprep.subr.bf16.mxu0 %v8257_v28  ;;  %8280 = vmatprep.subr.bf16.mxu1 %v8257_v28 }
 0xbc1   :  { %v8884_v52 = vpop.eup %8883  ;;  %v6446_v42 = vadd.f32 1.0, %v8882_v17  ;;  %8260 = vmatpush3.bf16.msra.mxu0 %v8257_v28  ;;  %8288 = vmatpush3.bf16.msra.mxu1 %v8257_v28 }
 0xbc2   :  { %v8261_v44 = vpack.c.bf16 %v6460_v26, %v6459_v43  ;;  %v6445_v20 = vadd.f32 1.0, %v8884_v52  ;;  %v6481_v0 = vpop.permute.xlu1 %6480 }
 0xbc3   :  { %v6462_v6 = vmul.f32 %v6446_v42, %v6398_v9 }
 0xbc4   :  { %v8886_v37 = vpop.eup %8885  ;;  %v6461_v47 = vmul.f32 %v6445_v20, %v6397_v48  ;;  %8262 = vmatprep.subr.bf16.mxu0 %v8261_v44  ;;  %8281 = vmatprep.subr.bf16.mxu1 %v8261_v44 }
 0xbc5   :  { %v8888_v5 = vpop.eup %8887  ;;  %v6448_v38 = vadd.f32 1.0, %v8886_v37  ;;  %8264 = vmatpush3.bf16.msra.mxu0 %v8261_v44  ;;  %8289 = vmatpush3.bf16.msra.mxu1 %v8261_v44 }
 0xbc6   :  { %v8265_v8 = vpack.c.bf16 %v6462_v6, %v6461_v47  ;;  %v6447_v51 = vadd.f32 1.0, %v8888_v5 }
 0xbc7   :  { %v6464_v35 = vmul.f32 %v6448_v38, %v6400_v29 }
 0xbc8   :  { %v8890_v56 = vpop.eup %8889  ;;  %v6463_v13 = vmul.f32 %v6447_v51, %v6399_v24  ;;  %8266 = vmatprep.subr.bf16.mxu0 %v8265_v8  ;;  %8282 = vmatprep.subr.bf16.mxu1 %v8265_v8 }
 0xbc9   :  { %v8892_v25 = vpop.eup %8891  ;;  %v6450_v22 = vadd.f32 1.0, %v8890_v56  ;;  %8268 = vmatpush3.bf16.msra.mxu0 %v8265_v8  ;;  %8290 = vmatpush3.bf16.msra.mxu1 %v8265_v8 }
 0xbca   :  { %v8269_v60 = vpack.c.bf16 %v6464_v35, %v6463_v13  ;;  %v6449_v34 = vadd.f32 1.0, %v8892_v25 }
 0xbcb   :  { %v6466_v61 = vmul.f32 %v6450_v22, %v6402_v15 }
 0xbcc   :  { %v6465_v36 = vmul.f32 %v6449_v34, %v6401_v11  ;;  %8270 = vmatprep.subr.bf16.mxu0 %v8269_v60  ;;  %8283 = vmatprep.subr.bf16.mxu1 %v8269_v60 }
 0xbcd   :  { %8272 = vmatpush3.bf16.msra.mxu0 %v8269_v60  ;;  %8291 = vmatpush3.bf16.msra.mxu1 %v8269_v60 }
 0xbce   :  { %v8273_v4 = vpack.c.bf16 %v6466_v61, %v6465_v36 }
 0xbd0   :  { %8274 = vmatprep.subr.bf16.mxu0 %v8273_v4  ;;  %8284 = vmatprep.subr.bf16.mxu1 %v8273_v4 }
 0xbd1   :  { %8276 = vmatpush3.bf16.msra.mxu0 %v8273_v4  ;;  %8292 = vmatpush3.bf16.msra.mxu1 %v8273_v4 }
 0xbd4   :  { %7952 = vmatmul.mubr.f32.vlgmr.msra.gmra.mrb[92].mxu0 %v68_v3  ;;  %7955 = vmatmul.mubr.f32.vlgmr.msra.gmra.mrb[112].mxu1 %v70_v30 }
 0xca7   :  { %v7953_v12 = vpop.f32.mrb[92].mxu0  ;;  %v7956_v53 = vpop.f32.mrb[112].mxu1 }
 0xca8   :  { %v6555_v32 = vadd.f32 %v7953_v12, %v6473_v58  ;;  %v6565_v2 = vadd.f32 %v7956_v53, %v6481_v0  ;;  %v6549_v31 = vpop.f32.mrb[93].mxu0  ;;  %v6559_v7 = vpop.f32.mrb[113].mxu1 }
 0xca9   :  { %v6550_v50 = vadd.f32 %v6549_v31, %v6469_v45  ;;  %v6560_v49 = vadd.f32 %v6559_v7, %v6477_v16 }
 0xcaa   :  { %v6569_v19 = vadd.f32 %v6555_v32, %v11371_v1  ;;  %v6571_v59 = vadd.f32 %v6565_v2, %v11388_v27 }
 0xcab   :  { %v6568_v46 = vadd.f32 %v6550_v50, %v11374_v40  ;;  %v6570_v10 = vadd.f32 %v6560_v49, %v11385_v33 }
 0xcac   :  { %6573 = vst.msk [vmem:[%s11552_s6 + $0x8] sm:$0xff] %vm120_vm1, %v6569_v19  ;;  %6575 = vst.msk [vmem:[%s11552_s6 + $0x18] sm:$0xff] %vm120_vm1, %v6571_v59  ;;  %6582 = vrot.lane.b32.xlu1 %v6569_v19, %s8910_s25 }
 0xcad   :  { %6572 = vst.msk [vmem:[%s11552_s6] sm:$0xff] %vm120_vm1, %v6568_v46  ;;  %6574 = vst.msk [vmem:[%s11552_s6 + $0x10] sm:$0xff] %vm120_vm1, %v6570_v10  ;;  %6580 = vrot.lane.b32.xlu0 %v6568_v46, %s8910_s25 }
 0xcb0   :  { %6586 = vrot.lane.b32.xlu1 %v6571_v59, %s8910_s25 }
 0xcb1   :  { %6584 = vrot.lane.b32.xlu0 %v6570_v10, %s8910_s25 }
 0xd1e   :  { %v6583_v1 = vpop.permute.xlu1 %6582 }
 0xd1f   :  { %6922 = vst.msk [vmem:[%s11552_s6 + $0x28] sm:$0xff] %vm120_vm1, %v6583_v1  ;;  %v6581_v40 = vpop.permute.xlu0 %6580 }
 0xd20   :  { %6921 = vst.msk [vmem:[%s11552_s6 + $0x20] sm:$0xff] %vm120_vm1, %v6581_v40 }
 0xd22   :  { %v6587_v33 = vpop.permute.xlu1 %6586 }
 0xd23   :  { %6924 = vst.msk [vmem:[%s11552_s6 + $0x38] sm:$0xff] %vm120_vm1, %v6587_v33  ;;  %v6585_v27 = vpop.permute.xlu0 %6584 }
 0xd24   :  { %6923 = vst.msk [vmem:[%s11552_s6 + $0x30] sm:$0xff] %vm120_vm1, %v6585_v27 }

</bundles_post_ra>
